<compile_context>
chip_gen: v6e
topology: v6e:2x2x1
jax: 0.10.0
libtpu: 0.0.40
codegen_flags: <defaults>
</compile_context>

<pallas_src>
import functools

import jax
import jax.numpy as jnp
from jax.experimental import pallas as pl
from jax.experimental.pallas import tpu as pltpu

IMG_SIZE = 28
D_IN = IMG_SIZE * IMG_SIZE   # 784
H1 = 1024
H2 = 512
D_OUT = 10
D_OUT_PAD = 128              # pad fc3 output to one full lane width


def _round_up(x, m):
    return ((x + m - 1) // m) * m


def mlp_kernel(x_ref, w1_ref, b1_ref, w2_ref, b2_ref, w3_ref, b3_ref, o_ref):
    # One batch tile per grid step; all 3 matmuls + biases + 2 ReLUs fused.
    # Weights are VMEM-resident (constant index_map); accumulate in f32.
    x = x_ref[...]                                                       # (TB, 784)
    h1 = jnp.dot(x, w1_ref[...], preferred_element_type=jnp.float32)     # (TB, 1024)
    h1 = jnp.maximum(h1 + b1_ref[...], 0.0)
    h2 = jnp.dot(h1.astype(w2_ref.dtype), w2_ref[...],
                 preferred_element_type=jnp.float32)                     # (TB, 512)
    h2 = jnp.maximum(h2 + b2_ref[...], 0.0)
    out = jnp.dot(h2.astype(w3_ref.dtype), w3_ref[...],
                  preferred_element_type=jnp.float32)                    # (TB, 128)
    o_ref[...] = (out + b3_ref[...]).astype(o_ref.dtype)


@functools.partial(jax.jit, static_argnames=("tb", "compute_dtype"))
def net_forward(x_nchw, params, *, tb=256, compute_dtype=jnp.bfloat16):
    """Forward pass of Net. x_nchw: (B, 1, 28, 28) float32 -> (B, 10) float32."""
    w1, b1, w2, b2, w3, b3 = params
    B = x_nchw.shape[0]
    x = x_nchw.reshape(B, D_IN)                       # == torch x.view(-1, 784)

    # Cast matmul operands to the compute dtype; biases stay f32.
    x = x.astype(compute_dtype)
    w1 = w1.astype(compute_dtype)
    w2 = w2.astype(compute_dtype)
    w3 = w3.astype(compute_dtype)
    b1 = b1.astype(jnp.float32)
    b2 = b2.astype(jnp.float32)
    b3 = b3.astype(jnp.float32)

    # Pad fc3 to a full 128-lane output (unmasked final store); slice later.
    w3p = jnp.zeros((H2, D_OUT_PAD), compute_dtype).at[:, :D_OUT].set(w3)
    b3p = jnp.zeros((1, D_OUT_PAD), jnp.float32).at[:, :D_OUT].set(b3)

    # Batch tiling: clamp TB for small batches, pad B to a multiple of TB.
    tb_eff = min(tb, max(8, _round_up(B, 8)))
    B_pad = _round_up(B, tb_eff)
    if B_pad != B:
        x = jnp.pad(x, ((0, B_pad - B), (0, 0)))      # zero tail rows, sliced off below
    nb = B_pad // tb_eff

    itemsize = jnp.dtype(compute_dtype).itemsize
    n_w = D_IN * H1 + H1 * H2 + H2 * D_OUT_PAD
    cost = pl.CostEstimate(
        flops=2 * B_pad * n_w,
        transcendentals=0,
        bytes_accessed=(B_pad * D_IN * itemsize            # x
                        + n_w * itemsize                    # weights
                        + (H1 + H2 + D_OUT_PAD) * 4         # biases
                        + B_pad * D_OUT_PAD * 4),           # out
    )

    wspec = lambda shape: pl.BlockSpec(shape, lambda i: (0, 0))  # resident across tiles
    out_pad = pl.pallas_call(
        mlp_kernel,
        out_shape=jax.ShapeDtypeStruct((B_pad, D_OUT_PAD), jnp.float32),
        grid=(nb,),
        in_specs=[
            pl.BlockSpec((tb_eff, D_IN), lambda i: (i, 0)),      # x tile (pipelined)
            wspec((D_IN, H1)), wspec((1, H1)),
            wspec((H1, H2)),   wspec((1, H2)),
            wspec((H2, D_OUT_PAD)), wspec((1, D_OUT_PAD)),
        ],
        out_specs=pl.BlockSpec((tb_eff, D_OUT_PAD), lambda i: (i, 0)),
        compiler_params=pltpu.CompilerParams(
            dimension_semantics=("parallel",),   # shard batch tiles across v7x's 2 TCs
            vmem_limit_bytes=32 << 20,           # safe on v5e/v6e/v7x, plenty of headroom
        ),
        cost_estimate=cost,
    )(x, w1, b1, w2, b2, w3p, b3p)

    return out_pad[:B, :D_OUT]


def init_params(key):
    """Deterministic PyTorch-style Linear init: U(-1/sqrt(fan_in), 1/sqrt(fan_in)).
    Weights returned pre-transposed to (in, out)."""
    def linear(key, fan_in, fan_out):
        kw, kb = jax.random.split(key)
        bound = 1.0 / jnp.sqrt(jnp.float32(fan_in))
        w = jax.random.uniform(kw, (fan_in, fan_out), jnp.float32, -bound, bound)
        b = jax.random.uniform(kb, (1, fan_out), jnp.float32, -bound, bound)
        return w, b

    k1, k2, k3 = jax.random.split(key, 3)
    w1, b1 = linear(k1, D_IN, H1)
    w2, b2 = linear(k2, H1, H2)
    w3, b3 = linear(k3, H2, D_OUT)
    return (w1, b1, w2, b2, w3, b3)


def net_forward_ref(x_nchw, params, compute_dtype=jnp.float32):
    """Plain-JAX reference (same operand dtypes, f32 accumulation)."""
    w1, b1, w2, b2, w3, b3 = params
    x = x_nchw.reshape(x_nchw.shape[0], D_IN).astype(compute_dtype)
    w1, w2, w3 = (w.astype(compute_dtype) for w in (w1, w2, w3))
    h1 = jnp.maximum(jnp.dot(x, w1, preferred_element_type=jnp.float32) + b1, 0.0)
    h2 = jnp.maximum(
        jnp.dot(h1.astype(compute_dtype), w2, preferred_element_type=jnp.float32) + b2, 0.0)
    return jnp.dot(h2.astype(compute_dtype), w3, preferred_element_type=jnp.float32) + b3


if __name__ == "__main__":
    key = jax.random.PRNGKey(0)
    kx, kp = jax.random.split(key)

    # Small deterministic example input, NCHW like the PyTorch module expects.
    B = 2
    x = jax.random.normal(kx, (B, 1, IMG_SIZE, IMG_SIZE), jnp.float32)
    params = init_params(kp)

    # f32 path: tight check against the plain-JAX reference.
    out_f32 = jax.block_until_ready(net_forward(x, params, compute_dtype=jnp.float32))
    ref_f32 = net_forward_ref(x, params, jnp.float32)
    assert out_f32.shape == (B, D_OUT), out_f32.shape
    assert jnp.allclose(out_f32, ref_f32, atol=1e-4, rtol=1e-4), "f32 mismatch vs reference"

    # bf16 path (default; halves weight HBM traffic): check vs matching-precision ref.
    out_bf16 = jax.block_until_ready(net_forward(x, params))
    ref_bf16 = net_forward_ref(x, params, jnp.bfloat16)
    assert out_bf16.shape == (B, D_OUT), out_bf16.shape
    assert jnp.allclose(out_bf16, ref_bf16, atol=1e-2, rtol=1e-2), "bf16 mismatch vs reference"

    # Larger, non-tile-aligned batch: exercises multi-step grid + tail padding.
    B2 = 300
    x2 = jax.random.normal(kx, (B2, 1, IMG_SIZE, IMG_SIZE), jnp.float32)
    out2 = jax.block_until_ready(net_forward(x2, params))
    ref2 = net_forward_ref(x2, params, jnp.bfloat16)
    assert out2.shape == (B2, D_OUT), out2.shape
    assert jnp.allclose(out2, ref2, atol=1e-2, rtol=1e-2), "batched bf16 mismatch vs reference"

    print("KERNEL_OK")
</pallas_src>

<mosaic_0001>
module attributes {stable_mosaic.version = 11 : i64} {
  func.func @mlp_kernel(%arg0: i32, %arg1: memref<8x784xf32, #tpu.memory_space<vmem>>, %arg2: memref<784x1024xf32, #tpu.memory_space<vmem>>, %arg3: memref<1x1024xf32, #tpu.memory_space<vmem>>, %arg4: memref<1024x512xf32, #tpu.memory_space<vmem>>, %arg5: memref<1x512xf32, #tpu.memory_space<vmem>>, %arg6: memref<512x128xf32, #tpu.memory_space<vmem>>, %arg7: memref<1x128xf32, #tpu.memory_space<vmem>>, %arg8: memref<8x128xf32, #tpu.memory_space<vmem>>) attributes {dimension_semantics = [#tpu.dimension_semantics<parallel>], iteration_bounds = array<i64: 1>, scalar_prefetch = 0 : i64, scratch_operands = 0 : i64, tpu.core_type = #tpu.core_type<tc>, window_params = [{transform_indices = @transform_0, window_bounds = array<i64: 8, 784>}, {pipeline_mode = #tpu.pipeline_mode<synchronous>, transform_indices = @transform_1, window_bounds = array<i64: 784, 1024>}, {pipeline_mode = #tpu.pipeline_mode<synchronous>, transform_indices = @transform_2, window_bounds = array<i64: 1, 1024>}, {pipeline_mode = #tpu.pipeline_mode<synchronous>, transform_indices = @transform_3, window_bounds = array<i64: 1024, 512>}, {pipeline_mode = #tpu.pipeline_mode<synchronous>, transform_indices = @transform_4, window_bounds = array<i64: 1, 512>}, {pipeline_mode = #tpu.pipeline_mode<synchronous>, transform_indices = @transform_5, window_bounds = array<i64: 512, 128>}, {pipeline_mode = #tpu.pipeline_mode<synchronous>, transform_indices = @transform_6, window_bounds = array<i64: 1, 128>}, {transform_indices = @transform_7, window_bounds = array<i64: 8, 128>}]} {
    %c0 = arith.constant 0 : index
    %c0_0 = arith.constant 0 : index
    %0 = vector.load %arg1[%c0, %c0_0] : memref<8x784xf32, #tpu.memory_space<vmem>>, vector<8x784xf32>
    %c0_1 = arith.constant 0 : index
    %c0_2 = arith.constant 0 : index
    %1 = vector.load %arg2[%c0_1, %c0_2] : memref<784x1024xf32, #tpu.memory_space<vmem>>, vector<784x1024xf32>
    %cst = arith.constant dense<0.000000e+00> : vector<8x1024xf32>
    %2 = tpu.matmul %0, %1, %cst {dimension_numbers = #tpu.dot_dimension_numbers<[1], [0], [0], [1], [0, 0, 1, 1], [], []>} : vector<8x784xf32>, vector<784x1024xf32>, vector<8x1024xf32> -> vector<8x1024xf32>
    %c0_3 = arith.constant 0 : index
    %c0_4 = arith.constant 0 : index
    %3 = vector.load %arg3[%c0_3, %c0_4] : memref<1x1024xf32, #tpu.memory_space<vmem>>, vector<1x1024xf32>
    %4 = vector.broadcast %3 : vector<1x1024xf32> to vector<8x1024xf32>
    %5 = arith.addf %2, %4 : vector<8x1024xf32>
    %cst_5 = arith.constant 0.000000e+00 : f32
    %6 = vector.broadcast %cst_5 : f32 to vector<8x1024xf32>
    %7 = arith.maximumf %5, %6 : vector<8x1024xf32>
    %c0_6 = arith.constant 0 : index
    %c0_7 = arith.constant 0 : index
    %8 = vector.load %arg4[%c0_6, %c0_7] : memref<1024x512xf32, #tpu.memory_space<vmem>>, vector<1024x512xf32>
    %cst_8 = arith.constant dense<0.000000e+00> : vector<8x512xf32>
    %9 = tpu.matmul %7, %8, %cst_8 {dimension_numbers = #tpu.dot_dimension_numbers<[1], [0], [0], [1], [0, 0, 1, 1], [], []>} : vector<8x1024xf32>, vector<1024x512xf32>, vector<8x512xf32> -> vector<8x512xf32>
    %c0_9 = arith.constant 0 : index
    %c0_10 = arith.constant 0 : index
    %10 = vector.load %arg5[%c0_9, %c0_10] : memref<1x512xf32, #tpu.memory_space<vmem>>, vector<1x512xf32>
    %11 = vector.broadcast %10 : vector<1x512xf32> to vector<8x512xf32>
    %12 = arith.addf %9, %11 : vector<8x512xf32>
    %cst_11 = arith.constant 0.000000e+00 : f32
    %13 = vector.broadcast %cst_11 : f32 to vector<8x512xf32>
    %14 = arith.maximumf %12, %13 : vector<8x512xf32>
    %c0_12 = arith.constant 0 : index
    %c0_13 = arith.constant 0 : index
    %15 = vector.load %arg6[%c0_12, %c0_13] : memref<512x128xf32, #tpu.memory_space<vmem>>, vector<512x128xf32>
    %cst_14 = arith.constant dense<0.000000e+00> : vector<8x128xf32>
    %16 = tpu.matmul %14, %15, %cst_14 {dimension_numbers = #tpu.dot_dimension_numbers<[1], [0], [0], [1], [0, 0, 1, 1], [], []>} : vector<8x512xf32>, vector<512x128xf32>, vector<8x128xf32> -> vector<8x128xf32>
    %c0_15 = arith.constant 0 : index
    %c0_16 = arith.constant 0 : index
    %17 = vector.load %arg7[%c0_15, %c0_16] : memref<1x128xf32, #tpu.memory_space<vmem>>, vector<1x128xf32>
    %18 = vector.broadcast %17 : vector<1x128xf32> to vector<8x128xf32>
    %19 = arith.addf %16, %18 : vector<8x128xf32>
    %c0_17 = arith.constant 0 : index
    %c0_18 = arith.constant 0 : index
    %20 = vector.load %arg8[%c0_17, %c0_18] : memref<8x128xf32, #tpu.memory_space<vmem>>, vector<8x128xf32>
    tpu.vector_store %arg8[%c0_17, %c0_18], %19 {strides = array<i32>} : memref<8x128xf32, #tpu.memory_space<vmem>>, vector<8x128xf32>,
    return
  }
  func.func @transform_0(%arg0: i32) -> (i32, i32) {
    %c0_i32 = arith.constant 0 : i32
    %c0_i32_0 = arith.constant 0 : i32
    return %arg0, %c0_i32 : i32, i32
  }
  func.func @transform_1(%arg0: i32) -> (i32, i32) {
    %c0_i32 = arith.constant 0 : i32
    %c0_i32_0 = arith.constant 0 : i32
    %c0_i32_1 = arith.constant 0 : i32
    return %c0_i32, %c0_i32_0 : i32, i32
  }
  func.func @transform_2(%arg0: i32) -> (i32, i32) {
    %c0_i32 = arith.constant 0 : i32
    %c0_i32_0 = arith.constant 0 : i32
    %c0_i32_1 = arith.constant 0 : i32
    return %c0_i32, %c0_i32_0 : i32, i32
  }
  func.func @transform_3(%arg0: i32) -> (i32, i32) {
    %c0_i32 = arith.constant 0 : i32
    %c0_i32_0 = arith.constant 0 : i32
    %c0_i32_1 = arith.constant 0 : i32
    return %c0_i32, %c0_i32_0 : i32, i32
  }
  func.func @transform_4(%arg0: i32) -> (i32, i32) {
    %c0_i32 = arith.constant 0 : i32
    %c0_i32_0 = arith.constant 0 : i32
    %c0_i32_1 = arith.constant 0 : i32
    return %c0_i32, %c0_i32_0 : i32, i32
  }
  func.func @transform_5(%arg0: i32) -> (i32, i32) {
    %c0_i32 = arith.constant 0 : i32
    %c0_i32_0 = arith.constant 0 : i32
    %c0_i32_1 = arith.constant 0 : i32
    return %c0_i32, %c0_i32_0 : i32, i32
  }
  func.func @transform_6(%arg0: i32) -> (i32, i32) {
    %c0_i32 = arith.constant 0 : i32
    %c0_i32_0 = arith.constant 0 : i32
    %c0_i32_1 = arith.constant 0 : i32
    return %c0_i32, %c0_i32_0 : i32, i32
  }
  func.func @transform_7(%arg0: i32) -> (i32, i32) {
    %c0_i32 = arith.constant 0 : i32
    %c0_i32_0 = arith.constant 0 : i32
    return %arg0, %c0_i32 : i32, i32
  }
}

</mosaic_0001>

<bundles_post_ra>
// kernel: net_forward.1
= control target key start
LH: loop header
LB: loop body
LE: loop exit
PB: predicated region body
PF: predicated region fallthrough
CT: control target
= control target key end

     0   :  { %12 = vsyncpa [#allocation3], 0  ;;  %s4044_s0 = inlined_call_operand.vmem [shape: f32[8,784], index: 0, kind: input, shape index: {}]   ;;  %s4045_s1 = inlined_call_operand.hbm [shape: f32[784,1024], index: 1, kind: input, shape index: {}]   ;;  %s4046_s2 = inlined_call_operand.hbm [shape: f32[1,1024], index: 2, kind: input, shape index: {}]   ;;  %s4047_s3 = inlined_call_operand.hbm [shape: f32[1024,512], index: 3, kind: input, shape index: {}]   ;;  %s4048_s4 = inlined_call_operand.hbm [shape: f32[1,512], index: 4, kind: input, shape index: {}]   ;;  %s4049_s5 = inlined_call_operand.vmem [shape: f32[512,128], index: 5, kind: input, shape index: {}]   ;;  %s4050_s6 = inlined_call_operand.vmem [shape: f32[1,128], index: 6, kind: input, shape index: {}]   ;;  %s4051_s7 = inlined_call_operand.vmem [shape: f32[8,128], index: 7, kind: output, shape index: {}]  }
   0x1   :  { %13 = vsyncpa [#allocation5], 0 }
   0x2   :  { %14 = vsyncpa [#allocation8], 0  ;;  %s3565_s24 = smov [#allocation4]   ;;  %s3566_s26 = smov [#allocation2]  }
   0x3   :  { %s35_s25 = sshll.u32 %s3565_s24, 4  ;;  %s22_s27 = sshll.u32 %s3566_s26, 4  ;;  %s36_s25 = int_to_ptr.vmem [resolvable:$true] %s35_s25  ;;  %s23_s27 = int_to_ptr.vmem [resolvable:$true] %s22_s27 }
   0x4   :  { %s3487_s28 = scalar_lea.vmem %s36_s25, 128  ;;  %p3492_p1 = scmp.lt.s32.totalorder %s36_s25, %s36_s25 }
   0x5   :  { %p3488_p0 = scmp.ne.s32.totalorder %s36_s25, %s3487_s28  ;;  %p3493_p2 = scmp.lt.s32.totalorder %s3487_s28, %s3487_s28 }
   0x7   :  { %p3494_p3 = por %p3493_p2, %p3492_p1 }
   0x9   :  { %p3495_p4 = pnand %p3494_p3, %p3488_p0 }
   0xb   :  { %3498 = shalt.err (!%p3495_p4)
}
   0xc   :  { %38 = dma.hbm_to_vmem [thread:$0]  %s4046_s2, 128, %s36_s25, [#allocation5]  }
   0xd   :  { %s3507_s8 = scalar_lea.vmem %s23_s27, 100352  ;;  %p3512_p6 = scmp.lt.s32.totalorder %s23_s27, %s23_s27 }
   0xe   :  { %p3508_p5 = scmp.ne.s32.totalorder %s23_s27, %s3507_s8  ;;  %p3513_p7 = scmp.lt.s32.totalorder %s3507_s8, %s3507_s8 }
  0x10   :  { %p3514_p8 = por %p3513_p7, %p3512_p6 }
  0x12   :  { %p3515_p9 = pnand %p3514_p8, %p3508_p5 }
  0x14   :  { %3518 = shalt.err (!%p3515_p9)
}
  0x15   :  { %s3567_s9 = smov 1024   ;;  %s3568_s10 = smov 64  }
  0x16   :  { %28 = dma.hbm_to_vmem [thread:$0]  %s4045_s1, 100352, %s23_s27, [#allocation3], %s3567_s9, %s3567_s9, %s3568_s10  }
  0x17   :  { %s3569_s13 = smov [#allocation6]  }
  0x18   :  { %s44_s14 = sshll.u32 %s3569_s13, 4  ;;  %s45_s14 = int_to_ptr.vmem [resolvable:$true] %s44_s14 }
  0x19   :  { %s3527_s15 = scalar_lea.vmem %s45_s14, 65536  ;;  %p3532_p11 = scmp.lt.s32.totalorder %s45_s14, %s45_s14 }
  0x1a   :  { %p3528_p10 = scmp.ne.s32.totalorder %s45_s14, %s3527_s15  ;;  %p3533_p12 = scmp.lt.s32.totalorder %s3527_s15, %s3527_s15 }
  0x1c   :  { %p3534_p13 = por %p3533_p12, %p3532_p11 }
  0x1e   :  { %p3535_p0 = pnand %p3534_p13, %p3528_p10 }
  0x20   :  { %3538 = shalt.err (!%p3535_p0)
}
  0x21   :  { %s3570_s2 = smov 512   ;;  %s3571_s16 = smov 32  }
  0x22   :  { %50 = dma.hbm_to_vmem [thread:$0]  %s4047_s3, 65536, %s45_s14, [#allocation5], %s3570_s2, %s3570_s2, %s3571_s16  }
  0x23   :  { %s3572_s19 = smov [#allocation7]  }
  0x24   :  { %s57_s20 = sshll.u32 %s3572_s19, 4  ;;  %s58_s20 = int_to_ptr.vmem [resolvable:$true] %s57_s20 }
  0x25   :  { %s3547_s1 = scalar_lea.vmem %s58_s20, 64  ;;  %p3552_p2 = scmp.lt.s32.totalorder %s58_s20, %s58_s20 }
  0x26   :  { %p3548_p1 = scmp.ne.s32.totalorder %s58_s20, %s3547_s1  ;;  %p3553_p3 = scmp.lt.s32.totalorder %s3547_s1, %s3547_s1 }
  0x28   :  { %p3554_p4 = por %p3553_p3, %p3552_p2 }
  0x2a   :  { %p3555_p5 = pnand %p3554_p4, %p3548_p1 }
  0x2c   :  { %3558 = shalt.err (!%p3555_p5)
}
  0x2d   :  { %60 = dma.hbm_to_vmem [thread:$0]  %s4048_s4, 64, %s58_s20, [#allocation8]  }
  0x2e   :  { %3559 = dma.done.wait [#allocation3], 100352  }
  0x2f   :  { %3560 = vsyncadd [#allocation3], 4294866944 }
  0x30   :  { %3561 = dma.done.wait [#allocation5], 65664  }
  0x31   :  { %3562 = vsyncadd [#allocation5], 4294901632 }
  0x32   :  { %3563 = dma.done.wait [#allocation8], 64  }
  0x33   :  { %3564 = vsyncadd [#allocation8], 4294967232  ;;  %v205_v0 = vld [vmem:[#allocation2 + $0x3c8] sm:$0xff]  ;;  %v204_v2 = vld [vmem:[#allocation2 + $0x3c0] sm:$0xff]  ;;  %vm910_vm0 = vcmask 130048  }
  0x34   :  { %v461_v1 = vld [vmem:[#allocation2 + $0xbc8] sm:$0xff]  ;;  %914 = vmatprep.subr.mxu0 %v205_v0  ;;  %v460_v3 = vld [vmem:[#allocation2 + $0xbc0] sm:$0xff] }
  0x35   :  { %985 = vmatprep.subr.mxu1 %v461_v1  ;;  %v197_v4 = vld [vmem:[#allocation2 + $0x388] sm:$0xff]  ;;  %915 = vmatpush1.msra.mxu0 %v204_v2  ;;  %v196_v6 = vld [vmem:[#allocation2 + $0x380] sm:$0xff] }
  0x36   :  { %v453_v5 = vld [vmem:[#allocation2 + $0xb88] sm:$0xff]  ;;  %986 = vmatpush1.msra.mxu1 %v460_v3  ;;  %v452_v7 = vld [vmem:[#allocation2 + $0xb80] sm:$0xff]  ;;  %916 = vmatprep.subr.mxu0 %v197_v4 }
  0x37   :  { %v189_v8 = vld [vmem:[#allocation2 + $0x348] sm:$0xff]  ;;  %987 = vmatprep.subr.mxu1 %v453_v5  ;;  %v188_v10 = vld [vmem:[#allocation2 + $0x340] sm:$0xff]  ;;  %917 = vmatpush1.msra.mxu0 %v196_v6 }
  0x38   :  { %v445_v9 = vld [vmem:[#allocation2 + $0xb48] sm:$0xff]  ;;  %v444_v11 = vld [vmem:[#allocation2 + $0xb40] sm:$0xff]  ;;  %988 = vmatpush1.msra.mxu1 %v452_v7  ;;  %918 = vmatprep.subr.mxu0 %v189_v8 }
  0x39   :  { %v181_v12 = vld [vmem:[#allocation2 + $0x308] sm:$0xff]  ;;  %989 = vmatprep.subr.mxu1 %v445_v9  ;;  %v180_v14 = vld [vmem:[#allocation2 + $0x300] sm:$0xff]  ;;  %919 = vmatpush1.msra.mxu0 %v188_v10 }
  0x3a   :  { %v437_v13 = vld [vmem:[#allocation2 + $0xb08] sm:$0xff]  ;;  %v436_v15 = vld [vmem:[#allocation2 + $0xb00] sm:$0xff]  ;;  %990 = vmatpush1.msra.mxu1 %v444_v11  ;;  %920 = vmatprep.subr.mxu0 %v181_v12 }
  0x3b   :  { %v173_v16 = vld [vmem:[#allocation2 + $0x2c8] sm:$0xff]  ;;  %991 = vmatprep.subr.mxu1 %v437_v13  ;;  %v172_v18 = vld [vmem:[#allocation2 + $0x2c0] sm:$0xff]  ;;  %921 = vmatpush1.msra.mxu0 %v180_v14 }
  0x3c   :  { %v429_v17 = vld [vmem:[#allocation2 + $0xac8] sm:$0xff]  ;;  %v428_v19 = vld [vmem:[#allocation2 + $0xac0] sm:$0xff]  ;;  %992 = vmatpush1.msra.mxu1 %v436_v15  ;;  %922 = vmatprep.subr.mxu0 %v173_v16 }
  0x3d   :  { %v165_v20 = vld [vmem:[#allocation2 + $0x288] sm:$0xff]  ;;  %993 = vmatprep.subr.mxu1 %v429_v17  ;;  %v164_v22 = vld [vmem:[#allocation2 + $0x280] sm:$0xff]  ;;  %923 = vmatpush1.msra.mxu0 %v172_v18 }
  0x3e   :  { %v421_v21 = vld [vmem:[#allocation2 + $0xa88] sm:$0xff]  ;;  %v420_v23 = vld [vmem:[#allocation2 + $0xa80] sm:$0xff]  ;;  %994 = vmatpush1.msra.mxu1 %v428_v19  ;;  %924 = vmatprep.subr.mxu0 %v165_v20 }
  0x3f   :  { %v157_v24 = vld [vmem:[#allocation2 + $0x248] sm:$0xff]  ;;  %995 = vmatprep.subr.mxu1 %v421_v21  ;;  %v156_v26 = vld [vmem:[#allocation2 + $0x240] sm:$0xff]  ;;  %925 = vmatpush1.msra.mxu0 %v164_v22 }
  0x40   :  { %v413_v25 = vld [vmem:[#allocation2 + $0xa48] sm:$0xff]  ;;  %v412_v27 = vld [vmem:[#allocation2 + $0xa40] sm:$0xff]  ;;  %996 = vmatpush1.msra.mxu1 %v420_v23  ;;  %926 = vmatprep.subr.mxu0 %v157_v24 }
  0x41   :  { %v149_v28 = vld [vmem:[#allocation2 + $0x208] sm:$0xff]  ;;  %997 = vmatprep.subr.mxu1 %v413_v25  ;;  %v148_v30 = vld [vmem:[#allocation2 + $0x200] sm:$0xff]  ;;  %927 = vmatpush1.msra.mxu0 %v156_v26 }
  0x42   :  { %v405_v29 = vld [vmem:[#allocation2 + $0xa08] sm:$0xff]  ;;  %v404_v31 = vld [vmem:[#allocation2 + $0xa00] sm:$0xff]  ;;  %998 = vmatpush1.msra.mxu1 %v412_v27  ;;  %928 = vmatprep.subr.mxu0 %v149_v28 }
  0x43   :  { %v141_v32 = vld [vmem:[#allocation2 + $0x1c8] sm:$0xff]  ;;  %999 = vmatprep.subr.mxu1 %v405_v29  ;;  %v140_v34 = vld [vmem:[#allocation2 + $0x1c0] sm:$0xff]  ;;  %929 = vmatpush1.msra.mxu0 %v148_v30 }
  0x44   :  { %v397_v33 = vld [vmem:[#allocation2 + $0x9c8] sm:$0xff]  ;;  %v396_v35 = vld [vmem:[#allocation2 + $0x9c0] sm:$0xff]  ;;  %1000 = vmatpush1.msra.mxu1 %v404_v31  ;;  %930 = vmatprep.subr.mxu0 %v141_v32 }
  0x45   :  { %v133_v36 = vld [vmem:[#allocation2 + $0x188] sm:$0xff]  ;;  %1001 = vmatprep.subr.mxu1 %v397_v33  ;;  %v132_v38 = vld [vmem:[#allocation2 + $0x180] sm:$0xff]  ;;  %931 = vmatpush1.msra.mxu0 %v140_v34 }
  0x46   :  { %v389_v37 = vld [vmem:[#allocation2 + $0x988] sm:$0xff]  ;;  %v388_v39 = vld [vmem:[#allocation2 + $0x980] sm:$0xff]  ;;  %1002 = vmatpush1.msra.mxu1 %v396_v35  ;;  %932 = vmatprep.subr.mxu0 %v133_v36 }
  0x47   :  { %v125_v40 = vld [vmem:[#allocation2 + $0x148] sm:$0xff]  ;;  %1003 = vmatprep.subr.mxu1 %v389_v37  ;;  %v124_v42 = vld [vmem:[#allocation2 + $0x140] sm:$0xff]  ;;  %933 = vmatpush1.msra.mxu0 %v132_v38 }
  0x48   :  { %v381_v41 = vld [vmem:[#allocation2 + $0x948] sm:$0xff]  ;;  %v380_v43 = vld [vmem:[#allocation2 + $0x940] sm:$0xff]  ;;  %1004 = vmatpush1.msra.mxu1 %v388_v39  ;;  %934 = vmatprep.subr.mxu0 %v125_v40 }
  0x49   :  { %v117_v44 = vld [vmem:[#allocation2 + $0x108] sm:$0xff]  ;;  %1005 = vmatprep.subr.mxu1 %v381_v41  ;;  %v116_v46 = vld [vmem:[#allocation2 + $0x100] sm:$0xff]  ;;  %935 = vmatpush1.msra.mxu0 %v124_v42 }
  0x4a   :  { %v373_v45 = vld [vmem:[#allocation2 + $0x908] sm:$0xff]  ;;  %v372_v47 = vld [vmem:[#allocation2 + $0x900] sm:$0xff]  ;;  %1006 = vmatpush1.msra.mxu1 %v380_v43  ;;  %936 = vmatprep.subr.mxu0 %v117_v44 }
  0x4b   :  { %v109_v48 = vld [vmem:[#allocation2 + $0xc8] sm:$0xff]  ;;  %1007 = vmatprep.subr.mxu1 %v373_v45  ;;  %v108_v50 = vld [vmem:[#allocation2 + $0xc0] sm:$0xff]  ;;  %937 = vmatpush1.msra.mxu0 %v116_v46 }
  0x4c   :  { %v365_v49 = vld [vmem:[#allocation2 + $0x8c8] sm:$0xff]  ;;  %v364_v51 = vld [vmem:[#allocation2 + $0x8c0] sm:$0xff]  ;;  %1008 = vmatpush1.msra.mxu1 %v372_v47  ;;  %938 = vmatprep.subr.mxu0 %v109_v48 }
  0x4d   :  { %v101_v52 = vld [vmem:[#allocation2 + $0x88] sm:$0xff]  ;;  %1009 = vmatprep.subr.mxu1 %v365_v49  ;;  %v100_v54 = vld [vmem:[#allocation2 + $0x80] sm:$0xff]  ;;  %939 = vmatpush1.msra.mxu0 %v108_v50 }
  0x4e   :  { %v357_v53 = vld [vmem:[#allocation2 + $0x888] sm:$0xff]  ;;  %v356_v55 = vld [vmem:[#allocation2 + $0x880] sm:$0xff]  ;;  %1010 = vmatpush1.msra.mxu1 %v364_v51  ;;  %940 = vmatprep.subr.mxu0 %v101_v52 }
  0x4f   :  { %v93_v56 = vld [vmem:[#allocation2 + $0x48] sm:$0xff]  ;;  %1011 = vmatprep.subr.mxu1 %v357_v53  ;;  %v92_v58 = vld [vmem:[#allocation2 + $0x40] sm:$0xff]  ;;  %941 = vmatpush1.msra.mxu0 %v100_v54 }
  0x50   :  { %v349_v57 = vld [vmem:[#allocation2 + $0x848] sm:$0xff]  ;;  %v348_v59 = vld [vmem:[#allocation2 + $0x840] sm:$0xff]  ;;  %1012 = vmatpush1.msra.mxu1 %v356_v55  ;;  %942 = vmatprep.subr.mxu0 %v93_v56 }
  0x51   :  { %v85_v60 = vld [vmem:[#allocation2 + $0x8] sm:$0xff]  ;;  %1013 = vmatprep.subr.mxu1 %v349_v57  ;;  %v84_v62 = vld [vmem:[#allocation2] sm:$0xff]  ;;  %943 = vmatpush1.msra.mxu0 %v92_v58 }
  0x52   :  { %v341_v61 = vld [vmem:[#allocation2 + $0x808] sm:$0xff]  ;;  %v340_v63 = vld [vmem:[#allocation2 + $0x800] sm:$0xff]  ;;  %1014 = vmatpush1.msra.mxu1 %v348_v59  ;;  %944 = vmatprep.subr.mxu0 %v85_v60 }
  0x53   :  { %v333_v0 = vld [vmem:[#allocation2 + $0x7c8] sm:$0xff]  ;;  %1015 = vmatprep.subr.mxu1 %v341_v61  ;;  %v332_v2 = vld [vmem:[#allocation2 + $0x7c0] sm:$0xff]  ;;  %945 = vmatpush1.msra.mxu0 %v84_v62 }
  0x54   :  { %v589_v1 = vld [vmem:[#allocation2 + $0xfc8] sm:$0xff]  ;;  %v588_v3 = vld [vmem:[#allocation2 + $0xfc0] sm:$0xff]  ;;  %1016 = vmatpush1.msra.mxu1 %v340_v63  ;;  %946 = vmatprep.subr.mxu0 %v333_v0 }
  0x55   :  { %v325_v4 = vld [vmem:[#allocation2 + $0x788] sm:$0xff]  ;;  %1017 = vmatprep.subr.mxu1 %v589_v1  ;;  %v324_v6 = vld [vmem:[#allocation2 + $0x780] sm:$0xff]  ;;  %947 = vmatpush2.msra.mxu0 %v332_v2  ;;  %v80_v1 = vld [vmem:[%s4044_s0 + $0x18] sm:$0xff] }
  0x56   :  { %v581_v5 = vld [vmem:[#allocation2 + $0xf88] sm:$0xff]  ;;  %v580_v7 = vld [vmem:[#allocation2 + $0xf80] sm:$0xff]  ;;  %1018 = vmatpush2.msra.mxu1 %v588_v3  ;;  %948 = vmatprep.subr.mxu0 %v325_v4  ;;  %v79_v3 = vld [vmem:[%s4044_s0 + $0x10] sm:$0xff] }
  0x57   :  { %v317_v8 = vld [vmem:[#allocation2 + $0x748] sm:$0xff]  ;;  %1019 = vmatprep.subr.mxu1 %v581_v5  ;;  %v316_v10 = vld [vmem:[#allocation2 + $0x740] sm:$0xff]  ;;  %949 = vmatpush2.msra.mxu0 %v324_v6 }
  0x58   :  { %v573_v9 = vld [vmem:[#allocation2 + $0xf48] sm:$0xff]  ;;  %v572_v11 = vld [vmem:[#allocation2 + $0xf40] sm:$0xff]  ;;  %1020 = vmatpush2.msra.mxu1 %v580_v7  ;;  %950 = vmatprep.subr.mxu0 %v317_v8 }
  0x59   :  { %v309_v12 = vld [vmem:[#allocation2 + $0x708] sm:$0xff]  ;;  %1021 = vmatprep.subr.mxu1 %v573_v9  ;;  %v308_v14 = vld [vmem:[#allocation2 + $0x700] sm:$0xff]  ;;  %951 = vmatpush2.msra.mxu0 %v316_v10 }
  0x5a   :  { %v565_v13 = vld [vmem:[#allocation2 + $0xf08] sm:$0xff]  ;;  %v564_v15 = vld [vmem:[#allocation2 + $0xf00] sm:$0xff]  ;;  %1022 = vmatpush2.msra.mxu1 %v572_v11  ;;  %952 = vmatprep.subr.mxu0 %v309_v12 }
  0x5b   :  { %v301_v16 = vld [vmem:[#allocation2 + $0x6c8] sm:$0xff]  ;;  %1023 = vmatprep.subr.mxu1 %v565_v13  ;;  %v300_v18 = vld [vmem:[#allocation2 + $0x6c0] sm:$0xff]  ;;  %953 = vmatpush2.msra.mxu0 %v308_v14  ;;  %v83_v13 = vld [vmem:[%s4044_s0 + $0x30] sm:$0xff] }
  0x5c   :  { %v557_v17 = vld [vmem:[#allocation2 + $0xec8] sm:$0xff]  ;;  %v556_v19 = vld [vmem:[#allocation2 + $0xec0] sm:$0xff]  ;;  %1024 = vmatpush2.msra.mxu1 %v564_v15  ;;  %954 = vmatprep.subr.mxu0 %v301_v16  ;;  %v207_v14 = vld [vmem:[#allocation2 + $0x3d8] sm:$0xff] }
  0x5d   :  { %v293_v20 = vld [vmem:[#allocation2 + $0x688] sm:$0xff]  ;;  %1025 = vmatprep.subr.mxu1 %v557_v17  ;;  %v292_v22 = vld [vmem:[#allocation2 + $0x680] sm:$0xff]  ;;  %955 = vmatpush2.msra.mxu0 %v300_v18  ;;  %v206_v16 = vld [vmem:[#allocation2 + $0x3d0] sm:$0xff]  ;;  %v3573_v17 = vmov 0.0  }
  0x5e   :  { %v549_v21 = vld [vmem:[#allocation2 + $0xe88] sm:$0xff]  ;;  %v548_v23 = vld [vmem:[#allocation2 + $0xe80] sm:$0xff]  ;;  %1026 = vmatpush2.msra.mxu1 %v556_v19  ;;  %956 = vmatprep.subr.mxu0 %v293_v20  ;;  %v199_v19 = vld [vmem:[#allocation2 + $0x398] sm:$0xff] }
  0x5f   :  { %v285_v24 = vld [vmem:[#allocation2 + $0x648] sm:$0xff]  ;;  %1027 = vmatprep.subr.mxu1 %v549_v21  ;;  %v284_v26 = vld [vmem:[#allocation2 + $0x640] sm:$0xff]  ;;  %957 = vmatpush2.msra.mxu0 %v292_v22  ;;  %v198_v21 = vld [vmem:[#allocation2 + $0x390] sm:$0xff] }
  0x60   :  { %v541_v25 = vld [vmem:[#allocation2 + $0xe48] sm:$0xff]  ;;  %v540_v27 = vld [vmem:[#allocation2 + $0xe40] sm:$0xff]  ;;  %1028 = vmatpush2.msra.mxu1 %v548_v23  ;;  %958 = vmatprep.subr.mxu0 %v285_v24  ;;  %v191_v23 = vld [vmem:[#allocation2 + $0x358] sm:$0xff] }
  0x61   :  { %v277_v28 = vld [vmem:[#allocation2 + $0x608] sm:$0xff]  ;;  %1029 = vmatprep.subr.mxu1 %v541_v25  ;;  %v276_v30 = vld [vmem:[#allocation2 + $0x600] sm:$0xff]  ;;  %959 = vmatpush2.msra.mxu0 %v284_v26  ;;  %v190_v25 = vld [vmem:[#allocation2 + $0x350] sm:$0xff] }
  0x62   :  { %v533_v29 = vld [vmem:[#allocation2 + $0xe08] sm:$0xff]  ;;  %v532_v31 = vld [vmem:[#allocation2 + $0xe00] sm:$0xff]  ;;  %1030 = vmatpush2.msra.mxu1 %v540_v27  ;;  %960 = vmatprep.subr.mxu0 %v277_v28  ;;  %v183_v27 = vld [vmem:[#allocation2 + $0x318] sm:$0xff] }
  0x63   :  { %v269_v32 = vld [vmem:[#allocation2 + $0x5c8] sm:$0xff]  ;;  %1031 = vmatprep.subr.mxu1 %v533_v29  ;;  %v268_v34 = vld [vmem:[#allocation2 + $0x5c0] sm:$0xff]  ;;  %961 = vmatpush2.msra.mxu0 %v276_v30  ;;  %v182_v29 = vld [vmem:[#allocation2 + $0x310] sm:$0xff] }
  0x64   :  { %v525_v33 = vld [vmem:[#allocation2 + $0xdc8] sm:$0xff]  ;;  %v524_v35 = vld [vmem:[#allocation2 + $0xdc0] sm:$0xff]  ;;  %1032 = vmatpush2.msra.mxu1 %v532_v31  ;;  %962 = vmatprep.subr.mxu0 %v269_v32  ;;  %v175_v31 = vld [vmem:[#allocation2 + $0x2d8] sm:$0xff] }
  0x65   :  { %v261_v36 = vld [vmem:[#allocation2 + $0x588] sm:$0xff]  ;;  %1033 = vmatprep.subr.mxu1 %v525_v33  ;;  %v260_v38 = vld [vmem:[#allocation2 + $0x580] sm:$0xff]  ;;  %963 = vmatpush2.msra.mxu0 %v268_v34  ;;  %v174_v33 = vld [vmem:[#allocation2 + $0x2d0] sm:$0xff] }
  0x66   :  { %v517_v37 = vld [vmem:[#allocation2 + $0xd88] sm:$0xff]  ;;  %v516_v39 = vld [vmem:[#allocation2 + $0xd80] sm:$0xff]  ;;  %1034 = vmatpush2.msra.mxu1 %v524_v35  ;;  %964 = vmatprep.subr.mxu0 %v261_v36  ;;  %v167_v35 = vld [vmem:[#allocation2 + $0x298] sm:$0xff] }
  0x67   :  { %v253_v40 = vld [vmem:[#allocation2 + $0x548] sm:$0xff]  ;;  %1035 = vmatprep.subr.mxu1 %v517_v37  ;;  %v252_v42 = vld [vmem:[#allocation2 + $0x540] sm:$0xff]  ;;  %965 = vmatpush2.msra.mxu0 %v260_v38  ;;  %v166_v37 = vld [vmem:[#allocation2 + $0x290] sm:$0xff] }
  0x68   :  { %v509_v41 = vld [vmem:[#allocation2 + $0xd48] sm:$0xff]  ;;  %v508_v43 = vld [vmem:[#allocation2 + $0xd40] sm:$0xff]  ;;  %1036 = vmatpush2.msra.mxu1 %v516_v39  ;;  %966 = vmatprep.subr.mxu0 %v253_v40  ;;  %v159_v39 = vld [vmem:[#allocation2 + $0x258] sm:$0xff] }
  0x69   :  { %v245_v44 = vld [vmem:[#allocation2 + $0x508] sm:$0xff]  ;;  %1037 = vmatprep.subr.mxu1 %v509_v41  ;;  %v244_v46 = vld [vmem:[#allocation2 + $0x500] sm:$0xff]  ;;  %967 = vmatpush2.msra.mxu0 %v252_v42  ;;  %v158_v41 = vld [vmem:[#allocation2 + $0x250] sm:$0xff] }
  0x6a   :  { %v501_v45 = vld [vmem:[#allocation2 + $0xd08] sm:$0xff]  ;;  %v500_v47 = vld [vmem:[#allocation2 + $0xd00] sm:$0xff]  ;;  %1038 = vmatpush2.msra.mxu1 %v508_v43  ;;  %968 = vmatprep.subr.mxu0 %v245_v44  ;;  %v151_v43 = vld [vmem:[#allocation2 + $0x218] sm:$0xff] }
  0x6b   :  { %v237_v48 = vld [vmem:[#allocation2 + $0x4c8] sm:$0xff]  ;;  %1039 = vmatprep.subr.mxu1 %v501_v45  ;;  %v236_v50 = vld [vmem:[#allocation2 + $0x4c0] sm:$0xff]  ;;  %969 = vmatpush2.msra.mxu0 %v244_v46  ;;  %v150_v45 = vld [vmem:[#allocation2 + $0x210] sm:$0xff] }
  0x6c   :  { %v493_v49 = vld [vmem:[#allocation2 + $0xcc8] sm:$0xff]  ;;  %v492_v51 = vld [vmem:[#allocation2 + $0xcc0] sm:$0xff]  ;;  %1040 = vmatpush2.msra.mxu1 %v500_v47  ;;  %970 = vmatprep.subr.mxu0 %v237_v48  ;;  %v143_v47 = vld [vmem:[#allocation2 + $0x1d8] sm:$0xff] }
  0x6d   :  { %v229_v52 = vld [vmem:[#allocation2 + $0x488] sm:$0xff]  ;;  %1041 = vmatprep.subr.mxu1 %v493_v49  ;;  %v228_v54 = vld [vmem:[#allocation2 + $0x480] sm:$0xff]  ;;  %971 = vmatpush2.msra.mxu0 %v236_v50  ;;  %v142_v49 = vld [vmem:[#allocation2 + $0x1d0] sm:$0xff] }
  0x6e   :  { %v485_v53 = vld [vmem:[#allocation2 + $0xc88] sm:$0xff]  ;;  %v484_v55 = vld [vmem:[#allocation2 + $0xc80] sm:$0xff]  ;;  %1042 = vmatpush2.msra.mxu1 %v492_v51  ;;  %972 = vmatprep.subr.mxu0 %v229_v52  ;;  %v135_v51 = vld [vmem:[#allocation2 + $0x198] sm:$0xff] }
  0x6f   :  { %v221_v56 = vld [vmem:[#allocation2 + $0x448] sm:$0xff]  ;;  %1043 = vmatprep.subr.mxu1 %v485_v53  ;;  %v220_v58 = vld [vmem:[#allocation2 + $0x440] sm:$0xff]  ;;  %973 = vmatpush2.msra.mxu0 %v228_v54  ;;  %v134_v53 = vld [vmem:[#allocation2 + $0x190] sm:$0xff] }
  0x70   :  { %v477_v57 = vld [vmem:[#allocation2 + $0xc48] sm:$0xff]  ;;  %v476_v59 = vld [vmem:[#allocation2 + $0xc40] sm:$0xff]  ;;  %1044 = vmatpush2.msra.mxu1 %v484_v55  ;;  %974 = vmatprep.subr.mxu0 %v221_v56  ;;  %v127_v55 = vld [vmem:[#allocation2 + $0x158] sm:$0xff] }
  0x71   :  { %v213_v60 = vld [vmem:[#allocation2 + $0x408] sm:$0xff]  ;;  %1045 = vmatprep.subr.mxu1 %v477_v57  ;;  %v212_v62 = vld [vmem:[#allocation2 + $0x400] sm:$0xff]  ;;  %975 = vmatpush2.msra.mxu0 %v220_v58  ;;  %v126_v57 = vld [vmem:[#allocation2 + $0x150] sm:$0xff] }
  0x72   :  { %v469_v61 = vld [vmem:[#allocation2 + $0xc08] sm:$0xff]  ;;  %1046 = vmatpush2.msra.mxu1 %v476_v59  ;;  %v468_v0 = vld [vmem:[#allocation2 + $0xc00] sm:$0xff]  ;;  %976 = vmatprep.subr.mxu0 %v213_v60  ;;  %v119_v59 = vld [vmem:[#allocation2 + $0x118] sm:$0xff] }
  0x73   :  { %v3629_v63 = vld [vmem:[%s4044_s0 + $0x8] sm:$0xff]  ;;  %1047 = vmatprep.subr.mxu1 %v469_v61  ;;  %v3637_v2 = vld [vmem:[%s4044_s0] sm:$0xff]  ;;  %977 = vmatpush2.msra.mxu0 %v212_v62  ;;  %v118_v61 = vld [vmem:[#allocation2 + $0x110] sm:$0xff] }
  0x74   :  { %978 = vmatprep.mubr.f32.mxu0 %v3629_v63  ;;  %v717_v4 = vld [vmem:[#allocation2 + $0x13c8] sm:$0xff]  ;;  %1048 = vmatpush2.msra.mxu1 %v468_v0  ;;  %v716_v6 = vld [vmem:[#allocation2 + $0x13c0] sm:$0xff]  ;;  %v111_v0 = vld [vmem:[#allocation2 + $0xd8] sm:$0xff] }
  0x75   :  { %v861_v5 = vld [vmem:[#allocation2 + $0x1848] sm:$0xff]  ;;  %1049 = vmatprep.mubr.f32.mxu1 %v80_v1  ;;  %v860_v7 = vld [vmem:[#allocation2 + $0x1840] sm:$0xff]  ;;  %979 = vmatmul.mubr.f32.vlgmr.msra.gmra.mxu0 %v3637_v2 }
  0x76   :  { %1050 = vmatmul.mubr.f32.vlgmr.msra.gmra.mxu1 %v79_v3  ;;  %v709_v8 = vld [vmem:[#allocation2 + $0x1388] sm:$0xff]  ;;  %1056 = vmatprep.subr.mxu0 %v717_v4  ;;  %v708_v10 = vld [vmem:[#allocation2 + $0x1380] sm:$0xff]  ;;  %v110_v3 = vld [vmem:[#allocation2 + $0xd0] sm:$0xff] }
  0x77   :  { %v853_v9 = vld [vmem:[#allocation2 + $0x1808] sm:$0xff]  ;;  %1155 = vmatprep.subr.mxu1 %v861_v5  ;;  %v852_v11 = vld [vmem:[#allocation2 + $0x1800] sm:$0xff]  ;;  %1057 = vmatpush1.msra.mxu0 %v716_v6  ;;  %v103_v5 = vld [vmem:[#allocation2 + $0x98] sm:$0xff] }
  0x78   :  { %1156 = vmatpush1.msra.mxu1 %v860_v7  ;;  %v701_v12 = vld [vmem:[#allocation2 + $0x1348] sm:$0xff]  ;;  %1058 = vmatprep.subr.mxu0 %v709_v8  ;;  %v700_v15 = vld [vmem:[#allocation2 + $0x1340] sm:$0xff]  ;;  %v102_v7 = vld [vmem:[#allocation2 + $0x90] sm:$0xff] }
  0x79   :  { %1157 = vmatprep.subr.mxu1 %v853_v9  ;;  %1059 = vmatpush1.msra.mxu0 %v708_v10  ;;  %v693_v18 = vld [vmem:[#allocation2 + $0x1308] sm:$0xff]  ;;  %v692_v20 = vld [vmem:[#allocation2 + $0x1300] sm:$0xff]  ;;  %v95_v9 = vld [vmem:[#allocation2 + $0x58] sm:$0xff] }
  0x7a   :  { %1158 = vmatpush1.msra.mxu1 %v852_v11  ;;  %1191 = vmatprep.mubr.f32.mxu1 %v3573_v17  ;;  %v685_v22 = vld [vmem:[#allocation2 + $0x12c8] sm:$0xff]  ;;  %v684_v24 = vld [vmem:[#allocation2 + $0x12c0] sm:$0xff]  ;;  %v94_v11 = vld [vmem:[#allocation2 + $0x50] sm:$0xff] }
  0x7b   :  { %1060 = vmatprep.subr.mxu0 %v701_v12  ;;  %3383 = vmatmul.mubr.msk.f32.vlgmr.msra.gmra.mxu1 %vm910_vm0, %v83_v13  ;;  %v677_v26 = vld [vmem:[#allocation2 + $0x1288] sm:$0xff]  ;;  %v676_v28 = vld [vmem:[#allocation2 + $0x1280] sm:$0xff]  ;;  %v87_v13 = vld [vmem:[#allocation2 + $0x18] sm:$0xff] }
  0x7c   :  { %1198 = vmatprep.subr.mxu1 %v207_v14  ;;  %1061 = vmatpush1.msra.mxu0 %v700_v15  ;;  %v669_v30 = vld [vmem:[#allocation2 + $0x1248] sm:$0xff]  ;;  %v668_v32 = vld [vmem:[#allocation2 + $0x1240] sm:$0xff]  ;;  %v86_v15 = vld [vmem:[#allocation2 + $0x10] sm:$0xff] }
  0x7d   :  { %1199 = vmatpush1.msra.mxu1 %v206_v16  ;;  %1062 = vmatprep.subr.mxu0 %v693_v18  ;;  %v661_v34 = vld [vmem:[#allocation2 + $0x1208] sm:$0xff]  ;;  %v660_v36 = vld [vmem:[#allocation2 + $0x1200] sm:$0xff]  ;;  %v335_v18 = vld [vmem:[#allocation2 + $0x7d8] sm:$0xff] }
  0x7e   :  { %1200 = vmatprep.subr.mxu1 %v199_v19  ;;  %1063 = vmatpush1.msra.mxu0 %v692_v20  ;;  %v653_v38 = vld [vmem:[#allocation2 + $0x11c8] sm:$0xff]  ;;  %v652_v40 = vld [vmem:[#allocation2 + $0x11c0] sm:$0xff]  ;;  %v334_v20 = vld [vmem:[#allocation2 + $0x7d0] sm:$0xff] }
  0x7f   :  { %1201 = vmatpush1.msra.mxu1 %v198_v21  ;;  %1064 = vmatprep.subr.mxu0 %v685_v22  ;;  %v645_v42 = vld [vmem:[#allocation2 + $0x1188] sm:$0xff]  ;;  %v644_v44 = vld [vmem:[#allocation2 + $0x1180] sm:$0xff]  ;;  %v327_v22 = vld [vmem:[#allocation2 + $0x798] sm:$0xff] }
  0x80   :  { %1202 = vmatprep.subr.mxu1 %v191_v23  ;;  %1065 = vmatpush1.msra.mxu0 %v684_v24  ;;  %v637_v46 = vld [vmem:[#allocation2 + $0x1148] sm:$0xff]  ;;  %v636_v48 = vld [vmem:[#allocation2 + $0x1140] sm:$0xff]  ;;  %v326_v24 = vld [vmem:[#allocation2 + $0x790] sm:$0xff] }
  0x81   :  { %1203 = vmatpush1.msra.mxu1 %v190_v25  ;;  %1066 = vmatprep.subr.mxu0 %v677_v26  ;;  %v629_v50 = vld [vmem:[#allocation2 + $0x1108] sm:$0xff]  ;;  %v628_v52 = vld [vmem:[#allocation2 + $0x1100] sm:$0xff]  ;;  %v319_v26 = vld [vmem:[#allocation2 + $0x758] sm:$0xff] }
  0x82   :  { %1204 = vmatprep.subr.mxu1 %v183_v27  ;;  %1067 = vmatpush1.msra.mxu0 %v676_v28  ;;  %v621_v54 = vld [vmem:[#allocation2 + $0x10c8] sm:$0xff]  ;;  %v620_v56 = vld [vmem:[#allocation2 + $0x10c0] sm:$0xff]  ;;  %v318_v28 = vld [vmem:[#allocation2 + $0x750] sm:$0xff] }
  0x83   :  { %1205 = vmatpush1.msra.mxu1 %v182_v29  ;;  %1068 = vmatprep.subr.mxu0 %v669_v30  ;;  %v613_v58 = vld [vmem:[#allocation2 + $0x1088] sm:$0xff]  ;;  %v612_v60 = vld [vmem:[#allocation2 + $0x1080] sm:$0xff]  ;;  %v311_v30 = vld [vmem:[#allocation2 + $0x718] sm:$0xff] }
  0x84   :  { %1206 = vmatprep.subr.mxu1 %v175_v31  ;;  %1069 = vmatpush1.msra.mxu0 %v668_v32  ;;  %v605_v62 = vld [vmem:[#allocation2 + $0x1048] sm:$0xff]  ;;  %v604_v1 = vld [vmem:[#allocation2 + $0x1040] sm:$0xff]  ;;  %v310_v32 = vld [vmem:[#allocation2 + $0x710] sm:$0xff] }
  0x85   :  { %1207 = vmatpush1.msra.mxu1 %v174_v33  ;;  %1070 = vmatprep.subr.mxu0 %v661_v34  ;;  %v597_v4 = vld [vmem:[#allocation2 + $0x1008] sm:$0xff]  ;;  %v596_v6 = vld [vmem:[#allocation2 + $0x1000] sm:$0xff]  ;;  %v303_v34 = vld [vmem:[#allocation2 + $0x6d8] sm:$0xff] }
  0x86   :  { %1208 = vmatprep.subr.mxu1 %v167_v35  ;;  %1071 = vmatpush1.msra.mxu0 %v660_v36  ;;  %v845_v8 = vld [vmem:[#allocation2 + $0x17c8] sm:$0xff]  ;;  %v844_v10 = vld [vmem:[#allocation2 + $0x17c0] sm:$0xff]  ;;  %v302_v36 = vld [vmem:[#allocation2 + $0x6d0] sm:$0xff] }
  0x87   :  { %1209 = vmatpush1.msra.mxu1 %v166_v37  ;;  %1072 = vmatprep.subr.mxu0 %v653_v38  ;;  %v837_v12 = vld [vmem:[#allocation2 + $0x1788] sm:$0xff]  ;;  %v836_v14 = vld [vmem:[#allocation2 + $0x1780] sm:$0xff]  ;;  %v295_v38 = vld [vmem:[#allocation2 + $0x698] sm:$0xff] }
  0x88   :  { %1210 = vmatprep.subr.mxu1 %v159_v39  ;;  %1073 = vmatpush1.msra.mxu0 %v652_v40  ;;  %v829_v16 = vld [vmem:[#allocation2 + $0x1748] sm:$0xff]  ;;  %v828_v19 = vld [vmem:[#allocation2 + $0x1740] sm:$0xff]  ;;  %v294_v40 = vld [vmem:[#allocation2 + $0x690] sm:$0xff] }
  0x89   :  { %1211 = vmatpush1.msra.mxu1 %v158_v41  ;;  %1074 = vmatprep.subr.mxu0 %v645_v42  ;;  %v821_v21 = vld [vmem:[#allocation2 + $0x1708] sm:$0xff]  ;;  %v820_v23 = vld [vmem:[#allocation2 + $0x1700] sm:$0xff]  ;;  %v287_v42 = vld [vmem:[#allocation2 + $0x658] sm:$0xff] }
  0x8a   :  { %1212 = vmatprep.subr.mxu1 %v151_v43  ;;  %1075 = vmatpush1.msra.mxu0 %v644_v44  ;;  %v813_v25 = vld [vmem:[#allocation2 + $0x16c8] sm:$0xff]  ;;  %v812_v27 = vld [vmem:[#allocation2 + $0x16c0] sm:$0xff]  ;;  %v286_v44 = vld [vmem:[#allocation2 + $0x650] sm:$0xff] }
  0x8b   :  { %1213 = vmatpush1.msra.mxu1 %v150_v45  ;;  %1076 = vmatprep.subr.mxu0 %v637_v46  ;;  %v805_v29 = vld [vmem:[#allocation2 + $0x1688] sm:$0xff]  ;;  %v804_v31 = vld [vmem:[#allocation2 + $0x1680] sm:$0xff]  ;;  %v279_v46 = vld [vmem:[#allocation2 + $0x618] sm:$0xff] }
  0x8c   :  { %1214 = vmatprep.subr.mxu1 %v143_v47  ;;  %1077 = vmatpush1.msra.mxu0 %v636_v48  ;;  %v797_v33 = vld [vmem:[#allocation2 + $0x1648] sm:$0xff]  ;;  %v796_v35 = vld [vmem:[#allocation2 + $0x1640] sm:$0xff]  ;;  %v278_v48 = vld [vmem:[#allocation2 + $0x610] sm:$0xff] }
  0x8d   :  { %1215 = vmatpush1.msra.mxu1 %v142_v49  ;;  %1078 = vmatprep.subr.mxu0 %v629_v50  ;;  %v789_v37 = vld [vmem:[#allocation2 + $0x1608] sm:$0xff]  ;;  %v788_v39 = vld [vmem:[#allocation2 + $0x1600] sm:$0xff]  ;;  %v271_v50 = vld [vmem:[#allocation2 + $0x5d8] sm:$0xff] }
  0x8e   :  { %1216 = vmatprep.subr.mxu1 %v135_v51  ;;  %1079 = vmatpush1.msra.mxu0 %v628_v52  ;;  %v781_v41 = vld [vmem:[#allocation2 + $0x15c8] sm:$0xff]  ;;  %v780_v43 = vld [vmem:[#allocation2 + $0x15c0] sm:$0xff]  ;;  %v270_v52 = vld [vmem:[#allocation2 + $0x5d0] sm:$0xff] }
  0x8f   :  { %1217 = vmatpush1.msra.mxu1 %v134_v53  ;;  %1080 = vmatprep.subr.mxu0 %v621_v54  ;;  %v773_v45 = vld [vmem:[#allocation2 + $0x1588] sm:$0xff]  ;;  %v772_v47 = vld [vmem:[#allocation2 + $0x1580] sm:$0xff]  ;;  %v263_v54 = vld [vmem:[#allocation2 + $0x598] sm:$0xff] }
  0x90   :  { %1218 = vmatprep.subr.mxu1 %v127_v55  ;;  %1081 = vmatpush1.msra.mxu0 %v620_v56  ;;  %v765_v49 = vld [vmem:[#allocation2 + $0x1548] sm:$0xff]  ;;  %v764_v51 = vld [vmem:[#allocation2 + $0x1540] sm:$0xff]  ;;  %v262_v56 = vld [vmem:[#allocation2 + $0x590] sm:$0xff] }
  0x91   :  { %1219 = vmatpush1.msra.mxu1 %v126_v57  ;;  %1082 = vmatprep.subr.mxu0 %v613_v58  ;;  %v757_v53 = vld [vmem:[#allocation2 + $0x1508] sm:$0xff]  ;;  %v756_v55 = vld [vmem:[#allocation2 + $0x1500] sm:$0xff]  ;;  %v255_v58 = vld [vmem:[#allocation2 + $0x558] sm:$0xff] }
  0x92   :  { %1220 = vmatprep.subr.mxu1 %v119_v59  ;;  %1083 = vmatpush1.msra.mxu0 %v612_v60  ;;  %v749_v57 = vld [vmem:[#allocation2 + $0x14c8] sm:$0xff]  ;;  %v748_v59 = vld [vmem:[#allocation2 + $0x14c0] sm:$0xff]  ;;  %v254_v60 = vld [vmem:[#allocation2 + $0x550] sm:$0xff] }
  0x93   :  { %1221 = vmatpush1.msra.mxu1 %v118_v61  ;;  %1084 = vmatprep.subr.mxu0 %v605_v62  ;;  %v741_v61 = vld [vmem:[#allocation2 + $0x1488] sm:$0xff]  ;;  %v247_v62 = vld [vmem:[#allocation2 + $0x518] sm:$0xff] }
  0x94   :  { %1222 = vmatprep.subr.mxu1 %v111_v0  ;;  %1085 = vmatpush1.msra.mxu0 %v604_v1  ;;  %v740_v0 = vld [vmem:[#allocation2 + $0x1480] sm:$0xff]  ;;  %v246_v1 = vld [vmem:[#allocation2 + $0x510] sm:$0xff] }
  0x95   :  { %1223 = vmatpush1.msra.mxu1 %v110_v3  ;;  %1086 = vmatprep.subr.mxu0 %v597_v4  ;;  %v733_v3 = vld [vmem:[#allocation2 + $0x1448] sm:$0xff]  ;;  %v239_v4 = vld [vmem:[#allocation2 + $0x4d8] sm:$0xff] }
  0x96   :  { %1224 = vmatprep.subr.mxu1 %v103_v5  ;;  %1087 = vmatpush1.msra.mxu0 %v596_v6  ;;  %v732_v5 = vld [vmem:[#allocation2 + $0x1440] sm:$0xff]  ;;  %v238_v6 = vld [vmem:[#allocation2 + $0x4d0] sm:$0xff] }
  0x97   :  { %1225 = vmatpush1.msra.mxu1 %v102_v7  ;;  %1088 = vmatprep.subr.mxu0 %v845_v8  ;;  %v725_v7 = vld [vmem:[#allocation2 + $0x1408] sm:$0xff]  ;;  %v231_v8 = vld [vmem:[#allocation2 + $0x498] sm:$0xff] }
  0x98   :  { %1226 = vmatprep.subr.mxu1 %v95_v9  ;;  %1089 = vmatpush2.msra.mxu0 %v844_v10  ;;  %v724_v9 = vld [vmem:[#allocation2 + $0x1400] sm:$0xff]  ;;  %v3652_v10 = vld [vmem:[%s4044_s0 + $0x28] sm:$0xff] }
  0x99   :  { %1227 = vmatpush1.msra.mxu1 %v94_v11  ;;  %1090 = vmatprep.subr.mxu0 %v837_v12  ;;  %v230_v11 = vld [vmem:[#allocation2 + $0x490] sm:$0xff]  ;;  %v3657_v12 = vld [vmem:[%s4044_s0 + $0x20] sm:$0xff] }
  0x9a   :  { %1228 = vmatprep.subr.mxu1 %v87_v13  ;;  %1091 = vmatpush2.msra.mxu0 %v836_v14  ;;  %v223_v13 = vld [vmem:[#allocation2 + $0x458] sm:$0xff] }
  0x9b   :  { %1229 = vmatpush1.msra.mxu1 %v86_v15  ;;  %1092 = vmatprep.subr.mxu0 %v829_v16  ;;  %v463_v14 = vld [vmem:[#allocation2 + $0xbd8] sm:$0xff]  ;;  %v222_v15 = vld [vmem:[#allocation2 + $0x450] sm:$0xff] }
  0x9c   :  { %1230 = vmatprep.subr.mxu1 %v335_v18  ;;  %1093 = vmatpush2.msra.mxu0 %v828_v19  ;;  %v462_v16 = vld [vmem:[#allocation2 + $0xbd0] sm:$0xff]  ;;  %v215_v18 = vld [vmem:[#allocation2 + $0x418] sm:$0xff] }
  0x9d   :  { %1231 = vmatpush2.msra.mxu1 %v334_v20  ;;  %1094 = vmatprep.subr.mxu0 %v821_v21  ;;  %v455_v19 = vld [vmem:[#allocation2 + $0xb98] sm:$0xff]  ;;  %v214_v20 = vld [vmem:[#allocation2 + $0x410] sm:$0xff] }
  0x9e   :  { %1232 = vmatprep.subr.mxu1 %v327_v22  ;;  %1095 = vmatpush2.msra.mxu0 %v820_v23  ;;  %v454_v21 = vld [vmem:[#allocation2 + $0xb90] sm:$0xff]  ;;  %v447_v22 = vld [vmem:[#allocation2 + $0xb58] sm:$0xff] }
  0x9f   :  { %1233 = vmatpush2.msra.mxu1 %v326_v24  ;;  %1096 = vmatprep.subr.mxu0 %v813_v25  ;;  %v719_v23 = vld [vmem:[#allocation2 + $0x13d8] sm:$0xff]  ;;  %v446_v24 = vld [vmem:[#allocation2 + $0xb50] sm:$0xff] }
  0xa0   :  { %1234 = vmatprep.subr.mxu1 %v319_v26  ;;  %1097 = vmatpush2.msra.mxu0 %v812_v27  ;;  %v718_v25 = vld [vmem:[#allocation2 + $0x13d0] sm:$0xff]  ;;  %v439_v26 = vld [vmem:[#allocation2 + $0xb18] sm:$0xff] }
  0xa1   :  { %1235 = vmatpush2.msra.mxu1 %v318_v28  ;;  %1098 = vmatprep.subr.mxu0 %v805_v29  ;;  %v711_v27 = vld [vmem:[#allocation2 + $0x1398] sm:$0xff]  ;;  %v438_v28 = vld [vmem:[#allocation2 + $0xb10] sm:$0xff] }
  0xa2   :  { %1236 = vmatprep.subr.mxu1 %v311_v30  ;;  %1099 = vmatpush2.msra.mxu0 %v804_v31  ;;  %v710_v29 = vld [vmem:[#allocation2 + $0x1390] sm:$0xff]  ;;  %v431_v30 = vld [vmem:[#allocation2 + $0xad8] sm:$0xff] }
  0xa3   :  { %1237 = vmatpush2.msra.mxu1 %v310_v32  ;;  %1100 = vmatprep.subr.mxu0 %v797_v33  ;;  %v703_v31 = vld [vmem:[#allocation2 + $0x1358] sm:$0xff]  ;;  %v430_v32 = vld [vmem:[#allocation2 + $0xad0] sm:$0xff] }
  0xa4   :  { %1238 = vmatprep.subr.mxu1 %v303_v34  ;;  %1101 = vmatpush2.msra.mxu0 %v796_v35  ;;  %v702_v33 = vld [vmem:[#allocation2 + $0x1350] sm:$0xff]  ;;  %v695_v34 = vld [vmem:[#allocation2 + $0x1318] sm:$0xff] }
  0xa5   :  { %1239 = vmatpush2.msra.mxu1 %v302_v36  ;;  %1102 = vmatprep.subr.mxu0 %v789_v37  ;;  %v694_v35 = vld [vmem:[#allocation2 + $0x1310] sm:$0xff]  ;;  %v415_v36 = vld [vmem:[#allocation2 + $0xa58] sm:$0xff] }
  0xa6   :  { %1240 = vmatprep.subr.mxu1 %v295_v38  ;;  %1103 = vmatpush2.msra.mxu0 %v788_v39  ;;  %v687_v37 = vld [vmem:[#allocation2 + $0x12d8] sm:$0xff]  ;;  %v414_v38 = vld [vmem:[#allocation2 + $0xa50] sm:$0xff] }
  0xa7   :  { %1241 = vmatpush2.msra.mxu1 %v294_v40  ;;  %1104 = vmatprep.subr.mxu0 %v781_v41  ;;  %v686_v39 = vld [vmem:[#allocation2 + $0x12d0] sm:$0xff]  ;;  %v407_v40 = vld [vmem:[#allocation2 + $0xa18] sm:$0xff] }
  0xa8   :  { %1242 = vmatprep.subr.mxu1 %v287_v42  ;;  %1105 = vmatpush2.msra.mxu0 %v780_v43  ;;  %v679_v41 = vld [vmem:[#allocation2 + $0x1298] sm:$0xff]  ;;  %v406_v42 = vld [vmem:[#allocation2 + $0xa10] sm:$0xff] }
  0xa9   :  { %1243 = vmatpush2.msra.mxu1 %v286_v44  ;;  %1106 = vmatprep.subr.mxu0 %v773_v45  ;;  %v678_v43 = vld [vmem:[#allocation2 + $0x1290] sm:$0xff]  ;;  %v399_v44 = vld [vmem:[#allocation2 + $0x9d8] sm:$0xff] }
  0xaa   :  { %1244 = vmatprep.subr.mxu1 %v279_v46  ;;  %1107 = vmatpush2.msra.mxu0 %v772_v47  ;;  %v671_v45 = vld [vmem:[#allocation2 + $0x1258] sm:$0xff]  ;;  %v398_v46 = vld [vmem:[#allocation2 + $0x9d0] sm:$0xff] }
  0xab   :  { %1245 = vmatpush2.msra.mxu1 %v278_v48  ;;  %1108 = vmatprep.subr.mxu0 %v765_v49  ;;  %v670_v47 = vld [vmem:[#allocation2 + $0x1250] sm:$0xff]  ;;  %v391_v48 = vld [vmem:[#allocation2 + $0x998] sm:$0xff] }
  0xac   :  { %1246 = vmatprep.subr.mxu1 %v271_v50  ;;  %1109 = vmatpush2.msra.mxu0 %v764_v51  ;;  %v663_v49 = vld [vmem:[#allocation2 + $0x1218] sm:$0xff]  ;;  %v390_v50 = vld [vmem:[#allocation2 + $0x990] sm:$0xff] }
  0xad   :  { %1247 = vmatpush2.msra.mxu1 %v270_v52  ;;  %1110 = vmatprep.subr.mxu0 %v757_v53  ;;  %v662_v51 = vld [vmem:[#allocation2 + $0x1210] sm:$0xff]  ;;  %v383_v52 = vld [vmem:[#allocation2 + $0x958] sm:$0xff] }
  0xae   :  { %1248 = vmatprep.subr.mxu1 %v263_v54  ;;  %1111 = vmatpush2.msra.mxu0 %v756_v55  ;;  %v655_v53 = vld [vmem:[#allocation2 + $0x11d8] sm:$0xff]  ;;  %v382_v54 = vld [vmem:[#allocation2 + $0x950] sm:$0xff] }
  0xaf   :  { %1249 = vmatpush2.msra.mxu1 %v262_v56  ;;  %1112 = vmatprep.subr.mxu0 %v749_v57  ;;  %v654_v55 = vld [vmem:[#allocation2 + $0x11d0] sm:$0xff]  ;;  %v375_v56 = vld [vmem:[#allocation2 + $0x918] sm:$0xff] }
  0xb0   :  { %1250 = vmatprep.subr.mxu1 %v255_v58  ;;  %1113 = vmatpush2.msra.mxu0 %v748_v59  ;;  %v647_v57 = vld [vmem:[#allocation2 + $0x1198] sm:$0xff]  ;;  %v374_v58 = vld [vmem:[#allocation2 + $0x910] sm:$0xff] }
  0xb1   :  { %1251 = vmatpush2.msra.mxu1 %v254_v60  ;;  %1114 = vmatprep.subr.mxu0 %v741_v61  ;;  %v646_v59 = vld [vmem:[#allocation2 + $0x1190] sm:$0xff]  ;;  %v367_v60 = vld [vmem:[#allocation2 + $0x8d8] sm:$0xff] }
  0xb2   :  { %1252 = vmatprep.subr.mxu1 %v247_v62  ;;  %1115 = vmatpush2.msra.mxu0 %v740_v0  ;;  %v639_v61 = vld [vmem:[#allocation2 + $0x1158] sm:$0xff]  ;;  %v366_v62 = vld [vmem:[#allocation2 + $0x8d0] sm:$0xff] }
  0xb3   :  { %1253 = vmatpush2.msra.mxu1 %v246_v1  ;;  %1116 = vmatprep.subr.mxu0 %v733_v3  ;;  %v638_v0 = vld [vmem:[#allocation2 + $0x1150] sm:$0xff]  ;;  %v359_v1 = vld [vmem:[#allocation2 + $0x898] sm:$0xff] }
  0xb4   :  { %1254 = vmatprep.subr.mxu1 %v239_v4  ;;  %1117 = vmatpush2.msra.mxu0 %v732_v5  ;;  %v631_v3 = vld [vmem:[#allocation2 + $0x1118] sm:$0xff]  ;;  %v358_v4 = vld [vmem:[#allocation2 + $0x890] sm:$0xff] }
  0xb5   :  { %1255 = vmatpush2.msra.mxu1 %v238_v6  ;;  %1118 = vmatprep.subr.mxu0 %v725_v7  ;;  %v630_v5 = vld [vmem:[#allocation2 + $0x1110] sm:$0xff]  ;;  %v351_v6 = vld [vmem:[#allocation2 + $0x858] sm:$0xff] }
  0xb6   :  { %1256 = vmatprep.subr.mxu1 %v231_v8  ;;  %1119 = vmatpush2.msra.mxu0 %v724_v9  ;;  %v623_v7 = vld [vmem:[#allocation2 + $0x10d8] sm:$0xff]  ;;  %v350_v8 = vld [vmem:[#allocation2 + $0x850] sm:$0xff] }
  0xb7   :  { %1120 = vmatprep.mubr.f32.mxu0 %v3652_v10  ;;  %1257 = vmatpush2.msra.mxu1 %v230_v11  ;;  %v622_v9 = vld [vmem:[#allocation2 + $0x10d0] sm:$0xff]  ;;  %v343_v11 = vld [vmem:[#allocation2 + $0x818] sm:$0xff] }
  0xb8   :  { %1121 = vmatmul.mubr.f32.vlgmr.msra.gmra.mxu0 %v3657_v12  ;;  %1258 = vmatprep.subr.mxu1 %v223_v13  ;;  %v615_v13 = vld [vmem:[#allocation2 + $0x1098] sm:$0xff] }
  0xb9   :  { %1269 = vmatprep.subr.mxu0 %v463_v14  ;;  %1259 = vmatpush2.msra.mxu1 %v222_v15  ;;  %v342_v14 = vld [vmem:[#allocation2 + $0x810] sm:$0xff] }
  0xba   :  { %1270 = vmatpush1.msra.mxu0 %v462_v16  ;;  %1260 = vmatprep.subr.mxu1 %v215_v18  ;;  %v614_v15 = vld [vmem:[#allocation2 + $0x1090] sm:$0xff]  ;;  %v591_v16 = vld [vmem:[#allocation2 + $0xfd8] sm:$0xff] }
  0xbb   :  { %1271 = vmatprep.subr.mxu0 %v455_v19  ;;  %1261 = vmatpush2.msra.mxu1 %v214_v20  ;;  %v607_v18 = vld [vmem:[#allocation2 + $0x1058] sm:$0xff]  ;;  %v590_v19 = vld [vmem:[#allocation2 + $0xfd0] sm:$0xff] }
  0xbc   :  { %1262 = vmatprep.mubr.f32.mxu1 %v3629_v63  ;;  %1272 = vmatpush1.msra.mxu0 %v454_v21  ;;  %v423_v63 = vld [vmem:[#allocation2 + $0xa98] sm:$0xff]  ;;  %v606_v20 = vld [vmem:[#allocation2 + $0x1050] sm:$0xff] }
  0xbd   :  { %1263 = vmatmul.mubr.f32.vlgmr.msra.gmra.mxu1 %v3637_v2  ;;  %1273 = vmatprep.subr.mxu0 %v447_v22  ;;  %v422_v2 = vld [vmem:[#allocation2 + $0xa90] sm:$0xff]  ;;  %v583_v21 = vld [vmem:[#allocation2 + $0xf98] sm:$0xff] }
  0xbe   :  { %1340 = vmatprep.subr.mxu1 %v719_v23  ;;  %1274 = vmatpush1.msra.mxu0 %v446_v24  ;;  %v599_v22 = vld [vmem:[#allocation2 + $0x1018] sm:$0xff]  ;;  %v582_v23 = vld [vmem:[#allocation2 + $0xf90] sm:$0xff] }
  0xbf   :  { %1341 = vmatpush1.msra.mxu1 %v718_v25  ;;  %1275 = vmatprep.subr.mxu0 %v439_v26  ;;  %v598_v24 = vld [vmem:[#allocation2 + $0x1010] sm:$0xff]  ;;  %v575_v25 = vld [vmem:[#allocation2 + $0xf58] sm:$0xff] }
  0xc0   :  { %1342 = vmatprep.subr.mxu1 %v711_v27  ;;  %1276 = vmatpush1.msra.mxu0 %v438_v28  ;;  %v847_v26 = vld [vmem:[#allocation2 + $0x17d8] sm:$0xff]  ;;  %v574_v27 = vld [vmem:[#allocation2 + $0xf50] sm:$0xff] }
  0xc1   :  { %1343 = vmatpush1.msra.mxu1 %v710_v29  ;;  %1277 = vmatprep.subr.mxu0 %v431_v30  ;;  %v846_v28 = vld [vmem:[#allocation2 + $0x17d0] sm:$0xff]  ;;  %v567_v29 = vld [vmem:[#allocation2 + $0xf18] sm:$0xff] }
  0xc2   :  { %1344 = vmatprep.subr.mxu1 %v703_v31  ;;  %1278 = vmatpush1.msra.mxu0 %v430_v32  ;;  %v839_v30 = vld [vmem:[#allocation2 + $0x1798] sm:$0xff]  ;;  %v566_v31 = vld [vmem:[#allocation2 + $0xf10] sm:$0xff] }
  0xc3   :  { %1345 = vmatpush1.msra.mxu1 %v702_v33  ;;  %1279 = vmatprep.subr.mxu0 %v423_v63  ;;  %v838_v32 = vld [vmem:[#allocation2 + $0x1790] sm:$0xff]  ;;  %v559_v33 = vld [vmem:[#allocation2 + $0xed8] sm:$0xff] }
  0xc4   :  { %1346 = vmatprep.subr.mxu1 %v695_v34  ;;  %1280 = vmatpush1.msra.mxu0 %v422_v2  ;;  %v831_v63 = vld [vmem:[#allocation2 + $0x1758] sm:$0xff]  ;;  %v558_v34 = vld [vmem:[#allocation2 + $0xed0] sm:$0xff] }
  0xc5   :  { %1347 = vmatpush1.msra.mxu1 %v694_v35  ;;  %1281 = vmatprep.subr.mxu0 %v415_v36  ;;  %v830_v2 = vld [vmem:[#allocation2 + $0x1750] sm:$0xff]  ;;  %v551_v35 = vld [vmem:[#allocation2 + $0xe98] sm:$0xff] }
  0xc6   :  { %1348 = vmatprep.subr.mxu1 %v687_v37  ;;  %1282 = vmatpush1.msra.mxu0 %v414_v38  ;;  %v823_v36 = vld [vmem:[#allocation2 + $0x1718] sm:$0xff]  ;;  %v550_v37 = vld [vmem:[#allocation2 + $0xe90] sm:$0xff] }
  0xc7   :  { %1349 = vmatpush1.msra.mxu1 %v686_v39  ;;  %1283 = vmatprep.subr.mxu0 %v407_v40  ;;  %v822_v38 = vld [vmem:[#allocation2 + $0x1710] sm:$0xff]  ;;  %v543_v39 = vld [vmem:[#allocation2 + $0xe58] sm:$0xff] }
  0xc8   :  { %1350 = vmatprep.subr.mxu1 %v679_v41  ;;  %1284 = vmatpush1.msra.mxu0 %v406_v42  ;;  %v815_v40 = vld [vmem:[#allocation2 + $0x16d8] sm:$0xff]  ;;  %v542_v41 = vld [vmem:[#allocation2 + $0xe50] sm:$0xff] }
  0xc9   :  { %1351 = vmatpush1.msra.mxu1 %v678_v43  ;;  %1285 = vmatprep.subr.mxu0 %v399_v44  ;;  %v814_v42 = vld [vmem:[#allocation2 + $0x16d0] sm:$0xff]  ;;  %v535_v43 = vld [vmem:[#allocation2 + $0xe18] sm:$0xff] }
  0xca   :  { %1352 = vmatprep.subr.mxu1 %v671_v45  ;;  %1286 = vmatpush1.msra.mxu0 %v398_v46  ;;  %v807_v44 = vld [vmem:[#allocation2 + $0x1698] sm:$0xff]  ;;  %v534_v45 = vld [vmem:[#allocation2 + $0xe10] sm:$0xff] }
  0xcb   :  { %1353 = vmatpush1.msra.mxu1 %v670_v47  ;;  %1287 = vmatprep.subr.mxu0 %v391_v48  ;;  %v806_v46 = vld [vmem:[#allocation2 + $0x1690] sm:$0xff]  ;;  %v527_v47 = vld [vmem:[#allocation2 + $0xdd8] sm:$0xff] }
  0xcc   :  { %1354 = vmatprep.subr.mxu1 %v663_v49  ;;  %1288 = vmatpush1.msra.mxu0 %v390_v50  ;;  %v799_v48 = vld [vmem:[#allocation2 + $0x1658] sm:$0xff]  ;;  %v526_v49 = vld [vmem:[#allocation2 + $0xdd0] sm:$0xff] }
  0xcd   :  { %1355 = vmatpush1.msra.mxu1 %v662_v51  ;;  %1289 = vmatprep.subr.mxu0 %v383_v52  ;;  %v798_v50 = vld [vmem:[#allocation2 + $0x1650] sm:$0xff]  ;;  %v519_v51 = vld [vmem:[#allocation2 + $0xd98] sm:$0xff] }
  0xce   :  { %1356 = vmatprep.subr.mxu1 %v655_v53  ;;  %1290 = vmatpush1.msra.mxu0 %v382_v54  ;;  %v791_v52 = vld [vmem:[#allocation2 + $0x1618] sm:$0xff]  ;;  %v518_v53 = vld [vmem:[#allocation2 + $0xd90] sm:$0xff] }
  0xcf   :  { %1357 = vmatpush1.msra.mxu1 %v654_v55  ;;  %1291 = vmatprep.subr.mxu0 %v375_v56  ;;  %v790_v54 = vld [vmem:[#allocation2 + $0x1610] sm:$0xff]  ;;  %v511_v55 = vld [vmem:[#allocation2 + $0xd58] sm:$0xff] }
  0xd0   :  { %1358 = vmatprep.subr.mxu1 %v647_v57  ;;  %1292 = vmatpush1.msra.mxu0 %v374_v58  ;;  %v783_v56 = vld [vmem:[#allocation2 + $0x15d8] sm:$0xff]  ;;  %v510_v57 = vld [vmem:[#allocation2 + $0xd50] sm:$0xff] }
  0xd1   :  { %1359 = vmatpush1.msra.mxu1 %v646_v59  ;;  %1293 = vmatprep.subr.mxu0 %v367_v60  ;;  %v782_v58 = vld [vmem:[#allocation2 + $0x15d0] sm:$0xff]  ;;  %v503_v59 = vld [vmem:[#allocation2 + $0xd18] sm:$0xff] }
  0xd2   :  { %1360 = vmatprep.subr.mxu1 %v639_v61  ;;  %1294 = vmatpush1.msra.mxu0 %v366_v62  ;;  %v775_v60 = vld [vmem:[#allocation2 + $0x1598] sm:$0xff]  ;;  %v502_v61 = vld [vmem:[#allocation2 + $0xd10] sm:$0xff] }
  0xd3   :  { %1361 = vmatpush1.msra.mxu1 %v638_v0  ;;  %1295 = vmatprep.subr.mxu0 %v359_v1  ;;  %v774_v62 = vld [vmem:[#allocation2 + $0x1590] sm:$0xff]  ;;  %v495_v0 = vld [vmem:[#allocation2 + $0xcd8] sm:$0xff] }
  0xd4   :  { %1362 = vmatprep.subr.mxu1 %v631_v3  ;;  %1296 = vmatpush1.msra.mxu0 %v358_v4  ;;  %v767_v1 = vld [vmem:[#allocation2 + $0x1558] sm:$0xff]  ;;  %v494_v3 = vld [vmem:[#allocation2 + $0xcd0] sm:$0xff] }
  0xd5   :  { %1363 = vmatpush1.msra.mxu1 %v630_v5  ;;  %1297 = vmatprep.subr.mxu0 %v351_v6  ;;  %v766_v4 = vld [vmem:[#allocation2 + $0x1550] sm:$0xff]  ;;  %v487_v5 = vld [vmem:[#allocation2 + $0xc98] sm:$0xff] }
  0xd6   :  { %1364 = vmatprep.subr.mxu1 %v623_v7  ;;  %1298 = vmatpush1.msra.mxu0 %v350_v8  ;;  %v759_v6 = vld [vmem:[#allocation2 + $0x1518] sm:$0xff]  ;;  %v486_v7 = vld [vmem:[#allocation2 + $0xc90] sm:$0xff] }
  0xd7   :  { %1365 = vmatpush1.msra.mxu1 %v622_v9  ;;  %1299 = vmatprep.subr.mxu0 %v343_v11  ;;  %v758_v8 = vld [vmem:[#allocation2 + $0x1510] sm:$0xff]  ;;  %v479_v9 = vld [vmem:[#allocation2 + $0xc58] sm:$0xff] }
  0xd8   :  { %1366 = vmatprep.subr.mxu1 %v615_v13  ;;  %1300 = vmatpush1.msra.mxu0 %v342_v14  ;;  %v751_v11 = vld [vmem:[#allocation2 + $0x14d8] sm:$0xff]  ;;  %v478_v13 = vld [vmem:[#allocation2 + $0xc50] sm:$0xff] }
  0xd9   :  { %1367 = vmatpush1.msra.mxu1 %v614_v15  ;;  %1301 = vmatprep.subr.mxu0 %v591_v16  ;;  %v750_v14 = vld [vmem:[#allocation2 + $0x14d0] sm:$0xff]  ;;  %v471_v15 = vld [vmem:[#allocation2 + $0xc18] sm:$0xff] }
  0xda   :  { %1368 = vmatprep.subr.mxu1 %v607_v18  ;;  %1302 = vmatpush2.msra.mxu0 %v590_v19  ;;  %v743_v16 = vld [vmem:[#allocation2 + $0x1498] sm:$0xff]  ;;  %v470_v18 = vld [vmem:[#allocation2 + $0xc10] sm:$0xff] }
  0xdb   :  { %1369 = vmatpush1.msra.mxu1 %v606_v20  ;;  %1303 = vmatprep.subr.mxu0 %v583_v21  ;;  %v742_v19 = vld [vmem:[#allocation2 + $0x1490] sm:$0xff]  ;;  %v735_v20 = vld [vmem:[#allocation2 + $0x1458] sm:$0xff] }
  0xdc   :  { %1370 = vmatprep.subr.mxu1 %v599_v22  ;;  %1304 = vmatpush2.msra.mxu0 %v582_v23  ;;  %v863_v21 = vld [vmem:[#allocation2 + $0x1858] sm:$0xff]  ;;  %v734_v23 = vld [vmem:[#allocation2 + $0x1450] sm:$0xff] }
  0xdd   :  { %1371 = vmatpush1.msra.mxu1 %v598_v24  ;;  %1305 = vmatprep.subr.mxu0 %v575_v25  ;;  %v3666_v22 = vld [vmem:[%s4044_s0 + $0x18] sm:$0xff]  ;;  %v862_v24 = vld [vmem:[#allocation2 + $0x1850] sm:$0xff] }
  0xde   :  { %1372 = vmatprep.subr.mxu1 %v847_v26  ;;  %1306 = vmatpush2.msra.mxu0 %v574_v27  ;;  %v3672_v25 = vld [vmem:[%s4044_s0 + $0x10] sm:$0xff]  ;;  %v727_v26 = vld [vmem:[#allocation2 + $0x1418] sm:$0xff] }
  0xdf   :  { %1373 = vmatpush2.msra.mxu1 %v846_v28  ;;  %1307 = vmatprep.subr.mxu0 %v567_v29  ;;  %v855_v27 = vld [vmem:[#allocation2 + $0x1818] sm:$0xff]  ;;  %v726_v28 = vld [vmem:[#allocation2 + $0x1410] sm:$0xff] }
  0xe0   :  { %1374 = vmatprep.subr.mxu1 %v839_v30  ;;  %1308 = vmatpush2.msra.mxu0 %v566_v31  ;;  %v854_v29 = vld [vmem:[#allocation2 + $0x1810] sm:$0xff]  ;;  %v209_v30 = vld [vmem:[#allocation2 + $0x3e8] sm:$0xff] }
  0xe1   :  { %1375 = vmatpush2.msra.mxu1 %v838_v32  ;;  %1309 = vmatprep.subr.mxu0 %v559_v33  ;;  %v465_v31 = vld [vmem:[#allocation2 + $0xbe8] sm:$0xff]  ;;  %v208_v32 = vld [vmem:[#allocation2 + $0x3e0] sm:$0xff] }
  0xe2   :  { %1376 = vmatprep.subr.mxu1 %v831_v63  ;;  %1310 = vmatpush2.msra.mxu0 %v558_v34  ;;  %v464_v33 = vld [vmem:[#allocation2 + $0xbe0] sm:$0xff]  ;;  %v3681_v63 = vld [vmem:[%s4044_s0 + $0x30] sm:$0xff]  ;;  %v201_v34 = vld [vmem:[#allocation2 + $0x3a8] sm:$0xff] }
  0xe3   :  { %1377 = vmatpush2.msra.mxu1 %v830_v2  ;;  %1311 = vmatprep.subr.mxu0 %v551_v35  ;;  %v457_v2 = vld [vmem:[#allocation2 + $0xba8] sm:$0xff]  ;;  %v456_v35 = vld [vmem:[#allocation2 + $0xba0] sm:$0xff] }
  0xe4   :  { %1378 = vmatprep.subr.mxu1 %v823_v36  ;;  %1312 = vmatpush2.msra.mxu0 %v550_v37  ;;  %v193_v36 = vld [vmem:[#allocation2 + $0x368] sm:$0xff] }
  0xe5   :  { %1379 = vmatpush2.msra.mxu1 %v822_v38  ;;  %1313 = vmatprep.subr.mxu0 %v543_v39  ;;  %v449_v37 = vld [vmem:[#allocation2 + $0xb68] sm:$0xff]  ;;  %v448_v38 = vld [vmem:[#allocation2 + $0xb60] sm:$0xff] }
  0xe6   :  { %1380 = vmatprep.subr.mxu1 %v815_v40  ;;  %1314 = vmatpush2.msra.mxu0 %v542_v41  ;;  %v185_v39 = vld [vmem:[#allocation2 + $0x328] sm:$0xff]  ;;  %v184_v41 = vld [vmem:[#allocation2 + $0x320] sm:$0xff] }
  0xe7   :  { %1381 = vmatpush2.msra.mxu1 %v814_v42  ;;  %1315 = vmatprep.subr.mxu0 %v535_v43  ;;  %v441_v40 = vld [vmem:[#allocation2 + $0xb28] sm:$0xff]  ;;  %v440_v42 = vld [vmem:[#allocation2 + $0xb20] sm:$0xff] }
  0xe8   :  { %1382 = vmatprep.subr.mxu1 %v807_v44  ;;  %1316 = vmatpush2.msra.mxu0 %v534_v45  ;;  %v177_v43 = vld [vmem:[#allocation2 + $0x2e8] sm:$0xff]  ;;  %v176_v45 = vld [vmem:[#allocation2 + $0x2e0] sm:$0xff] }
  0xe9   :  { %1383 = vmatpush2.msra.mxu1 %v806_v46  ;;  %1317 = vmatprep.subr.mxu0 %v527_v47  ;;  %v433_v44 = vld [vmem:[#allocation2 + $0xae8] sm:$0xff]  ;;  %v432_v46 = vld [vmem:[#allocation2 + $0xae0] sm:$0xff] }
  0xea   :  { %1384 = vmatprep.subr.mxu1 %v799_v48  ;;  %1318 = vmatpush2.msra.mxu0 %v526_v49  ;;  %v169_v47 = vld [vmem:[#allocation2 + $0x2a8] sm:$0xff]  ;;  %v168_v49 = vld [vmem:[#allocation2 + $0x2a0] sm:$0xff] }
  0xeb   :  { %1385 = vmatpush2.msra.mxu1 %v798_v50  ;;  %1319 = vmatprep.subr.mxu0 %v519_v51  ;;  %v425_v48 = vld [vmem:[#allocation2 + $0xaa8] sm:$0xff]  ;;  %v424_v50 = vld [vmem:[#allocation2 + $0xaa0] sm:$0xff] }
  0xec   :  { %1386 = vmatprep.subr.mxu1 %v791_v52  ;;  %1320 = vmatpush2.msra.mxu0 %v518_v53  ;;  %v161_v51 = vld [vmem:[#allocation2 + $0x268] sm:$0xff]  ;;  %v160_v53 = vld [vmem:[#allocation2 + $0x260] sm:$0xff] }
  0xed   :  { %1387 = vmatpush2.msra.mxu1 %v790_v54  ;;  %1321 = vmatprep.subr.mxu0 %v511_v55  ;;  %v417_v52 = vld [vmem:[#allocation2 + $0xa68] sm:$0xff]  ;;  %v416_v54 = vld [vmem:[#allocation2 + $0xa60] sm:$0xff] }
  0xee   :  { %1388 = vmatprep.subr.mxu1 %v783_v56  ;;  %1322 = vmatpush2.msra.mxu0 %v510_v57  ;;  %v153_v55 = vld [vmem:[#allocation2 + $0x228] sm:$0xff]  ;;  %v152_v57 = vld [vmem:[#allocation2 + $0x220] sm:$0xff] }
  0xef   :  { %1389 = vmatpush2.msra.mxu1 %v782_v58  ;;  %1323 = vmatprep.subr.mxu0 %v503_v59  ;;  %v409_v56 = vld [vmem:[#allocation2 + $0xa28] sm:$0xff]  ;;  %v408_v58 = vld [vmem:[#allocation2 + $0xa20] sm:$0xff] }
  0xf0   :  { %1390 = vmatprep.subr.mxu1 %v775_v60  ;;  %1324 = vmatpush2.msra.mxu0 %v502_v61  ;;  %v145_v59 = vld [vmem:[#allocation2 + $0x1e8] sm:$0xff]  ;;  %v144_v61 = vld [vmem:[#allocation2 + $0x1e0] sm:$0xff] }
  0xf1   :  { %1391 = vmatpush2.msra.mxu1 %v774_v62  ;;  %1325 = vmatprep.subr.mxu0 %v495_v0  ;;  %v401_v60 = vld [vmem:[#allocation2 + $0x9e8] sm:$0xff]  ;;  %v400_v62 = vld [vmem:[#allocation2 + $0x9e0] sm:$0xff] }
  0xf2   :  { %1392 = vmatprep.subr.mxu1 %v767_v1  ;;  %1326 = vmatpush2.msra.mxu0 %v494_v3  ;;  %v137_v0 = vld [vmem:[#allocation2 + $0x1a8] sm:$0xff]  ;;  %v136_v3 = vld [vmem:[#allocation2 + $0x1a0] sm:$0xff] }
  0xf3   :  { %1393 = vmatpush2.msra.mxu1 %v766_v4  ;;  %1327 = vmatprep.subr.mxu0 %v487_v5  ;;  %v393_v1 = vld [vmem:[#allocation2 + $0x9a8] sm:$0xff]  ;;  %v392_v4 = vld [vmem:[#allocation2 + $0x9a0] sm:$0xff] }
  0xf4   :  { %1394 = vmatprep.subr.mxu1 %v759_v6  ;;  %1328 = vmatpush2.msra.mxu0 %v486_v7  ;;  %v129_v5 = vld [vmem:[#allocation2 + $0x168] sm:$0xff]  ;;  %v128_v7 = vld [vmem:[#allocation2 + $0x160] sm:$0xff] }
  0xf5   :  { %1395 = vmatpush2.msra.mxu1 %v758_v8  ;;  %1329 = vmatprep.subr.mxu0 %v479_v9  ;;  %v385_v6 = vld [vmem:[#allocation2 + $0x968] sm:$0xff]  ;;  %v384_v8 = vld [vmem:[#allocation2 + $0x960] sm:$0xff] }
  0xf6   :  { %1396 = vmatprep.subr.mxu1 %v751_v11  ;;  %1330 = vmatpush2.msra.mxu0 %v478_v13  ;;  %v121_v9 = vld [vmem:[#allocation2 + $0x128] sm:$0xff]  ;;  %v120_v13 = vld [vmem:[#allocation2 + $0x120] sm:$0xff] }
  0xf7   :  { %1397 = vmatpush2.msra.mxu1 %v750_v14  ;;  %1331 = vmatprep.subr.mxu0 %v471_v15  ;;  %v377_v11 = vld [vmem:[#allocation2 + $0x928] sm:$0xff]  ;;  %v376_v14 = vld [vmem:[#allocation2 + $0x920] sm:$0xff] }
  0xf8   :  { %1398 = vmatprep.subr.mxu1 %v743_v16  ;;  %1332 = vmatpush2.msra.mxu0 %v470_v18  ;;  %v113_v15 = vld [vmem:[#allocation2 + $0xe8] sm:$0xff]  ;;  %v112_v18 = vld [vmem:[#allocation2 + $0xe0] sm:$0xff] }
  0xf9   :  { %1333 = vmatprep.mubr.f32.mxu0 %v3666_v22  ;;  %1399 = vmatpush2.msra.mxu1 %v742_v19  ;;  %v369_v16 = vld [vmem:[#allocation2 + $0x8e8] sm:$0xff]  ;;  %v368_v19 = vld [vmem:[#allocation2 + $0x8e0] sm:$0xff] }
  0xfa   :  { %1334 = vmatmul.mubr.f32.vlgmr.msra.gmra.mxu0 %v3672_v25  ;;  %1400 = vmatprep.subr.mxu1 %v735_v20  ;;  %v105_v20 = vld [vmem:[#allocation2 + $0xa8] sm:$0xff] }
  0xfb   :  { %1439 = vmatprep.subr.mxu0 %v863_v21  ;;  %1401 = vmatpush2.msra.mxu1 %v734_v23  ;;  %v361_v21 = vld [vmem:[#allocation2 + $0x8a8] sm:$0xff]  ;;  %v104_v23 = vld [vmem:[#allocation2 + $0xa0] sm:$0xff] }
  0xfc   :  { %1440 = vmatpush1.msra.mxu0 %v862_v24  ;;  %1402 = vmatprep.subr.mxu1 %v727_v26  ;;  %v360_v24 = vld [vmem:[#allocation2 + $0x8a0] sm:$0xff]  ;;  %v97_v26 = vld [vmem:[#allocation2 + $0x68] sm:$0xff] }
  0xfd   :  { %1441 = vmatprep.subr.mxu0 %v855_v27  ;;  %1403 = vmatpush2.msra.mxu1 %v726_v28  ;;  %v353_v27 = vld [vmem:[#allocation2 + $0x868] sm:$0xff]  ;;  %v96_v28 = vld [vmem:[#allocation2 + $0x60] sm:$0xff] }
  0xfe   :  { %1404 = vmatprep.mubr.f32.mxu1 %v3652_v10  ;;  %1442 = vmatpush1.msra.mxu0 %v854_v29  ;;  %v200_v10 = vld [vmem:[#allocation2 + $0x3a0] sm:$0xff] }
  0xff   :  { %1475 = vmatprep.mubr.f32.mxu0 %v3573_v17  ;;  %1405 = vmatmul.mubr.f32.vlgmr.msra.gmra.mxu1 %v3657_v12  ;;  %v192_v12 = vld [vmem:[#allocation2 + $0x360] sm:$0xff] }
 0x100   :  { %3384 = vmatmul.mubr.msk.f32.vlgmr.msra.gmra.mxu0 %vm910_vm0, %v3681_v63  ;;  %1482 = vmatprep.subr.mxu0 %v209_v30  ;;  %v352_v29 = vld [vmem:[#allocation2 + $0x860] sm:$0xff]  ;;  %v89_v30 = vld [vmem:[#allocation2 + $0x28] sm:$0xff] }
 0x101   :  { %1553 = vmatprep.subr.mxu1 %v465_v31  ;;  %1483 = vmatpush1.msra.mxu0 %v208_v32  ;;  %v345_v31 = vld [vmem:[#allocation2 + $0x828] sm:$0xff]  ;;  %v88_v32 = vld [vmem:[#allocation2 + $0x20] sm:$0xff] }
 0x102   :  { %1554 = vmatpush1.msra.mxu1 %v464_v33  ;;  %1484 = vmatprep.subr.mxu0 %v201_v34  ;;  %v344_v33 = vld [vmem:[#allocation2 + $0x820] sm:$0xff]  ;;  %v337_v34 = vld [vmem:[#allocation2 + $0x7e8] sm:$0xff] }
 0x103   :  { %1555 = vmatprep.subr.mxu1 %v457_v2  ;;  %1485 = vmatpush1.msra.mxu0 %v200_v10  ;;  %v593_v2 = vld [vmem:[#allocation2 + $0xfe8] sm:$0xff]  ;;  %v336_v10 = vld [vmem:[#allocation2 + $0x7e0] sm:$0xff] }
 0x104   :  { %1556 = vmatpush1.msra.mxu1 %v456_v35  ;;  %1486 = vmatprep.subr.mxu0 %v193_v36  ;;  %v592_v35 = vld [vmem:[#allocation2 + $0xfe0] sm:$0xff]  ;;  %v329_v36 = vld [vmem:[#allocation2 + $0x7a8] sm:$0xff] }
 0x105   :  { %1557 = vmatprep.subr.mxu1 %v449_v37  ;;  %1487 = vmatpush1.msra.mxu0 %v192_v12  ;;  %v585_v37 = vld [vmem:[#allocation2 + $0xfa8] sm:$0xff]  ;;  %v328_v12 = vld [vmem:[#allocation2 + $0x7a0] sm:$0xff] }
 0x106   :  { %1558 = vmatpush1.msra.mxu1 %v448_v38  ;;  %1488 = vmatprep.subr.mxu0 %v185_v39  ;;  %v584_v38 = vld [vmem:[#allocation2 + $0xfa0] sm:$0xff]  ;;  %v321_v39 = vld [vmem:[#allocation2 + $0x768] sm:$0xff] }
 0x107   :  { %1559 = vmatprep.subr.mxu1 %v441_v40  ;;  %1489 = vmatpush1.msra.mxu0 %v184_v41  ;;  %v577_v40 = vld [vmem:[#allocation2 + $0xf68] sm:$0xff]  ;;  %v320_v41 = vld [vmem:[#allocation2 + $0x760] sm:$0xff] }
 0x108   :  { %1560 = vmatpush1.msra.mxu1 %v440_v42  ;;  %1490 = vmatprep.subr.mxu0 %v177_v43  ;;  %v576_v42 = vld [vmem:[#allocation2 + $0xf60] sm:$0xff]  ;;  %v313_v43 = vld [vmem:[#allocation2 + $0x728] sm:$0xff] }
 0x109   :  { %1561 = vmatprep.subr.mxu1 %v433_v44  ;;  %1491 = vmatpush1.msra.mxu0 %v176_v45  ;;  %v569_v44 = vld [vmem:[#allocation2 + $0xf28] sm:$0xff]  ;;  %v312_v45 = vld [vmem:[#allocation2 + $0x720] sm:$0xff] }
 0x10a   :  { %1562 = vmatpush1.msra.mxu1 %v432_v46  ;;  %1492 = vmatprep.subr.mxu0 %v169_v47  ;;  %v568_v46 = vld [vmem:[#allocation2 + $0xf20] sm:$0xff]  ;;  %v305_v47 = vld [vmem:[#allocation2 + $0x6e8] sm:$0xff] }
 0x10b   :  { %1563 = vmatprep.subr.mxu1 %v425_v48  ;;  %1493 = vmatpush1.msra.mxu0 %v168_v49  ;;  %v561_v48 = vld [vmem:[#allocation2 + $0xee8] sm:$0xff]  ;;  %v304_v49 = vld [vmem:[#allocation2 + $0x6e0] sm:$0xff] }
 0x10c   :  { %1564 = vmatpush1.msra.mxu1 %v424_v50  ;;  %1494 = vmatprep.subr.mxu0 %v161_v51  ;;  %v560_v50 = vld [vmem:[#allocation2 + $0xee0] sm:$0xff]  ;;  %v870_v51 = vlaneseq }
 0x10d   :  { %1565 = vmatprep.subr.mxu1 %v417_v52  ;;  %1495 = vmatpush1.msra.mxu0 %v160_v53  ;;  %v297_v52 = vld [vmem:[#allocation2 + $0x6a8] sm:$0xff] }
 0x10e   :  { %1566 = vmatpush1.msra.mxu1 %v416_v54  ;;  %1496 = vmatprep.subr.mxu0 %v153_v55  ;;  %v553_v53 = vld [vmem:[#allocation2 + $0xea8] sm:$0xff]  ;;  %v296_v54 = vld [vmem:[#allocation2 + $0x6a0] sm:$0xff] }
 0x10f   :  { %1567 = vmatprep.subr.mxu1 %v409_v56  ;;  %1497 = vmatpush1.msra.mxu0 %v152_v57  ;;  %v552_v55 = vld [vmem:[#allocation2 + $0xea0] sm:$0xff]  ;;  %v289_v56 = vld [vmem:[#allocation2 + $0x668] sm:$0xff] }
 0x110   :  { %1568 = vmatpush1.msra.mxu1 %v408_v58  ;;  %1498 = vmatprep.subr.mxu0 %v145_v59  ;;  %v545_v57 = vld [vmem:[#allocation2 + $0xe68] sm:$0xff]  ;;  %v288_v58 = vld [vmem:[#allocation2 + $0x660] sm:$0xff] }
 0x111   :  { %1569 = vmatprep.subr.mxu1 %v401_v60  ;;  %1499 = vmatpush1.msra.mxu0 %v144_v61  ;;  %v544_v59 = vld [vmem:[#allocation2 + $0xe60] sm:$0xff]  ;;  %v3685_v60 = vshrl.u32 %v870_v51, 7  ;;  %v281_v61 = vld [vmem:[#allocation2 + $0x628] sm:$0xff] }
 0x112   :  { %1570 = vmatpush1.msra.mxu1 %v400_v62  ;;  %1500 = vmatprep.subr.mxu0 %v137_v0  ;;  %v537_v62 = vld [vmem:[#allocation2 + $0xe28] sm:$0xff]  ;;  %v280_v0 = vld [vmem:[#allocation2 + $0x620] sm:$0xff] }
 0x113   :  { %1571 = vmatprep.subr.mxu1 %v393_v1  ;;  %1501 = vmatpush1.msra.mxu0 %v136_v3  ;;  %v536_v1 = vld [vmem:[#allocation2 + $0xe20] sm:$0xff]  ;;  %v273_v3 = vld [vmem:[#allocation2 + $0x5e8] sm:$0xff] }
 0x114   :  { %1572 = vmatpush1.msra.mxu1 %v392_v4  ;;  %1502 = vmatprep.subr.mxu0 %v129_v5  ;;  %v529_v4 = vld [vmem:[#allocation2 + $0xde8] sm:$0xff]  ;;  %v272_v5 = vld [vmem:[#allocation2 + $0x5e0] sm:$0xff] }
 0x115   :  { %1573 = vmatprep.subr.mxu1 %v385_v6  ;;  %1503 = vmatpush1.msra.mxu0 %v128_v7  ;;  %v528_v6 = vld [vmem:[#allocation2 + $0xde0] sm:$0xff]  ;;  %v872_v7 = vsub.s32 0, %v3685_v60  ;;  %v857_v51 = vld [vmem:[#allocation2 + $0x1828] sm:$0xff] }
 0x116   :  { %1574 = vmatpush1.msra.mxu1 %v384_v8  ;;  %1504 = vmatprep.subr.mxu0 %v121_v9  ;;  %v265_v8 = vld [vmem:[#allocation2 + $0x5a8] sm:$0xff] }
 0x117   :  { %1575 = vmatprep.subr.mxu1 %v377_v11  ;;  %1505 = vmatpush1.msra.mxu0 %v120_v13  ;;  %v521_v9 = vld [vmem:[#allocation2 + $0xda8] sm:$0xff]  ;;  %v868_v11 = vld [vmem:[#allocation4] sm:$0xff] }
 0x118   :  { %1576 = vmatpush1.msra.mxu1 %v376_v14  ;;  %1506 = vmatprep.subr.mxu0 %v113_v15  ;;  %v264_v13 = vld [vmem:[#allocation2 + $0x5a0] sm:$0xff]  ;;  %v257_v15 = vld [vmem:[#allocation2 + $0x568] sm:$0xff] }
 0x119   :  { %1577 = vmatprep.subr.mxu1 %v369_v16  ;;  %1507 = vmatpush1.msra.mxu0 %v112_v18  ;;  %v520_v14 = vld [vmem:[#allocation2 + $0xda0] sm:$0xff]  ;;  %v513_v16 = vld [vmem:[#allocation2 + $0xd68] sm:$0xff] }
 0x11a   :  { %1578 = vmatpush1.msra.mxu1 %v368_v19  ;;  %1508 = vmatprep.subr.mxu0 %v105_v20  ;;  %v256_v18 = vld [vmem:[#allocation2 + $0x560] sm:$0xff]  ;;  %v873_v20 = vrot.slane %v868_v11, %v872_v7  ;;  %v178_v11 = vld [vmem:[#allocation2 + $0x2f0] sm:$0xff] }
 0x11b   :  { %1579 = vmatprep.subr.mxu1 %v361_v21  ;;  %1509 = vmatpush1.msra.mxu0 %v104_v23  ;;  %v512_v19 = vld [vmem:[#allocation2 + $0xd60] sm:$0xff]  ;;  %v249_v21 = vld [vmem:[#allocation2 + $0x528] sm:$0xff] }
 0x11c   :  { %1580 = vmatpush1.msra.mxu1 %v360_v24  ;;  %1510 = vmatprep.subr.mxu0 %v97_v26  ;;  %v505_v23 = vld [vmem:[#allocation2 + $0xd28] sm:$0xff]  ;;  %v248_v24 = vld [vmem:[#allocation2 + $0x520] sm:$0xff] }
 0x11d   :  { %1581 = vmatprep.subr.mxu1 %v353_v27  ;;  %1511 = vmatpush1.msra.mxu0 %v96_v28  ;;  %v504_v26 = vld [vmem:[#allocation2 + $0xd20] sm:$0xff]  ;;  %v241_v27 = vld [vmem:[#allocation2 + $0x4e8] sm:$0xff] }
 0x11e   :  { %1582 = vmatpush1.msra.mxu1 %v352_v29  ;;  %1512 = vmatprep.subr.mxu0 %v89_v30  ;;  %v497_v28 = vld [vmem:[#allocation2 + $0xce8] sm:$0xff]  ;;  %v240_v30 = vld [vmem:[#allocation2 + $0x4e0] sm:$0xff] }
 0x11f   :  { %1583 = vmatprep.subr.mxu1 %v345_v31  ;;  %1513 = vmatpush1.msra.mxu0 %v88_v32  ;;  %v496_v31 = vld [vmem:[#allocation2 + $0xce0] sm:$0xff] }
 0x120   :  { %1584 = vmatpush1.msra.mxu1 %v344_v33  ;;  %1514 = vmatprep.subr.mxu0 %v337_v34  ;;  %v233_v33 = vld [vmem:[#allocation2 + $0x4a8] sm:$0xff] }
 0x121   :  { %1585 = vmatprep.subr.mxu1 %v593_v2  ;;  %1515 = vmatpush2.msra.mxu0 %v336_v10  ;;  %v489_v34 = vld [vmem:[#allocation2 + $0xca8] sm:$0xff]  ;;  %v232_v10 = vld [vmem:[#allocation2 + $0x4a0] sm:$0xff] }
 0x122   :  { %1586 = vmatpush2.msra.mxu1 %v592_v35  ;;  %1516 = vmatprep.subr.mxu0 %v329_v36  ;;  %v488_v35 = vld [vmem:[#allocation2 + $0xca0] sm:$0xff] }
 0x123   :  { %1587 = vmatprep.subr.mxu1 %v585_v37  ;;  %1517 = vmatpush2.msra.mxu0 %v328_v12  ;;  %v225_v37 = vld [vmem:[#allocation2 + $0x468] sm:$0xff] }
 0x124   :  { %1588 = vmatpush2.msra.mxu1 %v584_v38  ;;  %1518 = vmatprep.subr.mxu0 %v321_v39  ;;  %v481_v12 = vld [vmem:[#allocation2 + $0xc68] sm:$0xff]  ;;  %v224_v38 = vld [vmem:[#allocation2 + $0x460] sm:$0xff] }
 0x125   :  { %1589 = vmatprep.subr.mxu1 %v577_v40  ;;  %1519 = vmatpush2.msra.mxu0 %v320_v41  ;;  %v480_v39 = vld [vmem:[#allocation2 + $0xc60] sm:$0xff]  ;;  %v217_v40 = vld [vmem:[#allocation2 + $0x428] sm:$0xff] }
 0x126   :  { %1590 = vmatpush2.msra.mxu1 %v576_v42  ;;  %1520 = vmatprep.subr.mxu0 %v313_v43  ;;  %v473_v41 = vld [vmem:[#allocation2 + $0xc28] sm:$0xff]  ;;  %v216_v42 = vld [vmem:[#allocation2 + $0x420] sm:$0xff] }
 0x127   :  { %1591 = vmatprep.subr.mxu1 %v569_v44  ;;  %1521 = vmatpush2.msra.mxu0 %v312_v45  ;;  %v472_v43 = vld [vmem:[#allocation2 + $0xc20] sm:$0xff]  ;;  %v3695_v44 = vld [vmem:[%s4044_s0 + $0x8] sm:$0xff] }
 0x128   :  { %1592 = vmatpush2.msra.mxu1 %v568_v46  ;;  %1522 = vmatprep.subr.mxu0 %v305_v47  ;;  %v721_v45 = vld [vmem:[#allocation2 + $0x13e8] sm:$0xff]  ;;  %v720_v47 = vld [vmem:[#allocation2 + $0x13e0] sm:$0xff] }
 0x129   :  { %1593 = vmatprep.subr.mxu1 %v561_v48  ;;  %1523 = vmatpush2.msra.mxu0 %v304_v49  ;;  %v865_v46 = vld [vmem:[#allocation2 + $0x1868] sm:$0xff]  ;;  %v864_v48 = vld [vmem:[#allocation2 + $0x1860] sm:$0xff] }
 0x12a   :  { %1594 = vmatpush2.msra.mxu1 %v560_v50  ;;  %1524 = vmatprep.subr.mxu0 %v297_v52  ;;  %v3702_v49 = vld [vmem:[%s4044_s0] sm:$0xff]  ;;  %v713_v50 = vld [vmem:[#allocation2 + $0x13a8] sm:$0xff] }
 0x12b   :  { %1595 = vmatprep.subr.mxu1 %v553_v53  ;;  %1525 = vmatpush2.msra.mxu0 %v296_v54  ;;  %v712_v52 = vld [vmem:[#allocation2 + $0x13a0] sm:$0xff]  ;;  %v211_v54 = vld [vmem:[#allocation2 + $0x3f8] sm:$0xff] }
 0x12c   :  { %1596 = vmatpush2.msra.mxu1 %v552_v55  ;;  %1526 = vmatprep.subr.mxu0 %v289_v56  ;;  %v856_v53 = vld [vmem:[#allocation2 + $0x1820] sm:$0xff]  ;;  %v210_v56 = vld [vmem:[#allocation2 + $0x3f0] sm:$0xff] }
 0x12d   :  { %1597 = vmatprep.subr.mxu1 %v545_v57  ;;  %1527 = vmatpush2.msra.mxu0 %v288_v58  ;;  %v704_v55 = vld [vmem:[#allocation2 + $0x1360] sm:$0xff]  ;;  %v203_v57 = vld [vmem:[#allocation2 + $0x3b8] sm:$0xff] }
 0x12e   :  { %1598 = vmatpush2.msra.mxu1 %v544_v59  ;;  %1528 = vmatprep.subr.mxu0 %v281_v61  ;;  %v696_v58 = vld [vmem:[#allocation2 + $0x1320] sm:$0xff]  ;;  %v202_v59 = vld [vmem:[#allocation2 + $0x3b0] sm:$0xff]  ;;  %v689_v61 = vld [vmem:[#allocation2 + $0x12e8] sm:$0xff] }
 0x12f   :  { %1599 = vmatprep.subr.mxu1 %v537_v62  ;;  %1529 = vmatpush2.msra.mxu0 %v280_v0  ;;  %v195_v62 = vld [vmem:[#allocation2 + $0x378] sm:$0xff]  ;;  %v688_v0 = vld [vmem:[#allocation2 + $0x12e0] sm:$0xff] }
 0x130   :  { %1600 = vmatpush2.msra.mxu1 %v536_v1  ;;  %1530 = vmatprep.subr.mxu0 %v273_v3  ;;  %v194_v1 = vld [vmem:[#allocation2 + $0x370] sm:$0xff]  ;;  %v681_v3 = vld [vmem:[#allocation2 + $0x12a8] sm:$0xff] }
 0x131   :  { %1601 = vmatprep.subr.mxu1 %v529_v4  ;;  %1531 = vmatpush2.msra.mxu0 %v272_v5  ;;  %v187_v4 = vld [vmem:[#allocation2 + $0x338] sm:$0xff]  ;;  %v680_v5 = vld [vmem:[#allocation2 + $0x12a0] sm:$0xff] }
 0x132   :  { %1602 = vmatpush2.msra.mxu1 %v528_v6  ;;  %1532 = vmatprep.subr.mxu0 %v265_v8  ;;  %v186_v6 = vld [vmem:[#allocation2 + $0x330] sm:$0xff]  ;;  %v179_v8 = vld [vmem:[#allocation2 + $0x2f8] sm:$0xff] }
 0x133   :  { %1603 = vmatprep.subr.mxu1 %v521_v9  ;;  %1533 = vmatpush2.msra.mxu0 %v264_v13  ;;  %v672_v9 = vld [vmem:[#allocation2 + $0x1260] sm:$0xff]  ;;  %v665_v13 = vld [vmem:[#allocation2 + $0x1228] sm:$0xff] }
 0x134   :  { %1604 = vmatpush2.msra.mxu1 %v520_v14  ;;  %1534 = vmatprep.subr.mxu0 %v257_v15  ;;  %v171_v14 = vld [vmem:[#allocation2 + $0x2b8] sm:$0xff]  ;;  %v664_v15 = vld [vmem:[#allocation2 + $0x1220] sm:$0xff] }
 0x135   :  { %1605 = vmatprep.subr.mxu1 %v513_v16  ;;  %1535 = vmatpush2.msra.mxu0 %v256_v18  ;;  %v980_v29 = vpop.f32.mrf.mxu0  ;;  %v170_v16 = vld [vmem:[#allocation2 + $0x2b0] sm:$0xff]  ;;  %v657_v18 = vld [vmem:[#allocation2 + $0x11e8] sm:$0xff] }
 0x136   :  { %1606 = vmatpush2.msra.mxu1 %v512_v19  ;;  %1536 = vmatprep.subr.mxu0 %v249_v21  ;;  %v981_v32 = vadd.f32 %v980_v29, %v873_v20  ;;  %v1051_v2 = vpop.f32.mrf.mxu1  ;;  %v163_v19 = vld [vmem:[#allocation2 + $0x278] sm:$0xff]  ;;  %v656_v20 = vld [vmem:[#allocation2 + $0x11e0] sm:$0xff]  ;;  %v162_v21 = vld [vmem:[#allocation2 + $0x270] sm:$0xff] }
 0x137   :  { %1607 = vmatprep.subr.mxu1 %v505_v23  ;;  %1537 = vmatpush2.msra.mxu0 %v248_v24  ;;  %v649_v23 = vld [vmem:[#allocation2 + $0x11a8] sm:$0xff]  ;;  %v155_v24 = vld [vmem:[#allocation2 + $0x238] sm:$0xff] }
 0x138   :  { %1608 = vmatpush2.msra.mxu1 %v504_v26  ;;  %1538 = vmatprep.subr.mxu0 %v241_v27  ;;  %v3690_v36 = vadd.f32 %v1051_v2, %v981_v32  ;;  %v648_v26 = vld [vmem:[#allocation2 + $0x11a0] sm:$0xff]  ;;  %v154_v27 = vld [vmem:[#allocation2 + $0x230] sm:$0xff]  ;;  %v147_v29 = vld [vmem:[#allocation2 + $0x1f8] sm:$0xff] }
 0x139   :  { %1609 = vmatprep.subr.mxu1 %v497_v28  ;;  %1539 = vmatpush2.msra.mxu0 %v240_v30  ;;  %v641_v28 = vld [vmem:[#allocation2 + $0x1168] sm:$0xff]  ;;  %v640_v30 = vld [vmem:[#allocation2 + $0x1160] sm:$0xff]  ;;  %v138_v2 = vld [vmem:[#allocation2 + $0x1b0] sm:$0xff] }
 0x13a   :  { %1610 = vmatpush2.msra.mxu1 %v496_v31  ;;  %1540 = vmatprep.subr.mxu0 %v233_v33  ;;  %v146_v31 = vld [vmem:[#allocation2 + $0x1f0] sm:$0xff]  ;;  %v633_v32 = vld [vmem:[#allocation2 + $0x1128] sm:$0xff]  ;;  %v139_v33 = vld [vmem:[#allocation2 + $0x1b8] sm:$0xff] }
 0x13b   :  { %1611 = vmatprep.subr.mxu1 %v489_v34  ;;  %1541 = vmatpush2.msra.mxu0 %v232_v10  ;;  %v632_v34 = vld [vmem:[#allocation2 + $0x1120] sm:$0xff]  ;;  %v625_v10 = vld [vmem:[#allocation2 + $0x10e8] sm:$0xff] }
 0x13c   :  { %1612 = vmatpush2.msra.mxu1 %v488_v35  ;;  %1542 = vmatprep.subr.mxu0 %v225_v37  ;;  %v131_v35 = vld [vmem:[#allocation2 + $0x178] sm:$0xff]  ;;  %v624_v37 = vld [vmem:[#allocation2 + $0x10e0] sm:$0xff] }
 0x13d   :  { %1613 = vmatprep.subr.mxu1 %v481_v12  ;;  %1543 = vmatpush2.msra.mxu0 %v224_v38  ;;  %v130_v12 = vld [vmem:[#allocation2 + $0x170] sm:$0xff]  ;;  %v617_v38 = vld [vmem:[#allocation2 + $0x10a8] sm:$0xff] }
 0x13e   :  { %1614 = vmatpush2.msra.mxu1 %v480_v39  ;;  %1544 = vmatprep.subr.mxu0 %v217_v40  ;;  %v123_v39 = vld [vmem:[#allocation2 + $0x138] sm:$0xff]  ;;  %v616_v40 = vld [vmem:[#allocation2 + $0x10a0] sm:$0xff] }
 0x13f   :  { %1615 = vmatprep.subr.mxu1 %v473_v41  ;;  %1545 = vmatpush2.msra.mxu0 %v216_v42  ;;  %v122_v41 = vld [vmem:[#allocation2 + $0x130] sm:$0xff]  ;;  %v609_v42 = vld [vmem:[#allocation2 + $0x1068] sm:$0xff] }
 0x140   :  { %1546 = vmatprep.mubr.f32.mxu0 %v3695_v44  ;;  %1616 = vmatpush2.msra.mxu1 %v472_v43  ;;  %v115_v43 = vld [vmem:[#allocation2 + $0xf8] sm:$0xff] }
 0x141   :  { %1617 = vmatprep.mubr.f32.mxu1 %v3666_v22  ;;  %1547 = vmatmul.mubr.f32.vlgmr.msra.gmra.mxu0 %v3702_v49  ;;  %v705_v22 = vld [vmem:[#allocation2 + $0x1368] sm:$0xff] }
 0x142   :  { %1618 = vmatmul.mubr.f32.vlgmr.msra.gmra.mxu1 %v3672_v25  ;;  %1624 = vmatprep.subr.mxu0 %v721_v45  ;;  %v697_v25 = vld [vmem:[#allocation2 + $0x1328] sm:$0xff]  ;;  %v608_v45 = vld [vmem:[#allocation2 + $0x1060] sm:$0xff] }
 0x143   :  { %1723 = vmatprep.subr.mxu1 %v865_v46  ;;  %1625 = vmatpush1.msra.mxu0 %v720_v47  ;;  %v114_v46 = vld [vmem:[#allocation2 + $0xf0] sm:$0xff]  ;;  %v601_v47 = vld [vmem:[#allocation2 + $0x1028] sm:$0xff] }
 0x144   :  { %1724 = vmatpush1.msra.mxu1 %v864_v48  ;;  %1626 = vmatprep.subr.mxu0 %v713_v50  ;;  %v107_v48 = vld [vmem:[#allocation2 + $0xb8] sm:$0xff]  ;;  %v600_v50 = vld [vmem:[#allocation2 + $0x1020] sm:$0xff] }
 0x145   :  { %1725 = vmatprep.subr.mxu1 %v857_v51  ;;  %1627 = vmatpush1.msra.mxu0 %v712_v52  ;;  %v106_v51 = vld [vmem:[#allocation2 + $0xb0] sm:$0xff]  ;;  %v849_v52 = vld [vmem:[#allocation2 + $0x17e8] sm:$0xff] }
 0x146   :  { %1726 = vmatpush1.msra.mxu1 %v856_v53  ;;  %1759 = vmatprep.mubr.f32.mxu1 %v3573_v17  ;;  %v99_v53 = vld [vmem:[#allocation2 + $0x78] sm:$0xff] }
 0x147   :  { %1628 = vmatprep.subr.mxu0 %v705_v22  ;;  %3385 = vmatmul.mubr.msk.f32.vlgmr.msra.gmra.mxu1 %vm910_vm0, %v3681_v63  ;;  %v673_v63 = vld [vmem:[#allocation2 + $0x1268] sm:$0xff]  ;;  %v848_v22 = vld [vmem:[#allocation2 + $0x17e0] sm:$0xff] }
 0x148   :  { %1766 = vmatprep.subr.mxu1 %v211_v54  ;;  %1629 = vmatpush1.msra.mxu0 %v704_v55  ;;  %v98_v54 = vld [vmem:[#allocation2 + $0x70] sm:$0xff]  ;;  %v841_v55 = vld [vmem:[#allocation2 + $0x17a8] sm:$0xff] }
 0x149   :  { %1767 = vmatpush1.msra.mxu1 %v210_v56  ;;  %1630 = vmatprep.subr.mxu0 %v697_v25  ;;  %v91_v56 = vld [vmem:[#allocation2 + $0x38] sm:$0xff]  ;;  %v840_v25 = vld [vmem:[#allocation2 + $0x17a0] sm:$0xff] }
 0x14a   :  { %1768 = vmatprep.subr.mxu1 %v203_v57  ;;  %1631 = vmatpush1.msra.mxu0 %v696_v58  ;;  %v90_v57 = vld [vmem:[#allocation2 + $0x30] sm:$0xff]  ;;  %v833_v58 = vld [vmem:[#allocation2 + $0x1768] sm:$0xff] }
 0x14b   :  { %1769 = vmatpush1.msra.mxu1 %v202_v59  ;;  %1632 = vmatprep.subr.mxu0 %v689_v61  ;;  %v339_v59 = vld [vmem:[#allocation2 + $0x7f8] sm:$0xff]  ;;  %v832_v61 = vld [vmem:[#allocation2 + $0x1760] sm:$0xff] }
 0x14c   :  { %1770 = vmatprep.subr.mxu1 %v195_v62  ;;  %1633 = vmatpush1.msra.mxu0 %v688_v0  ;;  %v338_v62 = vld [vmem:[#allocation2 + $0x7f0] sm:$0xff]  ;;  %v825_v0 = vld [vmem:[#allocation2 + $0x1728] sm:$0xff] }
 0x14d   :  { %1771 = vmatpush1.msra.mxu1 %v194_v1  ;;  %1634 = vmatprep.subr.mxu0 %v681_v3  ;;  %v331_v1 = vld [vmem:[#allocation2 + $0x7b8] sm:$0xff]  ;;  %v824_v3 = vld [vmem:[#allocation2 + $0x1720] sm:$0xff] }
 0x14e   :  { %1772 = vmatprep.subr.mxu1 %v187_v4  ;;  %1635 = vmatpush1.msra.mxu0 %v680_v5  ;;  %v330_v4 = vld [vmem:[#allocation2 + $0x7b0] sm:$0xff]  ;;  %v817_v5 = vld [vmem:[#allocation2 + $0x16e8] sm:$0xff] }
 0x14f   :  { %1773 = vmatpush1.msra.mxu1 %v186_v6  ;;  %1636 = vmatprep.subr.mxu0 %v673_v63  ;;  %v323_v6 = vld [vmem:[#allocation2 + $0x778] sm:$0xff]  ;;  %v816_v63 = vld [vmem:[#allocation2 + $0x16e0] sm:$0xff] }
 0x150   :  { %1774 = vmatprep.subr.mxu1 %v179_v8  ;;  %1637 = vmatpush1.msra.mxu0 %v672_v9  ;;  %v322_v8 = vld [vmem:[#allocation2 + $0x770] sm:$0xff]  ;;  %v809_v9 = vld [vmem:[#allocation2 + $0x16a8] sm:$0xff] }
 0x151   :  { %1775 = vmatpush1.msra.mxu1 %v178_v11  ;;  %1638 = vmatprep.subr.mxu0 %v665_v13  ;;  %v315_v11 = vld [vmem:[#allocation2 + $0x738] sm:$0xff]  ;;  %v808_v13 = vld [vmem:[#allocation2 + $0x16a0] sm:$0xff] }
 0x152   :  { %1776 = vmatprep.subr.mxu1 %v171_v14  ;;  %1639 = vmatpush1.msra.mxu0 %v664_v15  ;;  %v314_v14 = vld [vmem:[#allocation2 + $0x730] sm:$0xff]  ;;  %v801_v15 = vld [vmem:[#allocation2 + $0x1668] sm:$0xff] }
 0x153   :  { %1777 = vmatpush1.msra.mxu1 %v170_v16  ;;  %1640 = vmatprep.subr.mxu0 %v657_v18  ;;  %v307_v16 = vld [vmem:[#allocation2 + $0x6f8] sm:$0xff]  ;;  %v800_v18 = vld [vmem:[#allocation2 + $0x1660] sm:$0xff] }
 0x154   :  { %1778 = vmatprep.subr.mxu1 %v163_v19  ;;  %1641 = vmatpush1.msra.mxu0 %v656_v20  ;;  %v306_v19 = vld [vmem:[#allocation2 + $0x6f0] sm:$0xff]  ;;  %v793_v20 = vld [vmem:[#allocation2 + $0x1628] sm:$0xff] }
 0x155   :  { %1779 = vmatpush1.msra.mxu1 %v162_v21  ;;  %1642 = vmatprep.subr.mxu0 %v649_v23  ;;  %v299_v21 = vld [vmem:[#allocation2 + $0x6b8] sm:$0xff]  ;;  %v792_v23 = vld [vmem:[#allocation2 + $0x1620] sm:$0xff] }
 0x156   :  { %1780 = vmatprep.subr.mxu1 %v155_v24  ;;  %1643 = vmatpush1.msra.mxu0 %v648_v26  ;;  %v298_v24 = vld [vmem:[#allocation2 + $0x6b0] sm:$0xff]  ;;  %v785_v26 = vld [vmem:[#allocation2 + $0x15e8] sm:$0xff] }
 0x157   :  { %1781 = vmatpush1.msra.mxu1 %v154_v27  ;;  %1644 = vmatprep.subr.mxu0 %v641_v28  ;;  %v291_v27 = vld [vmem:[#allocation2 + $0x678] sm:$0xff]  ;;  %v784_v28 = vld [vmem:[#allocation2 + $0x15e0] sm:$0xff] }
 0x158   :  { %1782 = vmatprep.subr.mxu1 %v147_v29  ;;  %1645 = vmatpush1.msra.mxu0 %v640_v30  ;;  %v290_v29 = vld [vmem:[#allocation2 + $0x670] sm:$0xff]  ;;  %v777_v30 = vld [vmem:[#allocation2 + $0x15a8] sm:$0xff] }
 0x159   :  { %1783 = vmatpush1.msra.mxu1 %v146_v31  ;;  %1646 = vmatprep.subr.mxu0 %v633_v32  ;;  %v283_v31 = vld [vmem:[#allocation2 + $0x638] sm:$0xff]  ;;  %v776_v32 = vld [vmem:[#allocation2 + $0x15a0] sm:$0xff] }
 0x15a   :  { %1784 = vmatprep.subr.mxu1 %v139_v33  ;;  %1647 = vmatpush1.msra.mxu0 %v632_v34  ;;  %v282_v33 = vld [vmem:[#allocation2 + $0x630] sm:$0xff]  ;;  %v769_v34 = vld [vmem:[#allocation2 + $0x1568] sm:$0xff] }
 0x15b   :  { %1785 = vmatpush1.msra.mxu1 %v138_v2  ;;  %1648 = vmatprep.subr.mxu0 %v625_v10  ;;  %v275_v2 = vld [vmem:[#allocation2 + $0x5f8] sm:$0xff]  ;;  %v3709_v10 = vpop.f32.mrf.mxu0 }
 0x15c   :  { %1786 = vmatprep.subr.mxu1 %v131_v35  ;;  %1649 = vmatpush1.msra.mxu0 %v624_v37  ;;  %v3711_v35 = vpop.f32.mrf.mxu1  ;;  %v768_v37 = vld [vmem:[#allocation2 + $0x1560] sm:$0xff] }
 0x15d   :  { %1787 = vmatpush1.msra.mxu1 %v130_v12  ;;  %1650 = vmatprep.subr.mxu0 %v617_v38  ;;  %v274_v12 = vld [vmem:[#allocation2 + $0x5f0] sm:$0xff]  ;;  %v761_v38 = vld [vmem:[#allocation2 + $0x1528] sm:$0xff] }
 0x15e   :  { %1788 = vmatprep.subr.mxu1 %v123_v39  ;;  %1651 = vmatpush1.msra.mxu0 %v616_v40  ;;  %v267_v39 = vld [vmem:[#allocation2 + $0x5b8] sm:$0xff]  ;;  %v760_v40 = vld [vmem:[#allocation2 + $0x1520] sm:$0xff] }
 0x15f   :  { %1789 = vmatpush1.msra.mxu1 %v122_v41  ;;  %1652 = vmatprep.subr.mxu0 %v609_v42  ;;  %v266_v41 = vld [vmem:[#allocation2 + $0x5b0] sm:$0xff] }
 0x160   :  { %1790 = vmatprep.subr.mxu1 %v115_v43  ;;  %1653 = vmatpush1.msra.mxu0 %v608_v45  ;;  %v753_v43 = vld [vmem:[#allocation2 + $0x14e8] sm:$0xff]  ;;  %v259_v45 = vld [vmem:[#allocation2 + $0x578] sm:$0xff] }
 0x161   :  { %1791 = vmatpush1.msra.mxu1 %v114_v46  ;;  %1654 = vmatprep.subr.mxu0 %v601_v47  ;;  %v1193_v47 = vpop.f32.mrf.mxu1 }
 0x162   :  { %1792 = vmatprep.subr.mxu1 %v107_v48  ;;  %1655 = vmatpush1.msra.mxu0 %v600_v50  ;;  %v752_v48 = vld [vmem:[#allocation2 + $0x14e0] sm:$0xff]  ;;  %v258_v50 = vld [vmem:[#allocation2 + $0x570] sm:$0xff] }
 0x163   :  { %1793 = vmatpush1.msra.mxu1 %v106_v51  ;;  %1656 = vmatprep.subr.mxu0 %v849_v52  ;;  %v745_v51 = vld [vmem:[#allocation2 + $0x14a8] sm:$0xff]  ;;  %v251_v52 = vld [vmem:[#allocation2 + $0x538] sm:$0xff] }
 0x164   :  { %1794 = vmatprep.subr.mxu1 %v99_v53  ;;  %1657 = vmatpush2.msra.mxu0 %v848_v22  ;;  %v744_v22 = vld [vmem:[#allocation2 + $0x14a0] sm:$0xff] }
 0x165   :  { %1795 = vmatpush1.msra.mxu1 %v98_v54  ;;  %1658 = vmatprep.subr.mxu0 %v841_v55  ;;  %v250_v54 = vld [vmem:[#allocation2 + $0x530] sm:$0xff]  ;;  %v737_v55 = vld [vmem:[#allocation2 + $0x1468] sm:$0xff] }
 0x166   :  { %1796 = vmatprep.subr.mxu1 %v91_v56  ;;  %1659 = vmatpush2.msra.mxu0 %v840_v25  ;;  %v243_v56 = vld [vmem:[#allocation2 + $0x4f8] sm:$0xff]  ;;  %v242_v25 = vld [vmem:[#allocation2 + $0x4f0] sm:$0xff] }
 0x167   :  { %1797 = vmatpush1.msra.mxu1 %v90_v57  ;;  %1660 = vmatprep.subr.mxu0 %v833_v58  ;;  %v729_v57 = vld [vmem:[#allocation2 + $0x1428] sm:$0xff]  ;;  %v235_v58 = vld [vmem:[#allocation2 + $0x4b8] sm:$0xff] }
 0x168   :  { %1798 = vmatprep.subr.mxu1 %v339_v59  ;;  %1661 = vmatpush2.msra.mxu0 %v832_v61  ;;  %v728_v59 = vld [vmem:[#allocation2 + $0x1420] sm:$0xff]  ;;  %v234_v61 = vld [vmem:[#allocation2 + $0x4b0] sm:$0xff] }
 0x169   :  { %1799 = vmatpush2.msra.mxu1 %v338_v62  ;;  %1662 = vmatprep.subr.mxu0 %v825_v0  ;;  %v227_v62 = vld [vmem:[#allocation2 + $0x478] sm:$0xff] }
 0x16a   :  { %1800 = vmatprep.subr.mxu1 %v331_v1  ;;  %1663 = vmatpush2.msra.mxu0 %v824_v3  ;;  %v467_v0 = vld [vmem:[#allocation2 + $0xbf8] sm:$0xff]  ;;  %v3719_v1 = vld [vmem:[%s4044_s0 + $0x28] sm:$0xff]  ;;  %v226_v3 = vld [vmem:[#allocation2 + $0x470] sm:$0xff] }
 0x16b   :  { %1801 = vmatpush2.msra.mxu1 %v330_v4  ;;  %1664 = vmatprep.subr.mxu0 %v817_v5  ;;  %v466_v4 = vld [vmem:[#allocation2 + $0xbf0] sm:$0xff]  ;;  %v3725_v5 = vld [vmem:[%s4044_s0 + $0x20] sm:$0xff] }
 0x16c   :  { %1802 = vmatprep.subr.mxu1 %v323_v6  ;;  %1665 = vmatpush2.msra.mxu0 %v816_v63  ;;  %v219_v6 = vld [vmem:[#allocation2 + $0x438] sm:$0xff] }
 0x16d   :  { %1803 = vmatpush2.msra.mxu1 %v322_v8  ;;  %1666 = vmatprep.subr.mxu0 %v809_v9  ;;  %v459_v63 = vld [vmem:[#allocation2 + $0xbb8] sm:$0xff]  ;;  %v218_v8 = vld [vmem:[#allocation2 + $0x430] sm:$0xff] }
 0x16e   :  { %1804 = vmatprep.subr.mxu1 %v315_v11  ;;  %1667 = vmatpush2.msra.mxu0 %v808_v13  ;;  %v458_v9 = vld [vmem:[#allocation2 + $0xbb0] sm:$0xff]  ;;  %v451_v11 = vld [vmem:[#allocation2 + $0xb78] sm:$0xff] }
 0x16f   :  { %1805 = vmatpush2.msra.mxu1 %v314_v14  ;;  %1668 = vmatprep.subr.mxu0 %v801_v15  ;;  %v723_v13 = vld [vmem:[#allocation2 + $0x13f8] sm:$0xff]  ;;  %v450_v14 = vld [vmem:[#allocation2 + $0xb70] sm:$0xff] }
 0x170   :  { %1806 = vmatprep.subr.mxu1 %v307_v16  ;;  %1669 = vmatpush2.msra.mxu0 %v800_v18  ;;  %v722_v15 = vld [vmem:[#allocation2 + $0x13f0] sm:$0xff]  ;;  %v443_v16 = vld [vmem:[#allocation2 + $0xb38] sm:$0xff] }
 0x171   :  { %1807 = vmatpush2.msra.mxu1 %v306_v19  ;;  %1670 = vmatprep.subr.mxu0 %v793_v20  ;;  %v715_v18 = vld [vmem:[#allocation2 + $0x13b8] sm:$0xff]  ;;  %v442_v19 = vld [vmem:[#allocation2 + $0xb30] sm:$0xff] }
 0x172   :  { %1808 = vmatprep.subr.mxu1 %v299_v21  ;;  %1671 = vmatpush2.msra.mxu0 %v792_v23  ;;  %v714_v20 = vld [vmem:[#allocation2 + $0x13b0] sm:$0xff]  ;;  %v435_v21 = vld [vmem:[#allocation2 + $0xaf8] sm:$0xff] }
 0x173   :  { %1809 = vmatpush2.msra.mxu1 %v298_v24  ;;  %1672 = vmatprep.subr.mxu0 %v785_v26  ;;  %v707_v23 = vld [vmem:[#allocation2 + $0x1378] sm:$0xff]  ;;  %v434_v24 = vld [vmem:[#allocation2 + $0xaf0] sm:$0xff] }
 0x174   :  { %1810 = vmatprep.subr.mxu1 %v291_v27  ;;  %1673 = vmatpush2.msra.mxu0 %v784_v28  ;;  %v706_v26 = vld [vmem:[#allocation2 + $0x1370] sm:$0xff]  ;;  %v699_v27 = vld [vmem:[#allocation2 + $0x1338] sm:$0xff] }
 0x175   :  { %1811 = vmatpush2.msra.mxu1 %v290_v29  ;;  %1674 = vmatprep.subr.mxu0 %v777_v30  ;;  %v698_v28 = vld [vmem:[#allocation2 + $0x1330] sm:$0xff]  ;;  %v419_v29 = vld [vmem:[#allocation2 + $0xa78] sm:$0xff] }
 0x176   :  { %1812 = vmatprep.subr.mxu1 %v283_v31  ;;  %1675 = vmatpush2.msra.mxu0 %v776_v32  ;;  %v691_v30 = vld [vmem:[#allocation2 + $0x12f8] sm:$0xff]  ;;  %v418_v31 = vld [vmem:[#allocation2 + $0xa70] sm:$0xff] }
 0x177   :  { %1813 = vmatpush2.msra.mxu1 %v282_v33  ;;  %1676 = vmatprep.subr.mxu0 %v769_v34  ;;  %v690_v32 = vld [vmem:[#allocation2 + $0x12f0] sm:$0xff]  ;;  %v411_v33 = vld [vmem:[#allocation2 + $0xa38] sm:$0xff] }
 0x178   :  { %1814 = vmatprep.subr.mxu1 %v275_v2  ;;  %v1122_v42 = vpop.f32.mrf.mxu0  ;;  %1677 = vmatpush2.msra.mxu0 %v768_v37  ;;  %v683_v34 = vld [vmem:[#allocation2 + $0x12b8] sm:$0xff]  ;;  %v410_v2 = vld [vmem:[#allocation2 + $0xa30] sm:$0xff] }
 0x179   :  { %1815 = vmatpush2.msra.mxu1 %v274_v12  ;;  %v1123_v46 = vadd.f32 %v1122_v42, %v3690_v36  ;;  %1678 = vmatprep.subr.mxu0 %v761_v38  ;;  %v736_v36 = vld [vmem:[#allocation2 + $0x1460] sm:$0xff]  ;;  %v682_v37 = vld [vmem:[#allocation2 + $0x12b0] sm:$0xff]  ;;  %v403_v12 = vld [vmem:[#allocation2 + $0x9f8] sm:$0xff] }
 0x17a   :  { %1816 = vmatprep.subr.mxu1 %v267_v39  ;;  %1679 = vmatpush2.msra.mxu0 %v760_v40  ;;  %v675_v38 = vld [vmem:[#allocation2 + $0x1278] sm:$0xff]  ;;  %v402_v39 = vld [vmem:[#allocation2 + $0x9f0] sm:$0xff] }
 0x17b   :  { %1817 = vmatpush2.msra.mxu1 %v266_v41  ;;  %v3714_v53 = vadd.f32 %v1193_v47, %v1123_v46  ;;  %1680 = vmatprep.subr.mxu0 %v753_v43  ;;  %v674_v40 = vld [vmem:[#allocation2 + $0x1270] sm:$0xff]  ;;  %v395_v41 = vld [vmem:[#allocation2 + $0x9b8] sm:$0xff] }
 0x17c   :  { %1818 = vmatprep.subr.mxu1 %v259_v45  ;;  %1681 = vmatpush2.msra.mxu0 %v752_v48  ;;  %v667_v42 = vld [vmem:[#allocation2 + $0x1238] sm:$0xff]  ;;  %v394_v43 = vld [vmem:[#allocation2 + $0x9b0] sm:$0xff] }
 0x17d   :  { %1819 = vmatpush2.msra.mxu1 %v258_v50  ;;  %1682 = vmatprep.subr.mxu0 %v745_v51  ;;  %v666_v45 = vld [vmem:[#allocation2 + $0x1230] sm:$0xff]  ;;  %v387_v46 = vld [vmem:[#allocation2 + $0x978] sm:$0xff] }
 0x17e   :  { %1820 = vmatprep.subr.mxu1 %v251_v52  ;;  %1683 = vmatpush2.msra.mxu0 %v744_v22  ;;  %v659_v47 = vld [vmem:[#allocation2 + $0x11f8] sm:$0xff]  ;;  %v386_v48 = vld [vmem:[#allocation2 + $0x970] sm:$0xff] }
 0x17f   :  { %1821 = vmatpush2.msra.mxu1 %v250_v54  ;;  %1684 = vmatprep.subr.mxu0 %v737_v55  ;;  %v658_v50 = vld [vmem:[#allocation2 + $0x11f0] sm:$0xff]  ;;  %v379_v51 = vld [vmem:[#allocation2 + $0x938] sm:$0xff] }
 0x180   :  { %1822 = vmatprep.subr.mxu1 %v243_v56  ;;  %1685 = vmatpush2.msra.mxu0 %v736_v36  ;;  %v651_v52 = vld [vmem:[#allocation2 + $0x11b8] sm:$0xff]  ;;  %v378_v22 = vld [vmem:[#allocation2 + $0x930] sm:$0xff] }
 0x181   :  { %1823 = vmatpush2.msra.mxu1 %v242_v25  ;;  %1686 = vmatprep.subr.mxu0 %v729_v57  ;;  %v650_v54 = vld [vmem:[#allocation2 + $0x11b0] sm:$0xff]  ;;  %v371_v55 = vld [vmem:[#allocation2 + $0x8f8] sm:$0xff] }
 0x182   :  { %1824 = vmatprep.subr.mxu1 %v235_v58  ;;  %1687 = vmatpush2.msra.mxu0 %v728_v59  ;;  %v643_v56 = vld [vmem:[#allocation2 + $0x1178] sm:$0xff]  ;;  %v370_v36 = vld [vmem:[#allocation2 + $0x8f0] sm:$0xff] }
 0x183   :  { %1688 = vmatprep.mubr.f32.mxu0 %v3719_v1  ;;  %1825 = vmatpush2.msra.mxu1 %v234_v61  ;;  %v642_v25 = vld [vmem:[#allocation2 + $0x1170] sm:$0xff]  ;;  %v363_v57 = vld [vmem:[#allocation2 + $0x8b8] sm:$0xff] }
 0x184   :  { %1689 = vmatmul.mubr.f32.vlgmr.msra.gmra.mxu0 %v3725_v5  ;;  %1826 = vmatprep.subr.mxu1 %v227_v62  ;;  %v635_v58 = vld [vmem:[#allocation2 + $0x1138] sm:$0xff]  ;;  %v362_v59 = vld [vmem:[#allocation2 + $0x8b0] sm:$0xff] }
 0x185   :  { %1837 = vmatprep.subr.mxu0 %v467_v0  ;;  %1827 = vmatpush2.msra.mxu1 %v226_v3  ;;  %v634_v61 = vld [vmem:[#allocation2 + $0x1130] sm:$0xff]  ;;  %v355_v62 = vld [vmem:[#allocation2 + $0x878] sm:$0xff] }
 0x186   :  { %1838 = vmatpush1.msra.mxu0 %v466_v4  ;;  %1828 = vmatprep.subr.mxu1 %v219_v6  ;;  %v627_v0 = vld [vmem:[#allocation2 + $0x10f8] sm:$0xff]  ;;  %v354_v3 = vld [vmem:[#allocation2 + $0x870] sm:$0xff] }
 0x187   :  { %1839 = vmatprep.subr.mxu0 %v459_v63  ;;  %1829 = vmatpush2.msra.mxu1 %v218_v8  ;;  %v626_v4 = vld [vmem:[#allocation2 + $0x10f0] sm:$0xff]  ;;  %v347_v6 = vld [vmem:[#allocation2 + $0x838] sm:$0xff] }
 0x188   :  { %1830 = vmatprep.mubr.f32.mxu1 %v3695_v44  ;;  %1840 = vmatpush1.msra.mxu0 %v458_v9  ;;  %v427_v44 = vld [vmem:[#allocation2 + $0xab8] sm:$0xff]  ;;  %v346_v8 = vld [vmem:[#allocation2 + $0x830] sm:$0xff] }
 0x189   :  { %1831 = vmatmul.mubr.f32.vlgmr.msra.gmra.mxu1 %v3702_v49  ;;  %1841 = vmatprep.subr.mxu0 %v451_v11  ;;  %v426_v49 = vld [vmem:[#allocation2 + $0xab0] sm:$0xff]  ;;  %v619_v63 = vld [vmem:[#allocation2 + $0x10b8] sm:$0xff] }
 0x18a   :  { %1908 = vmatprep.subr.mxu1 %v723_v13  ;;  %1842 = vmatpush1.msra.mxu0 %v450_v14  ;;  %v618_v9 = vld [vmem:[#allocation2 + $0x10b0] sm:$0xff]  ;;  %v595_v11 = vld [vmem:[#allocation2 + $0xff8] sm:$0xff] }
 0x18b   :  { %1909 = vmatpush1.msra.mxu1 %v722_v15  ;;  %1843 = vmatprep.subr.mxu0 %v443_v16  ;;  %v611_v13 = vld [vmem:[#allocation2 + $0x1078] sm:$0xff]  ;;  %v594_v14 = vld [vmem:[#allocation2 + $0xff0] sm:$0xff] }
 0x18c   :  { %1910 = vmatprep.subr.mxu1 %v715_v18  ;;  %1844 = vmatpush1.msra.mxu0 %v442_v19  ;;  %v610_v15 = vld [vmem:[#allocation2 + $0x1070] sm:$0xff]  ;;  %v587_v16 = vld [vmem:[#allocation2 + $0xfb8] sm:$0xff] }
 0x18d   :  { %1911 = vmatpush1.msra.mxu1 %v714_v20  ;;  %1845 = vmatprep.subr.mxu0 %v435_v21  ;;  %v603_v18 = vld [vmem:[#allocation2 + $0x1038] sm:$0xff]  ;;  %v586_v19 = vld [vmem:[#allocation2 + $0xfb0] sm:$0xff] }
 0x18e   :  { %1912 = vmatprep.subr.mxu1 %v707_v23  ;;  %1846 = vmatpush1.msra.mxu0 %v434_v24  ;;  %v602_v20 = vld [vmem:[#allocation2 + $0x1030] sm:$0xff]  ;;  %v579_v21 = vld [vmem:[#allocation2 + $0xf78] sm:$0xff] }
 0x18f   :  { %1913 = vmatpush1.msra.mxu1 %v706_v26  ;;  %1847 = vmatprep.subr.mxu0 %v427_v44  ;;  %v851_v23 = vld [vmem:[#allocation2 + $0x17f8] sm:$0xff]  ;;  %v578_v24 = vld [vmem:[#allocation2 + $0xf70] sm:$0xff] }
 0x190   :  { %1914 = vmatprep.subr.mxu1 %v699_v27  ;;  %1848 = vmatpush1.msra.mxu0 %v426_v49  ;;  %v850_v26 = vld [vmem:[#allocation2 + $0x17f0] sm:$0xff]  ;;  %v571_v44 = vld [vmem:[#allocation2 + $0xf38] sm:$0xff] }
 0x191   :  { %1915 = vmatpush1.msra.mxu1 %v698_v28  ;;  %1849 = vmatprep.subr.mxu0 %v419_v29  ;;  %v843_v27 = vld [vmem:[#allocation2 + $0x17b8] sm:$0xff]  ;;  %v570_v49 = vld [vmem:[#allocation2 + $0xf30] sm:$0xff] }
 0x192   :  { %1916 = vmatprep.subr.mxu1 %v691_v30  ;;  %1850 = vmatpush1.msra.mxu0 %v418_v31  ;;  %v842_v28 = vld [vmem:[#allocation2 + $0x17b0] sm:$0xff]  ;;  %v563_v29 = vld [vmem:[#allocation2 + $0xef8] sm:$0xff] }
 0x193   :  { %1917 = vmatpush1.msra.mxu1 %v690_v32  ;;  %1851 = vmatprep.subr.mxu0 %v411_v33  ;;  %v835_v30 = vld [vmem:[#allocation2 + $0x1778] sm:$0xff]  ;;  %v562_v31 = vld [vmem:[#allocation2 + $0xef0] sm:$0xff] }
 0x194   :  { %1918 = vmatprep.subr.mxu1 %v683_v34  ;;  %1852 = vmatpush1.msra.mxu0 %v410_v2  ;;  %v834_v32 = vld [vmem:[#allocation2 + $0x1770] sm:$0xff]  ;;  %v555_v33 = vld [vmem:[#allocation2 + $0xeb8] sm:$0xff] }
 0x195   :  { %1919 = vmatpush1.msra.mxu1 %v682_v37  ;;  %1853 = vmatprep.subr.mxu0 %v403_v12  ;;  %v827_v34 = vld [vmem:[#allocation2 + $0x1738] sm:$0xff]  ;;  %v554_v2 = vld [vmem:[#allocation2 + $0xeb0] sm:$0xff] }
 0x196   :  { %1920 = vmatprep.subr.mxu1 %v675_v38  ;;  %1854 = vmatpush1.msra.mxu0 %v402_v39  ;;  %v826_v37 = vld [vmem:[#allocation2 + $0x1730] sm:$0xff]  ;;  %v547_v12 = vld [vmem:[#allocation2 + $0xe78] sm:$0xff] }
 0x197   :  { %1921 = vmatpush1.msra.mxu1 %v674_v40  ;;  %1855 = vmatprep.subr.mxu0 %v395_v41  ;;  %v819_v38 = vld [vmem:[#allocation2 + $0x16f8] sm:$0xff]  ;;  %v546_v39 = vld [vmem:[#allocation2 + $0xe70] sm:$0xff] }
 0x198   :  { %1922 = vmatprep.subr.mxu1 %v667_v42  ;;  %1856 = vmatpush1.msra.mxu0 %v394_v43  ;;  %v818_v40 = vld [vmem:[#allocation2 + $0x16f0] sm:$0xff]  ;;  %v539_v41 = vld [vmem:[#allocation2 + $0xe38] sm:$0xff] }
 0x199   :  { %1923 = vmatpush1.msra.mxu1 %v666_v45  ;;  %1857 = vmatprep.subr.mxu0 %v387_v46  ;;  %v811_v42 = vld [vmem:[#allocation2 + $0x16b8] sm:$0xff]  ;;  %v538_v43 = vld [vmem:[#allocation2 + $0xe30] sm:$0xff] }
 0x19a   :  { %1924 = vmatprep.subr.mxu1 %v659_v47  ;;  %1858 = vmatpush1.msra.mxu0 %v386_v48  ;;  %v810_v45 = vld [vmem:[#allocation2 + $0x16b0] sm:$0xff]  ;;  %v531_v46 = vld [vmem:[#allocation2 + $0xdf8] sm:$0xff] }
 0x19b   :  { %1925 = vmatpush1.msra.mxu1 %v658_v50  ;;  %1859 = vmatprep.subr.mxu0 %v379_v51  ;;  %v803_v47 = vld [vmem:[#allocation2 + $0x1678] sm:$0xff]  ;;  %v530_v48 = vld [vmem:[#allocation2 + $0xdf0] sm:$0xff] }
 0x19c   :  { %1926 = vmatprep.subr.mxu1 %v651_v52  ;;  %1860 = vmatpush1.msra.mxu0 %v378_v22  ;;  %v802_v50 = vld [vmem:[#allocation2 + $0x1670] sm:$0xff]  ;;  %v523_v51 = vld [vmem:[#allocation2 + $0xdb8] sm:$0xff]  ;;  %v876_v22 = vsub.s32 1, %v3685_v60 }
 0x19d   :  { %1927 = vmatpush1.msra.mxu1 %v650_v54  ;;  %1861 = vmatprep.subr.mxu0 %v371_v55  ;;  %v795_v52 = vld [vmem:[#allocation2 + $0x1638] sm:$0xff]  ;;  %v522_v54 = vld [vmem:[#allocation2 + $0xdb0] sm:$0xff] }
 0x19e   :  { %1928 = vmatprep.subr.mxu1 %v643_v56  ;;  %1862 = vmatpush1.msra.mxu0 %v370_v36  ;;  %v794_v55 = vld [vmem:[#allocation2 + $0x1630] sm:$0xff]  ;;  %v515_v56 = vld [vmem:[#allocation2 + $0xd78] sm:$0xff] }
 0x19f   :  { %1929 = vmatpush1.msra.mxu1 %v642_v25  ;;  %1863 = vmatprep.subr.mxu0 %v363_v57  ;;  %v787_v36 = vld [vmem:[#allocation2 + $0x15f8] sm:$0xff]  ;;  %v3731_v25 = vpop.f32.mrf.mxu1  ;;  %v514_v57 = vld [vmem:[#allocation2 + $0xd70] sm:$0xff] }
 0x1a0   :  { %1930 = vmatprep.subr.mxu1 %v635_v58  ;;  %1864 = vmatpush1.msra.mxu0 %v362_v59  ;;  %v786_v58 = vld [vmem:[#allocation2 + $0x15f0] sm:$0xff]  ;;  %v507_v59 = vld [vmem:[#allocation2 + $0xd38] sm:$0xff] }
 0x1a1   :  { %1931 = vmatpush1.msra.mxu1 %v634_v61  ;;  %1865 = vmatprep.subr.mxu0 %v355_v62  ;;  %v779_v61 = vld [vmem:[#allocation2 + $0x15b8] sm:$0xff]  ;;  %v3733_v62 = vld [vmem:[#allocation4] sm:$0xff] }
 0x1a2   :  { %1932 = vmatprep.subr.mxu1 %v627_v0  ;;  %1866 = vmatpush1.msra.mxu0 %v354_v3  ;;  %v877_v0 = vrot.slane %v3733_v62, %v876_v22  ;;  %v1124_v3 = vpop.f32.mrf.mxu0 }
 0x1a3   :  { %1933 = vmatpush1.msra.mxu1 %v626_v4  ;;  %1867 = vmatprep.subr.mxu0 %v347_v6  ;;  %v3738_v4 = vpop.f32.mrf.mxu1  ;;  %v506_v6 = vld [vmem:[#allocation2 + $0xd30] sm:$0xff] }
 0x1a4   :  { %1934 = vmatprep.subr.mxu1 %v619_v63  ;;  %1868 = vmatpush1.msra.mxu0 %v346_v8  ;;  %v778_v63 = vld [vmem:[#allocation2 + $0x15b0] sm:$0xff]  ;;  %v884_v8 = vsub.s32 3, %v3685_v60 }
 0x1a5   :  { %1935 = vmatpush1.msra.mxu1 %v618_v9  ;;  %1869 = vmatprep.subr.mxu0 %v595_v11  ;;  %v499_v9 = vld [vmem:[#allocation2 + $0xcf8] sm:$0xff] }
 0x1a6   :  { %1936 = vmatprep.subr.mxu1 %v611_v13  ;;  %1870 = vmatpush2.msra.mxu0 %v594_v14  ;;  %v771_v11 = vld [vmem:[#allocation2 + $0x1578] sm:$0xff]  ;;  %v498_v13 = vld [vmem:[#allocation2 + $0xcf0] sm:$0xff] }
 0x1a7   :  { %1937 = vmatpush1.msra.mxu1 %v610_v15  ;;  %1871 = vmatprep.subr.mxu0 %v587_v16  ;;  %v770_v14 = vld [vmem:[#allocation2 + $0x1570] sm:$0xff]  ;;  %v491_v16 = vld [vmem:[#allocation2 + $0xcb8] sm:$0xff] }
 0x1a8   :  { %1938 = vmatprep.subr.mxu1 %v603_v18  ;;  %1872 = vmatpush2.msra.mxu0 %v586_v19  ;;  %v763_v18 = vld [vmem:[#allocation2 + $0x1538] sm:$0xff]  ;;  %v983_v19 = vadd.f32 %v3709_v10, %v877_v0  ;;  %v2111_v0 = vld [vmem:[#allocation6 + $0x1a8] sm:$0xff] }
 0x1a9   :  { %1939 = vmatpush1.msra.mxu1 %v602_v20  ;;  %1873 = vmatprep.subr.mxu0 %v579_v21  ;;  %v1266_v20 = vpop.f32.mrf.mxu1  ;;  %v490_v21 = vld [vmem:[#allocation2 + $0xcb0] sm:$0xff]  ;;  %v475_v10 = vld [vmem:[#allocation2 + $0xc38] sm:$0xff] }
 0x1aa   :  { %1940 = vmatprep.subr.mxu1 %v851_v23  ;;  %1874 = vmatpush2.msra.mxu0 %v578_v24  ;;  %v762_v23 = vld [vmem:[#allocation2 + $0x1530] sm:$0xff]  ;;  %v885_v24 = vrot.slane %v3733_v62, %v884_v8 }
 0x1ab   :  { %1941 = vmatpush2.msra.mxu1 %v850_v26  ;;  %1875 = vmatprep.subr.mxu0 %v571_v44  ;;  %v483_v26 = vld [vmem:[#allocation2 + $0xc78] sm:$0xff] }
 0x1ac   :  { %1942 = vmatprep.subr.mxu1 %v843_v27  ;;  %1876 = vmatpush2.msra.mxu0 %v570_v49  ;;  %v755_v44 = vld [vmem:[#allocation2 + $0x14f8] sm:$0xff]  ;;  %v482_v27 = vld [vmem:[#allocation2 + $0xc70] sm:$0xff] }
 0x1ad   :  { %1943 = vmatpush2.msra.mxu1 %v842_v28  ;;  %1877 = vmatprep.subr.mxu0 %v563_v29  ;;  %v754_v49 = vld [vmem:[#allocation2 + $0x14f0] sm:$0xff] }
 0x1ae   :  { %1944 = vmatprep.subr.mxu1 %v835_v30  ;;  %1878 = vmatpush2.msra.mxu0 %v562_v31  ;;  %v747_v30 = vld [vmem:[#allocation2 + $0x14b8] sm:$0xff]  ;;  %v1054_v31 = vadd.f32 %v3711_v35, %v983_v19  ;;  %v2102_v19 = vld [vmem:[#allocation6 + $0x160] sm:$0xff] }
 0x1af   :  { %1945 = vmatpush2.msra.mxu1 %v834_v32  ;;  %1879 = vmatprep.subr.mxu0 %v555_v33  ;;  %v474_v32 = vld [vmem:[#allocation2 + $0xc30] sm:$0xff]  ;;  %v1267_v33 = vadd.f32 %v1266_v20, %v885_v24  ;;  %v3475_v35 = vld [vmem:[%s4044_s0 + $0x18] sm:$0xff]  ;;  %v2230_v20 = vld [vmem:[#allocation6 + $0x560] sm:$0xff] }
 0x1b0   :  { %1946 = vmatprep.subr.mxu1 %v827_v34  ;;  %1880 = vmatpush2.msra.mxu0 %v554_v2  ;;  %v746_v34 = vld [vmem:[#allocation2 + $0x14b0] sm:$0xff]  ;;  %v1125_v2 = vadd.f32 %v1124_v3, %v1054_v31  ;;  %v2098_v24 = vld [vmem:[#allocation6 + $0x140] sm:$0xff] }
 0x1b1   :  { %1947 = vmatpush2.msra.mxu1 %v826_v37  ;;  %1881 = vmatprep.subr.mxu0 %v547_v12  ;;  %v739_v12 = vld [vmem:[#allocation2 + $0x1478] sm:$0xff]  ;;  %v2239_v3 = vld [vmem:[#allocation6 + $0x5a8] sm:$0xff]  ;;  %v2090_v31 = vld [vmem:[#allocation6 + $0x100] sm:$0xff] }
 0x1b2   :  { %1948 = vmatprep.subr.mxu1 %v819_v38  ;;  %1882 = vmatpush2.msra.mxu0 %v546_v39  ;;  %v867_v38 = vld [vmem:[#allocation2 + $0x1878] sm:$0xff] }
 0x1b3   :  { %1949 = vmatpush2.msra.mxu1 %v818_v40  ;;  %1883 = vmatprep.subr.mxu0 %v539_v41  ;;  %v738_v41 = vld [vmem:[#allocation2 + $0x1470] sm:$0xff] }
 0x1b4   :  { %1950 = vmatprep.subr.mxu1 %v811_v42  ;;  %1884 = vmatpush2.msra.mxu0 %v538_v43  ;;  %v866_v42 = vld [vmem:[#allocation2 + $0x1870] sm:$0xff] }
 0x1b5   :  { %1951 = vmatpush2.msra.mxu1 %v810_v45  ;;  %1885 = vmatprep.subr.mxu0 %v531_v46  ;;  %v3476_v43 = vld [vmem:[%s4044_s0 + $0x10] sm:$0xff]  ;;  %v731_v45 = vld [vmem:[#allocation2 + $0x1438] sm:$0xff] }
 0x1b6   :  { %1952 = vmatprep.subr.mxu1 %v803_v47  ;;  %1886 = vmatpush2.msra.mxu0 %v530_v48  ;;  %v859_v46 = vld [vmem:[#allocation2 + $0x1838] sm:$0xff]  ;;  %v730_v48 = vld [vmem:[#allocation2 + $0x1430] sm:$0xff] }
 0x1b7   :  { %1953 = vmatpush2.msra.mxu1 %v802_v50  ;;  %1887 = vmatprep.subr.mxu0 %v523_v51  ;;  %v3759_v50 = vadd.f32 %v3731_v25, %v1125_v2  ;;  %v2086_v2 = vld [vmem:[#allocation6 + $0xe0] sm:$0xff] }
 0x1b8   :  { %1954 = vmatprep.subr.mxu1 %v795_v52  ;;  %1888 = vmatpush2.msra.mxu0 %v522_v54  ;;  %v858_v52 = vld [vmem:[#allocation2 + $0x1830] sm:$0xff] }
 0x1b9   :  { %1955 = vmatpush2.msra.mxu1 %v794_v55  ;;  %1889 = vmatprep.subr.mxu0 %v515_v56  ;;  %v2119_v54 = vld [vmem:[#allocation6 + $0x1e8] sm:$0xff]  ;;  %v2051_v25 = vmax.f32 %v3759_v50, 0.0  ;;  %v2097_v50 = vld [vmem:[#allocation6 + $0x138] sm:$0xff] }
 0x1ba   :  { %1956 = vmatprep.subr.mxu1 %v787_v36  ;;  %1890 = vmatpush2.msra.mxu0 %v514_v57  ;;  %v3741_v15 = vpop.f32.mrf.mxu0  ;;  %v2247_v55 = vld [vmem:[#allocation6 + $0x5e8] sm:$0xff]  ;;  %v2118_v36 = vld [vmem:[#allocation6 + $0x1e0] sm:$0xff] }
 0x1bb   :  { %1957 = vmatpush2.msra.mxu1 %v786_v58  ;;  %1891 = vmatprep.subr.mxu0 %v507_v59  ;;  %v3477_v57 = vld [vmem:[%s4044_s0 + $0x30] sm:$0xff]  ;;  %v2246_v58 = vld [vmem:[#allocation6 + $0x5e0] sm:$0xff] }
 0x1bc   :  { %1958 = vmatprep.subr.mxu1 %v779_v61  ;;  %1892 = vmatpush2.msra.mxu0 %v506_v6  ;;  %v1337_v28 = vpop.f32.mrf.mxu0  ;;  %v2243_v59 = vld [vmem:[#allocation6 + $0x5c8] sm:$0xff]  ;;  %v2114_v61 = vld [vmem:[#allocation6 + $0x1c0] sm:$0xff] }
 0x1bd   :  { %1959 = vmatpush2.msra.mxu1 %v778_v63  ;;  %1893 = vmatprep.subr.mxu0 %v499_v9  ;;  %v1338_v40 = vadd.f32 %v1337_v28, %v1267_v33  ;;  %v2110_v6 = vld [vmem:[#allocation6 + $0x1a0] sm:$0xff]  ;;  %v2107_v9 = vld [vmem:[#allocation6 + $0x188] sm:$0xff] }
 0x1be   :  { %1960 = vmatprep.subr.mxu1 %v771_v11  ;;  %1894 = vmatpush2.msra.mxu0 %v498_v13  ;;  %v2238_v63 = vld [vmem:[#allocation6 + $0x5a0] sm:$0xff]  ;;  %v2235_v11 = vld [vmem:[#allocation6 + $0x588] sm:$0xff] }
 0x1bf   :  { %1961 = vmatpush2.msra.mxu1 %v770_v14  ;;  %1895 = vmatprep.subr.mxu0 %v491_v16  ;;  %v3747_v29 = vpop.f32.mrf.mxu1  ;;  %v2106_v13 = vld [vmem:[#allocation6 + $0x180] sm:$0xff]  ;;  %v2103_v16 = vld [vmem:[#allocation6 + $0x168] sm:$0xff] }
 0x1c0   :  { %1962 = vmatprep.subr.mxu1 %v763_v18  ;;  %1896 = vmatpush2.msra.mxu0 %v490_v21  ;;  %v3750_v37 = vpop.f32.mrf.mxu0  ;;  %v2234_v14 = vld [vmem:[#allocation6 + $0x580] sm:$0xff]  ;;  %v2231_v18 = vld [vmem:[#allocation6 + $0x568] sm:$0xff] }
 0x1c1   :  { %1963 = vmatpush2.msra.mxu1 %v762_v23  ;;  %1897 = vmatprep.subr.mxu0 %v483_v26  ;;  %v1408_v39 = vpop.f32.mrf.mxu1  ;;  %v2099_v21 = vld [vmem:[#allocation6 + $0x148] sm:$0xff]  ;;  %v2226_v26 = vld [vmem:[#allocation6 + $0x540] sm:$0xff] }
 0x1c2   :  { %1964 = vmatprep.subr.mxu1 %v755_v44  ;;  %1898 = vmatpush2.msra.mxu0 %v482_v27  ;;  %v1409_v47 = vadd.f32 %v1408_v39, %v1338_v40  ;;  %v1479_v51 = vpop.f32.mrf.mxu0  ;;  %v2227_v23 = vld [vmem:[#allocation6 + $0x548] sm:$0xff]  ;;  %v2222_v28 = vld [vmem:[#allocation6 + $0x520] sm:$0xff] }
 0x1c3   :  { %1965 = vmatpush2.msra.mxu1 %v754_v49  ;;  %1899 = vmatprep.subr.mxu0 %v475_v10  ;;  %v2095_v44 = vld [vmem:[#allocation6 + $0x128] sm:$0xff]  ;;  %v2094_v49 = vld [vmem:[#allocation6 + $0x120] sm:$0xff] }
 0x1c4   :  { %1966 = vmatprep.subr.mxu1 %v747_v30  ;;  %1900 = vmatpush2.msra.mxu0 %v474_v32  ;;  %v3762_v56 = vadd.f32 %v1479_v51, %v1409_v47  ;;  %v2223_v27 = vld [vmem:[#allocation6 + $0x528] sm:$0xff]  ;;  %v2218_v32 = vld [vmem:[#allocation6 + $0x500] sm:$0xff] }
 0x1c5   :  { %1901 = vmatprep.mubr.f32.mxu0 %v3475_v35  ;;  %1967 = vmatpush2.msra.mxu1 %v746_v34  ;;  %v2091_v10 = vld [vmem:[#allocation6 + $0x108] sm:$0xff]  ;;  %v2082_v40 = vld [vmem:[#allocation6 + $0xc0] sm:$0xff] }
 0x1c6   :  { %1902 = vmatmul.mubr.f32.vlgmr.msra.gmra.mxu0 %v3476_v43  ;;  %1968 = vmatprep.subr.mxu1 %v739_v12  ;;  %v2219_v30 = vld [vmem:[#allocation6 + $0x508] sm:$0xff]  ;;  %v2214_v12 = vld [vmem:[#allocation6 + $0x4e0] sm:$0xff] }
 0x1c7   :  { %2007 = vmatprep.subr.mxu0 %v867_v38  ;;  %1969 = vmatpush2.msra.mxu1 %v738_v41  ;;  %v2087_v33 = vld [vmem:[#allocation6 + $0xe8] sm:$0xff]  ;;  %v2210_v35 = vld [vmem:[#allocation6 + $0x4c0] sm:$0xff] }
 0x1c8   :  { %2008 = vmatpush1.msra.mxu0 %v866_v42  ;;  %1970 = vmatprep.subr.mxu1 %v731_v45  ;;  %v2215_v34 = vld [vmem:[#allocation6 + $0x4e8] sm:$0xff]  ;;  %v2078_v43 = vld [vmem:[#allocation6 + $0xa0] sm:$0xff] }
 0x1c9   :  { %2009 = vmatprep.subr.mxu0 %v859_v46  ;;  %1971 = vmatpush2.msra.mxu1 %v730_v48  ;;  %v2083_v38 = vld [vmem:[#allocation6 + $0xc8] sm:$0xff]  ;;  %v2206_v45 = vld [vmem:[#allocation6 + $0x4a0] sm:$0xff] }
 0x1ca   :  { %1972 = vmatprep.mubr.f32.mxu1 %v3719_v1  ;;  %2010 = vmatpush1.msra.mxu0 %v858_v52  ;;  %v2115_v1 = vld [vmem:[#allocation6 + $0x1c8] sm:$0xff]  ;;  %v2074_v48 = vld [vmem:[#allocation6 + $0x80] sm:$0xff] }
 0x1cb   :  { %2043 = vmatprep.mubr.f32.mxu0 %v3573_v17  ;;  %1973 = vmatmul.mubr.f32.vlgmr.msra.gmra.mxu1 %v3725_v5  ;;  %v2242_v17 = vld [vmem:[#allocation6 + $0x5c0] sm:$0xff]  ;;  %v2053_v5 = vmax.f32 %v3762_v56, 0.0  ;;  %v2211_v39 = vld [vmem:[#allocation6 + $0x4c8] sm:$0xff]  ;;  %v2232_v56 = vld [vmem:[#allocation6 + $0x570] sm:$0xff] }
 0x1cc   :  { %3386 = vmatmul.mubr.msk.f32.vlgmr.msra.gmra.mxu0 %vm910_vm0, %v3477_v57  ;;  %2592 = vmatprep.subr.mxu0 %v2119_v54  ;;  %v2079_v41 = vld [vmem:[#allocation6 + $0xa8] sm:$0xff]  ;;  %v2202_v51 = vld [vmem:[#allocation6 + $0x480] sm:$0xff] }
 0x1cd   :  { %2663 = vmatprep.subr.mxu1 %v2247_v55  ;;  %2593 = vmatpush1.msra.mxu0 %v2118_v36  ;;  %v2207_v42 = vld [vmem:[#allocation6 + $0x4a8] sm:$0xff]  ;;  %v2070_v55 = vld [vmem:[#allocation6 + $0x60] sm:$0xff] }
 0x1ce   :  { %2656 = vmatprep.mubr.f32.mxu0 %v2051_v25  ;;  %2664 = vmatpush1.msra.mxu1 %v2246_v58  ;;  %v2075_v46 = vld [vmem:[#allocation6 + $0x88] sm:$0xff]  ;;  %v2198_v36 = vld [vmem:[#allocation6 + $0x460] sm:$0xff] }
 0x1cf   :  { %2594 = vmatprep.subr.mxu0 %v2115_v1  ;;  %2665 = vmatprep.subr.mxu1 %v2243_v59  ;;  %v2203_v47 = vld [vmem:[#allocation6 + $0x488] sm:$0xff]  ;;  %v2066_v1 = vld [vmem:[#allocation6 + $0x40] sm:$0xff] }
 0x1d0   :  { %2595 = vmatpush1.msra.mxu0 %v2114_v61  ;;  %2666 = vmatpush1.msra.mxu1 %v2242_v17  ;;  %v2071_v52 = vld [vmem:[#allocation6 + $0x68] sm:$0xff]  ;;  %v2194_v59 = vld [vmem:[#allocation6 + $0x440] sm:$0xff] }
 0x1d1   :  { %2596 = vmatprep.subr.mxu0 %v2111_v0  ;;  %2667 = vmatprep.subr.mxu1 %v2239_v3  ;;  %v2199_v54 = vld [vmem:[#allocation6 + $0x468] sm:$0xff]  ;;  %v2062_v0 = vld [vmem:[#allocation6 + $0x20] sm:$0xff] }
 0x1d2   :  { %2597 = vmatpush1.msra.mxu0 %v2110_v6  ;;  %2668 = vmatpush1.msra.mxu1 %v2238_v63  ;;  %v2067_v57 = vld [vmem:[#allocation6 + $0x48] sm:$0xff]  ;;  %v2190_v3 = vld [vmem:[#allocation6 + $0x420] sm:$0xff] }
 0x1d3   :  { %2727 = vmatprep.mubr.f32.mxu1 %v2053_v5  ;;  %2598 = vmatprep.subr.mxu0 %v2107_v9  ;;  %v2195_v58 = vld [vmem:[#allocation6 + $0x448] sm:$0xff]  ;;  %v2058_v9 = vld [vmem:[#allocation6] sm:$0xff] }
 0x1d4   :  { %2669 = vmatprep.subr.mxu1 %v2235_v11  ;;  %2599 = vmatpush1.msra.mxu0 %v2106_v13  ;;  %v2063_v61 = vld [vmem:[#allocation6 + $0x28] sm:$0xff]  ;;  %v2186_v11 = vld [vmem:[#allocation6 + $0x400] sm:$0xff] }
 0x1d5   :  { %2670 = vmatpush1.msra.mxu1 %v2234_v14  ;;  %2600 = vmatprep.subr.mxu0 %v2103_v16  ;;  %v2191_v17 = vld [vmem:[#allocation6 + $0x428] sm:$0xff]  ;;  %v2182_v16 = vld [vmem:[#allocation6 + $0x3e0] sm:$0xff] }
 0x1d6   :  { %2671 = vmatprep.subr.mxu1 %v2231_v18  ;;  %2601 = vmatpush1.msra.mxu0 %v2102_v19  ;;  %v2059_v6 = vld [vmem:[#allocation6 + $0x8] sm:$0xff]  ;;  %v2310_v18 = vld [vmem:[#allocation6 + $0x7e0] sm:$0xff] }
 0x1d7   :  { %2672 = vmatpush1.msra.mxu1 %v2230_v20  ;;  %2602 = vmatprep.subr.mxu0 %v2099_v21  ;;  %v2187_v63 = vld [vmem:[#allocation6 + $0x408] sm:$0xff]  ;;  %v2178_v21 = vld [vmem:[#allocation6 + $0x3c0] sm:$0xff] }
 0x1d8   :  { %2673 = vmatprep.subr.mxu1 %v2227_v23  ;;  %2603 = vmatpush1.msra.mxu0 %v2098_v24  ;;  %v2183_v13 = vld [vmem:[#allocation6 + $0x3e8] sm:$0xff]  ;;  %v2306_v23 = vld [vmem:[#allocation6 + $0x7c0] sm:$0xff] }
 0x1d9   :  { %2674 = vmatpush1.msra.mxu1 %v2226_v26  ;;  %2604 = vmatprep.subr.mxu0 %v2095_v44  ;;  %v2311_v14 = vld [vmem:[#allocation6 + $0x7e8] sm:$0xff]  ;;  %v2174_v44 = vld [vmem:[#allocation6 + $0x3a0] sm:$0xff] }
 0x1da   :  { %2675 = vmatprep.subr.mxu1 %v2223_v27  ;;  %2605 = vmatpush1.msra.mxu0 %v2094_v49  ;;  %v2179_v19 = vld [vmem:[#allocation6 + $0x3c8] sm:$0xff]  ;;  %v2302_v27 = vld [vmem:[#allocation6 + $0x7a0] sm:$0xff] }
 0x1db   :  { %2676 = vmatpush1.msra.mxu1 %v2222_v28  ;;  %2606 = vmatprep.subr.mxu0 %v2091_v10  ;;  %v2307_v20 = vld [vmem:[#allocation6 + $0x7c8] sm:$0xff]  ;;  %v2170_v10 = vld [vmem:[#allocation6 + $0x380] sm:$0xff] }
 0x1dc   :  { %2677 = vmatprep.subr.mxu1 %v2219_v30  ;;  %2607 = vmatpush1.msra.mxu0 %v2090_v31  ;;  %v2175_v24 = vld [vmem:[#allocation6 + $0x3a8] sm:$0xff]  ;;  %v2298_v30 = vld [vmem:[#allocation6 + $0x780] sm:$0xff] }
 0x1dd   :  { %2678 = vmatpush1.msra.mxu1 %v2218_v32  ;;  %2608 = vmatprep.subr.mxu0 %v2087_v33  ;;  %v2303_v26 = vld [vmem:[#allocation6 + $0x7a8] sm:$0xff]  ;;  %v2166_v33 = vld [vmem:[#allocation6 + $0x360] sm:$0xff] }
 0x1de   :  { %2679 = vmatprep.subr.mxu1 %v2215_v34  ;;  %2609 = vmatpush1.msra.mxu0 %v2086_v2  ;;  %v2171_v49 = vld [vmem:[#allocation6 + $0x388] sm:$0xff]  ;;  %v2294_v34 = vld [vmem:[#allocation6 + $0x760] sm:$0xff] }
 0x1df   :  { %2680 = vmatpush1.msra.mxu1 %v2214_v12  ;;  %2610 = vmatprep.subr.mxu0 %v2083_v38  ;;  %v2299_v28 = vld [vmem:[#allocation6 + $0x788] sm:$0xff]  ;;  %v2162_v38 = vld [vmem:[#allocation6 + $0x340] sm:$0xff] }
 0x1e0   :  { %2681 = vmatprep.subr.mxu1 %v2211_v39  ;;  %2611 = vmatpush1.msra.mxu0 %v2082_v40  ;;  %v2167_v31 = vld [vmem:[#allocation6 + $0x368] sm:$0xff]  ;;  %v2290_v39 = vld [vmem:[#allocation6 + $0x740] sm:$0xff] }
 0x1e1   :  { %2682 = vmatpush1.msra.mxu1 %v2210_v35  ;;  %2612 = vmatprep.subr.mxu0 %v2079_v41  ;;  %v2295_v32 = vld [vmem:[#allocation6 + $0x768] sm:$0xff]  ;;  %v880_v41 = vsub.s32 2, %v3685_v60 }
 0x1e2   :  { %2683 = vmatprep.subr.mxu1 %v2207_v42  ;;  %2613 = vmatpush1.msra.mxu0 %v2078_v43  ;;  %v2163_v2 = vld [vmem:[#allocation6 + $0x348] sm:$0xff]  ;;  %v2158_v42 = vld [vmem:[#allocation6 + $0x320] sm:$0xff] }
 0x1e3   :  { %2684 = vmatpush1.msra.mxu1 %v2206_v45  ;;  %2614 = vmatprep.subr.mxu0 %v2075_v46  ;;  %v2291_v12 = vld [vmem:[#allocation6 + $0x748] sm:$0xff]  ;;  %v2286_v43 = vld [vmem:[#allocation6 + $0x720] sm:$0xff] }
 0x1e4   :  { %2685 = vmatprep.subr.mxu1 %v2203_v47  ;;  %2615 = vmatpush1.msra.mxu0 %v2074_v48  ;;  %v2159_v40 = vld [vmem:[#allocation6 + $0x328] sm:$0xff]  ;;  %v2154_v47 = vld [vmem:[#allocation6 + $0x300] sm:$0xff] }
 0x1e5   :  { %2686 = vmatpush1.msra.mxu1 %v2202_v51  ;;  %2616 = vmatprep.subr.mxu0 %v2071_v52  ;;  %v2287_v35 = vld [vmem:[#allocation6 + $0x728] sm:$0xff]  ;;  %v2282_v48 = vld [vmem:[#allocation6 + $0x700] sm:$0xff] }
 0x1e6   :  { %2687 = vmatprep.subr.mxu1 %v2199_v54  ;;  %2617 = vmatpush1.msra.mxu0 %v2070_v55  ;;  %v2155_v45 = vld [vmem:[#allocation6 + $0x308] sm:$0xff]  ;;  %v881_v54 = vrot.slane %v3733_v62, %v880_v41  ;;  %v2150_v55 = vld [vmem:[#allocation6 + $0x2e0] sm:$0xff] }
 0x1e7   :  { %2688 = vmatpush1.msra.mxu1 %v2198_v36  ;;  %2618 = vmatprep.subr.mxu0 %v2067_v57  ;;  %v2283_v46 = vld [vmem:[#allocation6 + $0x708] sm:$0xff]  ;;  %v2278_v36 = vld [vmem:[#allocation6 + $0x6e0] sm:$0xff] }
 0x1e8   :  { %2689 = vmatprep.subr.mxu1 %v2195_v58  ;;  %2619 = vmatpush1.msra.mxu0 %v2066_v1  ;;  %v2151_v51 = vld [vmem:[#allocation6 + $0x2e8] sm:$0xff]  ;;  %v2146_v1 = vld [vmem:[#allocation6 + $0x2c0] sm:$0xff] }
 0x1e9   :  { %2690 = vmatpush1.msra.mxu1 %v2194_v59  ;;  %2620 = vmatprep.subr.mxu0 %v2063_v61  ;;  %v2279_v52 = vld [vmem:[#allocation6 + $0x6e8] sm:$0xff]  ;;  %v2274_v59 = vld [vmem:[#allocation6 + $0x6c0] sm:$0xff] }
 0x1ea   :  { %2691 = vmatprep.subr.mxu1 %v2191_v17  ;;  %2621 = vmatpush1.msra.mxu0 %v2062_v0  ;;  %v2147_v57 = vld [vmem:[#allocation6 + $0x2c8] sm:$0xff]  ;;  %v1265_v0 = vadd.f32 %v3738_v4, %v881_v54  ;;  %v2142_v62 = vld [vmem:[#allocation6 + $0x2a0] sm:$0xff] }
 0x1eb   :  { %2692 = vmatpush1.msra.mxu1 %v2190_v3  ;;  %2622 = vmatprep.subr.mxu0 %v2059_v6  ;;  %v2275_v58 = vld [vmem:[#allocation6 + $0x6c8] sm:$0xff]  ;;  %v2270_v3 = vld [vmem:[#allocation6 + $0x6a0] sm:$0xff] }
 0x1ec   :  { %2693 = vmatprep.subr.mxu1 %v2187_v63  ;;  %2623 = vmatpush1.msra.mxu0 %v2058_v9  ;;  %v2143_v61 = vld [vmem:[#allocation6 + $0x2a8] sm:$0xff]  ;;  %v1336_v9 = vadd.f32 %v3741_v15, %v1265_v0  ;;  %v2130_v15 = vld [vmem:[#allocation6 + $0x240] sm:$0xff] }
 0x1ed   :  { %2694 = vmatpush1.msra.mxu1 %v2186_v11  ;;  %2624 = vmatprep.subr.mxu0 %v2183_v13  ;;  %v2271_v17 = vld [vmem:[#allocation6 + $0x6a8] sm:$0xff]  ;;  %v2138_v11 = vld [vmem:[#allocation6 + $0x280] sm:$0xff] }
 0x1ee   :  { %2695 = vmatprep.subr.mxu1 %v2311_v14  ;;  %2625 = vmatpush2.msra.mxu0 %v2182_v16  ;;  %v2139_v6 = vld [vmem:[#allocation6 + $0x288] sm:$0xff]  ;;  %v2266_v13 = vld [vmem:[#allocation6 + $0x680] sm:$0xff]  ;;  %v1407_v4 = vadd.f32 %v3747_v29, %v1336_v9 }
 0x1ef   :  { %2696 = vmatpush2.msra.mxu1 %v2310_v18  ;;  %2626 = vmatprep.subr.mxu0 %v2179_v19  ;;  %v2267_v63 = vld [vmem:[#allocation6 + $0x688] sm:$0xff]  ;;  %v2134_v18 = vld [vmem:[#allocation6 + $0x260] sm:$0xff] }
 0x1f0   :  { %2697 = vmatprep.subr.mxu1 %v2307_v20  ;;  %2627 = vmatpush2.msra.mxu0 %v2178_v21  ;;  %v2135_v14 = vld [vmem:[#allocation6 + $0x268] sm:$0xff]  ;;  %v2262_v19 = vld [vmem:[#allocation6 + $0x660] sm:$0xff] }
 0x1f1   :  { %2698 = vmatpush2.msra.mxu1 %v2306_v23  ;;  %2628 = vmatprep.subr.mxu0 %v2175_v24  ;;  %v2263_v16 = vld [vmem:[#allocation6 + $0x668] sm:$0xff]  ;;  %v2258_v23 = vld [vmem:[#allocation6 + $0x640] sm:$0xff] }
 0x1f2   :  { %2699 = vmatprep.subr.mxu1 %v2303_v26  ;;  %2629 = vmatpush2.msra.mxu0 %v2174_v44  ;;  %v2131_v20 = vld [vmem:[#allocation6 + $0x248] sm:$0xff]  ;;  %v3784_v44 = vadd.f32 %v3750_v37, %v1407_v4  ;;  %v2126_v29 = vld [vmem:[#allocation6 + $0x220] sm:$0xff] }
 0x1f3   :  { %2700 = vmatpush2.msra.mxu1 %v2302_v27  ;;  %2630 = vmatprep.subr.mxu0 %v2171_v49  ;;  %v2259_v21 = vld [vmem:[#allocation6 + $0x648] sm:$0xff]  ;;  %v2254_v27 = vld [vmem:[#allocation6 + $0x620] sm:$0xff] }
 0x1f4   :  { %2701 = vmatprep.subr.mxu1 %v2299_v28  ;;  %2631 = vmatpush2.msra.mxu0 %v2170_v10  ;;  %v2127_v24 = vld [vmem:[#allocation6 + $0x228] sm:$0xff]  ;;  %v2122_v10 = vld [vmem:[#allocation6 + $0x200] sm:$0xff] }
 0x1f5   :  { %2702 = vmatpush2.msra.mxu1 %v2298_v30  ;;  %2632 = vmatprep.subr.mxu0 %v2167_v31  ;;  %v2255_v26 = vld [vmem:[#allocation6 + $0x628] sm:$0xff]  ;;  %v2250_v30 = vld [vmem:[#allocation6 + $0x600] sm:$0xff]  ;;  %v2050_v31 = vmax.f32 %v3714_v53, 0.0  ;;  %v2364_v53 = vld [vmem:[#allocation6 + $0x990] sm:$0xff] }
 0x1f6   :  { %2703 = vmatprep.subr.mxu1 %v2295_v32  ;;  %2633 = vmatpush2.msra.mxu0 %v2166_v33  ;;  %v2123_v49 = vld [vmem:[#allocation6 + $0x208] sm:$0xff]  ;;  %v2052_v32 = vmax.f32 %v3784_v44, 0.0  ;;  %v2350_v0 = vld [vmem:[#allocation6 + $0x920] sm:$0xff]  ;;  %v3191_v44 = vld [vmem:[%s4049_s5 + $0xd8] sm:$0xff] }
 0x1f7   :  { %2704 = vmatpush2.msra.mxu1 %v2294_v34  ;;  %2634 = vmatprep.subr.mxu0 %v2163_v2  ;;  %v2251_v28 = vld [vmem:[#allocation6 + $0x608] sm:$0xff]  ;;  %v2374_v34 = vld [vmem:[#allocation6 + $0x9e0] sm:$0xff] }
 0x1f8   :  { %2705 = vmatprep.subr.mxu1 %v2291_v12  ;;  %2635 = vmatpush2.msra.mxu0 %v2162_v38  ;;  %v2375_v37 = vld [vmem:[#allocation6 + $0x9e8] sm:$0xff]  ;;  %v2502_v2 = vld [vmem:[#allocation6 + $0xde0] sm:$0xff] }
 0x1f9   :  { %2706 = vmatpush2.msra.mxu1 %v2290_v39  ;;  %2636 = vmatprep.subr.mxu0 %v2159_v40  ;;  %v2503_v33 = vld [vmem:[#allocation6 + $0xde8] sm:$0xff]  ;;  %v2370_v39 = vld [vmem:[#allocation6 + $0x9c0] sm:$0xff] }
 0x1fa   :  { %2707 = vmatprep.subr.mxu1 %v2287_v35  ;;  %2637 = vmatpush2.msra.mxu0 %v2158_v42  ;;  %v2371_v12 = vld [vmem:[#allocation6 + $0x9c8] sm:$0xff]  ;;  %v2498_v40 = vld [vmem:[#allocation6 + $0xdc0] sm:$0xff] }
 0x1fb   :  { %2708 = vmatpush2.msra.mxu1 %v2286_v43  ;;  %2638 = vmatprep.subr.mxu0 %v2155_v45  ;;  %v2499_v38 = vld [vmem:[#allocation6 + $0xdc8] sm:$0xff]  ;;  %v2366_v43 = vld [vmem:[#allocation6 + $0x9a0] sm:$0xff] }
 0x1fc   :  { %2709 = vmatprep.subr.mxu1 %v2283_v46  ;;  %2639 = vmatpush2.msra.mxu0 %v2154_v47  ;;  %v2367_v35 = vld [vmem:[#allocation6 + $0x9a8] sm:$0xff]  ;;  %v2494_v45 = vld [vmem:[#allocation6 + $0xda0] sm:$0xff] }
 0x1fd   :  { %2710 = vmatpush2.msra.mxu1 %v2282_v48  ;;  %2640 = vmatprep.subr.mxu0 %v2151_v51  ;;  %v2495_v42 = vld [vmem:[#allocation6 + $0xda8] sm:$0xff]  ;;  %v2362_v48 = vld [vmem:[#allocation6 + $0x980] sm:$0xff] }
 0x1fe   :  { %2711 = vmatprep.subr.mxu1 %v2279_v52  ;;  %2641 = vmatpush2.msra.mxu0 %v2150_v55  ;;  %v2363_v46 = vld [vmem:[#allocation6 + $0x988] sm:$0xff]  ;;  %v2490_v51 = vld [vmem:[#allocation6 + $0xd80] sm:$0xff] }
 0x1ff   :  { %2712 = vmatpush2.msra.mxu1 %v2278_v36  ;;  %2642 = vmatprep.subr.mxu0 %v2147_v57  ;;  %v2491_v47 = vld [vmem:[#allocation6 + $0xd88] sm:$0xff]  ;;  %v2358_v55 = vld [vmem:[#allocation6 + $0x960] sm:$0xff] }
 0x200   :  { %2713 = vmatprep.subr.mxu1 %v2275_v58  ;;  %2643 = vmatpush2.msra.mxu0 %v2146_v1  ;;  %v2359_v52 = vld [vmem:[#allocation6 + $0x968] sm:$0xff]  ;;  %v2486_v36 = vld [vmem:[#allocation6 + $0xd60] sm:$0xff] }
 0x201   :  { %2714 = vmatpush2.msra.mxu1 %v2274_v59  ;;  %2644 = vmatprep.subr.mxu0 %v2143_v61  ;;  %v2487_v54 = vld [vmem:[#allocation6 + $0xd68] sm:$0xff]  ;;  %v2354_v1 = vld [vmem:[#allocation6 + $0x940] sm:$0xff] }
 0x202   :  { %2715 = vmatprep.subr.mxu1 %v2271_v17  ;;  %2645 = vmatpush2.msra.mxu0 %v2142_v62  ;;  %v2355_v57 = vld [vmem:[#allocation6 + $0x948] sm:$0xff]  ;;  %v2482_v59 = vld [vmem:[#allocation6 + $0xd40] sm:$0xff] }
 0x203   :  { %2716 = vmatpush2.msra.mxu1 %v2270_v3  ;;  %2646 = vmatprep.subr.mxu0 %v2139_v6  ;;  %v2483_v58 = vld [vmem:[#allocation6 + $0xd48] sm:$0xff]  ;;  %v2478_v62 = vld [vmem:[#allocation6 + $0xd20] sm:$0xff] }
 0x204   :  { %2717 = vmatprep.subr.mxu1 %v2267_v63  ;;  %2647 = vmatpush2.msra.mxu0 %v2138_v11  ;;  %v2351_v61 = vld [vmem:[#allocation6 + $0x928] sm:$0xff]  ;;  %v2346_v63 = vld [vmem:[#allocation6 + $0x900] sm:$0xff] }
 0x205   :  { %2718 = vmatpush2.msra.mxu1 %v2266_v13  ;;  %2648 = vmatprep.subr.mxu0 %v2135_v14  ;;  %v2479_v17 = vld [vmem:[#allocation6 + $0xd28] sm:$0xff]  ;;  %v2474_v9 = vld [vmem:[#allocation6 + $0xd00] sm:$0xff] }
 0x206   :  { %2719 = vmatprep.subr.mxu1 %v2263_v16  ;;  %2649 = vmatpush2.msra.mxu0 %v2134_v18  ;;  %v2347_v3 = vld [vmem:[#allocation6 + $0x908] sm:$0xff]  ;;  %v2342_v14 = vld [vmem:[#allocation6 + $0x8e0] sm:$0xff] }
 0x207   :  { %2720 = vmatpush2.msra.mxu1 %v2262_v19  ;;  %2650 = vmatprep.subr.mxu0 %v2131_v20  ;;  %v2475_v6 = vld [vmem:[#allocation6 + $0xd08] sm:$0xff]  ;;  %v2470_v16 = vld [vmem:[#allocation6 + $0xce0] sm:$0xff] }
 0x208   :  { %2721 = vmatprep.subr.mxu1 %v2259_v21  ;;  %2651 = vmatpush2.msra.mxu0 %v2130_v15  ;;  %v2343_v11 = vld [vmem:[#allocation6 + $0x8e8] sm:$0xff]  ;;  %v2338_v19 = vld [vmem:[#allocation6 + $0x8c0] sm:$0xff] }
 0x209   :  { %2722 = vmatpush2.msra.mxu1 %v2258_v23  ;;  %2652 = vmatprep.subr.mxu0 %v2127_v24  ;;  %v2471_v13 = vld [vmem:[#allocation6 + $0xce8] sm:$0xff]  ;;  %v2466_v20 = vld [vmem:[#allocation6 + $0xcc0] sm:$0xff] }
 0x20a   :  { %2723 = vmatprep.subr.mxu1 %v2255_v26  ;;  %2653 = vmatpush2.msra.mxu0 %v2126_v29  ;;  %v2339_v4 = vld [vmem:[#allocation6 + $0x8c8] sm:$0xff]  ;;  %v2334_v23 = vld [vmem:[#allocation6 + $0x8a0] sm:$0xff] }
 0x20b   :  { %2724 = vmatpush2.msra.mxu1 %v2254_v27  ;;  %2654 = vmatprep.subr.mxu0 %v2123_v49  ;;  %v2467_v18 = vld [vmem:[#allocation6 + $0xcc8] sm:$0xff]  ;;  %v2462_v24 = vld [vmem:[#allocation6 + $0xca0] sm:$0xff] }
 0x20c   :  { %2725 = vmatprep.subr.mxu1 %v2251_v28  ;;  %2655 = vmatpush2.msra.mxu0 %v2122_v10  ;;  %v2335_v21 = vld [vmem:[#allocation6 + $0x8a8] sm:$0xff]  ;;  %v2330_v27 = vld [vmem:[#allocation6 + $0x880] sm:$0xff] }
 0x20d   :  { %2726 = vmatpush2.msra.mxu1 %v2250_v30  ;;  %2657 = vmatmul.mubr.f32.vlgmr.msra.gmra.mxu0 %v2050_v31  ;;  %v2463_v15 = vld [vmem:[#allocation6 + $0xca8] sm:$0xff]  ;;  %v2458_v49 = vld [vmem:[#allocation6 + $0xc80] sm:$0xff] }
 0x20e   :  { %2728 = vmatmul.mubr.f32.vlgmr.msra.gmra.mxu1 %v2052_v32  ;;  %2734 = vmatprep.subr.mxu0 %v2375_v37  ;;  %v2331_v26 = vld [vmem:[#allocation6 + $0x888] sm:$0xff]  ;;  %v2326_v30 = vld [vmem:[#allocation6 + $0x860] sm:$0xff] }
 0x20f   :  { %2805 = vmatprep.subr.mxu1 %v2503_v33  ;;  %2735 = vmatpush1.msra.mxu0 %v2374_v34  ;;  %v2459_v29 = vld [vmem:[#allocation6 + $0xc88] sm:$0xff]  ;;  %v2454_v37 = vld [vmem:[#allocation6 + $0xc60] sm:$0xff] }
 0x210   :  { %2806 = vmatpush1.msra.mxu1 %v2502_v2  ;;  %2736 = vmatprep.subr.mxu0 %v2371_v12  ;;  %v2327_v28 = vld [vmem:[#allocation6 + $0x868] sm:$0xff]  ;;  %v2322_v2 = vld [vmem:[#allocation6 + $0x840] sm:$0xff] }
 0x211   :  { %2807 = vmatprep.subr.mxu1 %v2499_v38  ;;  %2737 = vmatpush1.msra.mxu0 %v2370_v39  ;;  %v2455_v10 = vld [vmem:[#allocation6 + $0xc68] sm:$0xff]  ;;  %v2450_v12 = vld [vmem:[#allocation6 + $0xc40] sm:$0xff] }
 0x212   :  { %2808 = vmatpush1.msra.mxu1 %v2498_v40  ;;  %2738 = vmatprep.subr.mxu0 %v2367_v35  ;;  %v2323_v33 = vld [vmem:[#allocation6 + $0x848] sm:$0xff]  ;;  %v2318_v40 = vld [vmem:[#allocation6 + $0x820] sm:$0xff] }
 0x213   :  { %2809 = vmatprep.subr.mxu1 %v2495_v42  ;;  %2739 = vmatpush1.msra.mxu0 %v2366_v43  ;;  %v2451_v34 = vld [vmem:[#allocation6 + $0xc48] sm:$0xff]  ;;  %v2446_v35 = vld [vmem:[#allocation6 + $0xc20] sm:$0xff] }
 0x214   :  { %2810 = vmatpush1.msra.mxu1 %v2494_v45  ;;  %2740 = vmatprep.subr.mxu0 %v2363_v46  ;;  %v2319_v38 = vld [vmem:[#allocation6 + $0x828] sm:$0xff]  ;;  %v2314_v45 = vld [vmem:[#allocation6 + $0x800] sm:$0xff] }
 0x215   :  { %2811 = vmatprep.subr.mxu1 %v2491_v47  ;;  %2741 = vmatpush1.msra.mxu0 %v2362_v48  ;;  %v2447_v39 = vld [vmem:[#allocation6 + $0xc28] sm:$0xff]  ;;  %v2442_v46 = vld [vmem:[#allocation6 + $0xc00] sm:$0xff] }
 0x216   :  { %2812 = vmatpush1.msra.mxu1 %v2490_v51  ;;  %2742 = vmatprep.subr.mxu0 %v2359_v52  ;;  %v2315_v42 = vld [vmem:[#allocation6 + $0x808] sm:$0xff]  ;;  %v2438_v51 = vld [vmem:[#allocation6 + $0xbe0] sm:$0xff] }
 0x217   :  { %2813 = vmatprep.subr.mxu1 %v2487_v54  ;;  %2743 = vmatpush1.msra.mxu0 %v2358_v55  ;;  %v2443_v43 = vld [vmem:[#allocation6 + $0xc08] sm:$0xff]  ;;  %v2566_v52 = vld [vmem:[#allocation6 + $0xfe0] sm:$0xff] }
 0x218   :  { %2814 = vmatpush1.msra.mxu1 %v2486_v36  ;;  %2744 = vmatprep.subr.mxu0 %v2355_v57  ;;  %v2439_v47 = vld [vmem:[#allocation6 + $0xbe8] sm:$0xff]  ;;  %v2434_v36 = vld [vmem:[#allocation6 + $0xbc0] sm:$0xff] }
 0x219   :  { %2815 = vmatprep.subr.mxu1 %v2483_v58  ;;  %2745 = vmatpush1.msra.mxu0 %v2354_v1  ;;  %v2567_v48 = vld [vmem:[#allocation6 + $0xfe8] sm:$0xff]  ;;  %v2562_v57 = vld [vmem:[#allocation6 + $0xfc0] sm:$0xff] }
 0x21a   :  { %2816 = vmatpush1.msra.mxu1 %v2482_v59  ;;  %2746 = vmatprep.subr.mxu0 %v2351_v61  ;;  %v2435_v54 = vld [vmem:[#allocation6 + $0xbc8] sm:$0xff]  ;;  %v2430_v59 = vld [vmem:[#allocation6 + $0xba0] sm:$0xff] }
 0x21b   :  { %2817 = vmatprep.subr.mxu1 %v2479_v17  ;;  %2747 = vmatpush1.msra.mxu0 %v2350_v0  ;;  %v2563_v55 = vld [vmem:[#allocation6 + $0xfc8] sm:$0xff]  ;;  %v2558_v61 = vld [vmem:[#allocation6 + $0xfa0] sm:$0xff] }
 0x21c   :  { %2818 = vmatpush1.msra.mxu1 %v2478_v62  ;;  %2748 = vmatprep.subr.mxu0 %v2347_v3  ;;  %v2431_v58 = vld [vmem:[#allocation6 + $0xba8] sm:$0xff]  ;;  %v2426_v62 = vld [vmem:[#allocation6 + $0xb80] sm:$0xff] }
 0x21d   :  { %2819 = vmatprep.subr.mxu1 %v2475_v6  ;;  %2749 = vmatpush1.msra.mxu0 %v2346_v63  ;;  %v2559_v1 = vld [vmem:[#allocation6 + $0xfa8] sm:$0xff]  ;;  %v2554_v3 = vld [vmem:[#allocation6 + $0xf80] sm:$0xff] }
 0x21e   :  { %2820 = vmatpush1.msra.mxu1 %v2474_v9  ;;  %2750 = vmatprep.subr.mxu0 %v2343_v11  ;;  %v2427_v17 = vld [vmem:[#allocation6 + $0xb88] sm:$0xff]  ;;  %v2422_v9 = vld [vmem:[#allocation6 + $0xb60] sm:$0xff] }
 0x21f   :  { %2821 = vmatprep.subr.mxu1 %v2471_v13  ;;  %2751 = vmatpush1.msra.mxu0 %v2342_v14  ;;  %v2555_v0 = vld [vmem:[#allocation6 + $0xf88] sm:$0xff]  ;;  %v2550_v11 = vld [vmem:[#allocation6 + $0xf60] sm:$0xff] }
 0x220   :  { %2822 = vmatpush1.msra.mxu1 %v2470_v16  ;;  %2752 = vmatprep.subr.mxu0 %v2339_v4  ;;  %v2423_v6 = vld [vmem:[#allocation6 + $0xb68] sm:$0xff]  ;;  %v888_v16 = vsub.s32 4, %v3685_v60  ;;  %v2418_v4 = vld [vmem:[#allocation6 + $0xb40] sm:$0xff] }
 0x221   :  { %2823 = vmatprep.subr.mxu1 %v2467_v18  ;;  %2753 = vmatpush1.msra.mxu0 %v2338_v19  ;;  %v2551_v63 = vld [vmem:[#allocation6 + $0xf68] sm:$0xff]  ;;  %v2546_v18 = vld [vmem:[#allocation6 + $0xf40] sm:$0xff] }
 0x222   :  { %2824 = vmatpush1.msra.mxu1 %v2466_v20  ;;  %2754 = vmatprep.subr.mxu0 %v2335_v21  ;;  %v2419_v13 = vld [vmem:[#allocation6 + $0xb48] sm:$0xff]  ;;  %v892_v21 = vsub.s32 5, %v3685_v60 }
 0x223   :  { %2825 = vmatprep.subr.mxu1 %v2463_v15  ;;  %2755 = vmatpush1.msra.mxu0 %v2334_v23  ;;  %v2547_v14 = vld [vmem:[#allocation6 + $0xf48] sm:$0xff]  ;;  %v2414_v15 = vld [vmem:[#allocation6 + $0xb20] sm:$0xff] }
 0x224   :  { %2826 = vmatpush1.msra.mxu1 %v2462_v24  ;;  %2756 = vmatprep.subr.mxu0 %v2331_v26  ;;  %v2415_v19 = vld [vmem:[#allocation6 + $0xb28] sm:$0xff]  ;;  %v2542_v23 = vld [vmem:[#allocation6 + $0xf20] sm:$0xff]  ;;  %v1548_v24 = vpop.f32.mrf.mxu0 }
 0x225   :  { %2827 = vmatprep.subr.mxu1 %v2459_v29  ;;  %2757 = vmatpush1.msra.mxu0 %v2330_v27  ;;  %v2543_v20 = vld [vmem:[#allocation6 + $0xf28] sm:$0xff]  ;;  %v3794_v27 = vld [vmem:[#allocation4] sm:$0xff] }
 0x226   :  { %2828 = vmatpush1.msra.mxu1 %v2458_v49  ;;  %2758 = vmatprep.subr.mxu0 %v2327_v28  ;;  %v2411_v26 = vld [vmem:[#allocation6 + $0xb08] sm:$0xff]  ;;  %v889_v49 = vrot.slane %v3794_v27, %v888_v16  ;;  %v2410_v28 = vld [vmem:[#allocation6 + $0xb00] sm:$0xff] }
 0x227   :  { %2829 = vmatprep.subr.mxu1 %v2455_v10  ;;  %2759 = vmatpush1.msra.mxu0 %v2326_v30  ;;  %v2539_v29 = vld [vmem:[#allocation6 + $0xf08] sm:$0xff]  ;;  %v2538_v10 = vld [vmem:[#allocation6 + $0xf00] sm:$0xff]  ;;  %v1619_v30 = vpop.f32.mrf.mxu1 }
 0x228   :  { %2830 = vmatpush1.msra.mxu1 %v2454_v37  ;;  %2760 = vmatprep.subr.mxu0 %v2323_v33  ;;  %v2407_v37 = vld [vmem:[#allocation6 + $0xae8] sm:$0xff]  ;;  %v2514_v16 = vld [vmem:[#allocation6 + $0xe40] sm:$0xff] }
 0x229   :  { %2831 = vmatprep.subr.mxu1 %v2451_v34  ;;  %2761 = vmatpush1.msra.mxu0 %v2322_v2  ;;  %v2535_v33 = vld [vmem:[#allocation6 + $0xee8] sm:$0xff]  ;;  %v893_v34 = vrot.slane %v3794_v27, %v892_v21  ;;  %v2406_v2 = vld [vmem:[#allocation6 + $0xae0] sm:$0xff] }
 0x22a   :  { %2832 = vmatpush1.msra.mxu1 %v2450_v12  ;;  %2762 = vmatprep.subr.mxu0 %v2319_v38  ;;  %v2534_v12 = vld [vmem:[#allocation6 + $0xee0] sm:$0xff]  ;;  %v1550_v38 = vpop.f32.mrf.mxu0 }
 0x22b   :  { %2833 = vmatprep.subr.mxu1 %v2447_v39  ;;  %2763 = vmatpush1.msra.mxu0 %v2318_v40  ;;  %v2403_v39 = vld [vmem:[#allocation6 + $0xac8] sm:$0xff] }
 0x22c   :  { %2834 = vmatpush1.msra.mxu1 %v2446_v35  ;;  %2764 = vmatprep.subr.mxu0 %v2315_v42  ;;  %v2531_v40 = vld [vmem:[#allocation6 + $0xec8] sm:$0xff]  ;;  %v1549_v35 = vadd.f32 %v1548_v24, %v889_v49  ;;  %v2402_v42 = vld [vmem:[#allocation6 + $0xac0] sm:$0xff] }
 0x22d   :  { %2835 = vmatprep.subr.mxu1 %v2443_v43  ;;  %2765 = vmatpush1.msra.mxu0 %v2314_v45  ;;  %v2530_v43 = vld [vmem:[#allocation6 + $0xec0] sm:$0xff]  ;;  %v1621_v45 = vpop.f32.mrf.mxu1  ;;  %v2379_v24 = vld [vmem:[#allocation6 + $0xa08] sm:$0xff] }
 0x22e   :  { %2836 = vmatpush1.msra.mxu1 %v2442_v46  ;;  %2766 = vmatprep.subr.mxu0 %v2439_v47  ;;  %v2399_v46 = vld [vmem:[#allocation6 + $0xaa8] sm:$0xff] }
 0x22f   :  { %2837 = vmatprep.subr.mxu1 %v2567_v48  ;;  %2767 = vmatpush2.msra.mxu0 %v2438_v51  ;;  %v2527_v47 = vld [vmem:[#allocation6 + $0xea8] sm:$0xff]  ;;  %v1551_v48 = vadd.f32 %v1550_v38, %v893_v34  ;;  %v2398_v51 = vld [vmem:[#allocation6 + $0xaa0] sm:$0xff]  ;;  %v2116_v34 = vld [vmem:[#allocation6 + $0x1d0] sm:$0xff] }
 0x230   :  { %2838 = vmatpush2.msra.mxu1 %v2566_v52  ;;  %2768 = vmatprep.subr.mxu0 %v2435_v54  ;;  %v2526_v52 = vld [vmem:[#allocation6 + $0xea0] sm:$0xff]  ;;  %v2395_v54 = vld [vmem:[#allocation6 + $0xa88] sm:$0xff]  ;;  %v2112_v38 = vld [vmem:[#allocation6 + $0x1b0] sm:$0xff] }
 0x231   :  { %2839 = vmatprep.subr.mxu1 %v2563_v55  ;;  %2769 = vmatpush2.msra.mxu0 %v2434_v36  ;;  %v2523_v55 = vld [vmem:[#allocation6 + $0xe88] sm:$0xff]  ;;  %v1620_v36 = vadd.f32 %v1619_v30, %v1549_v35  ;;  %v2120_v30 = vld [vmem:[#allocation6 + $0x1f0] sm:$0xff]  ;;  %v2105_v35 = vld [vmem:[#allocation6 + $0x178] sm:$0xff] }
 0x232   :  { %2840 = vmatpush2.msra.mxu1 %v2562_v57  ;;  %2770 = vmatprep.subr.mxu0 %v2431_v58  ;;  %v2394_v57 = vld [vmem:[#allocation6 + $0xa80] sm:$0xff]  ;;  %v2507_v49 = vld [vmem:[#allocation6 + $0xe08] sm:$0xff] }
 0x233   :  { %2841 = vmatprep.subr.mxu1 %v2559_v1  ;;  %2771 = vmatpush2.msra.mxu0 %v2430_v59  ;;  %v2522_v58 = vld [vmem:[#allocation6 + $0xe80] sm:$0xff]  ;;  %v1761_v1 = vpop.f32.mrf.mxu1 }
 0x234   :  { %2842 = vmatpush2.msra.mxu1 %v2558_v61  ;;  %2772 = vmatprep.subr.mxu0 %v2427_v17  ;;  %v2391_v61 = vld [vmem:[#allocation6 + $0xa68] sm:$0xff] }
 0x235   :  { %2843 = vmatprep.subr.mxu1 %v2555_v0  ;;  %2773 = vmatpush2.msra.mxu0 %v2426_v62  ;;  %v2519_v17 = vld [vmem:[#allocation6 + $0xe68] sm:$0xff]  ;;  %v1622_v0 = vadd.f32 %v1621_v45, %v1551_v48  ;;  %v2100_v45 = vld [vmem:[#allocation6 + $0x150] sm:$0xff]  ;;  %v2089_v48 = vld [vmem:[#allocation6 + $0xf8] sm:$0xff] }
 0x236   :  { %2844 = vmatpush2.msra.mxu1 %v2554_v3  ;;  %2774 = vmatprep.subr.mxu0 %v2423_v6  ;;  %v2390_v3 = vld [vmem:[#allocation6 + $0xa60] sm:$0xff] }
 0x237   :  { %2845 = vmatprep.subr.mxu1 %v2551_v63  ;;  %2775 = vmatpush2.msra.mxu0 %v2422_v9  ;;  %v2518_v6 = vld [vmem:[#allocation6 + $0xe60] sm:$0xff]  ;;  %v2387_v9 = vld [vmem:[#allocation6 + $0xa48] sm:$0xff] }
 0x238   :  { %2846 = vmatpush2.msra.mxu1 %v2550_v11  ;;  %2776 = vmatprep.subr.mxu0 %v2419_v13  ;;  %v2515_v11 = vld [vmem:[#allocation6 + $0xe48] sm:$0xff] }
 0x239   :  { %2847 = vmatprep.subr.mxu1 %v2547_v14  ;;  %2777 = vmatpush2.msra.mxu0 %v2418_v4  ;;  %v2386_v14 = vld [vmem:[#allocation6 + $0xa40] sm:$0xff]  ;;  %v1763_v4 = vpop.f32.mrf.mxu1 }
 0x23a   :  { %2848 = vmatpush2.msra.mxu1 %v2546_v18  ;;  %2778 = vmatprep.subr.mxu0 %v2415_v19  ;;  %v2383_v18 = vld [vmem:[#allocation6 + $0xa28] sm:$0xff] }
 0x23b   :  { %2849 = vmatprep.subr.mxu1 %v2543_v20  ;;  %2779 = vmatpush2.msra.mxu0 %v2414_v15  ;;  %v2511_v19 = vld [vmem:[#allocation6 + $0xe28] sm:$0xff]  ;;  %v2382_v15 = vld [vmem:[#allocation6 + $0xa20] sm:$0xff] }
 0x23c   :  { %2850 = vmatpush2.msra.mxu1 %v2542_v23  ;;  %2780 = vmatprep.subr.mxu0 %v2411_v26  ;;  %v2510_v23 = vld [vmem:[#allocation6 + $0xe20] sm:$0xff] }
 0x23d   :  { %2851 = vmatprep.subr.mxu1 %v2539_v29  ;;  %2781 = vmatpush2.msra.mxu0 %v2410_v28  ;;  %v2378_v29 = vld [vmem:[#allocation6 + $0xa00] sm:$0xff]  ;;  %v2121_v28 = vld [vmem:[#allocation6 + $0x1f8] sm:$0xff] }
 0x23e   :  { %2852 = vmatpush2.msra.mxu1 %v2538_v10  ;;  %2782 = vmatprep.subr.mxu0 %v2407_v37  ;;  %v2117_v37 = vld [vmem:[#allocation6 + $0x1d8] sm:$0xff] }
 0x23f   :  { %2853 = vmatprep.subr.mxu1 %v2535_v33  ;;  %2783 = vmatpush2.msra.mxu0 %v2406_v2  ;;  %v2506_v33 = vld [vmem:[#allocation6 + $0xe00] sm:$0xff]  ;;  %v2249_v2 = vld [vmem:[#allocation6 + $0x5f8] sm:$0xff] }
 0x240   :  { %2854 = vmatpush2.msra.mxu1 %v2534_v12  ;;  %2784 = vmatprep.subr.mxu0 %v2403_v39  ;;  %v2113_v12 = vld [vmem:[#allocation6 + $0x1b8] sm:$0xff] }
 0x241   :  { %2855 = vmatprep.subr.mxu1 %v2531_v40  ;;  %2785 = vmatpush2.msra.mxu0 %v2402_v42  ;;  %v2109_v39 = vld [vmem:[#allocation6 + $0x198] sm:$0xff]  ;;  %v2108_v40 = vld [vmem:[#allocation6 + $0x190] sm:$0xff] }
 0x242   :  { %2856 = vmatpush2.msra.mxu1 %v2530_v43  ;;  %2786 = vmatprep.subr.mxu0 %v2399_v46  ;;  %v2104_v42 = vld [vmem:[#allocation6 + $0x170] sm:$0xff]  ;;  %v2101_v43 = vld [vmem:[#allocation6 + $0x158] sm:$0xff] }
 0x243   :  { %2857 = vmatprep.subr.mxu1 %v2527_v47  ;;  %2787 = vmatpush2.msra.mxu0 %v2398_v51  ;;  %v2093_v46 = vld [vmem:[#allocation6 + $0x118] sm:$0xff]  ;;  %v2092_v47 = vld [vmem:[#allocation6 + $0x110] sm:$0xff] }
 0x244   :  { %v1690_v59 = vpop.f32.mrf.mxu0  ;;  %2858 = vmatpush2.msra.mxu1 %v2526_v52  ;;  %2788 = vmatprep.subr.mxu0 %v2395_v54  ;;  %v2088_v51 = vld [vmem:[#allocation6 + $0xf0] sm:$0xff]  ;;  %v2085_v52 = vld [vmem:[#allocation6 + $0xd8] sm:$0xff] }
 0x245   :  { %v1691_v62 = vadd.f32 %v1690_v59, %v1620_v36  ;;  %2859 = vmatprep.subr.mxu1 %v2523_v55  ;;  %2789 = vmatpush2.msra.mxu0 %v2394_v57  ;;  %v2084_v54 = vld [vmem:[#allocation6 + $0xd0] sm:$0xff]  ;;  %v2081_v55 = vld [vmem:[#allocation6 + $0xb8] sm:$0xff] }
 0x246   :  { %v1692_v63 = vpop.f32.mrf.mxu0  ;;  %2860 = vmatpush2.msra.mxu1 %v2522_v58  ;;  %2790 = vmatprep.subr.mxu0 %v2391_v61  ;;  %v2080_v36 = vld [vmem:[#allocation6 + $0xb0] sm:$0xff]  ;;  %v2077_v57 = vld [vmem:[#allocation6 + $0x98] sm:$0xff] }
 0x247   :  { %v1693_v13 = vadd.f32 %v1692_v63, %v1622_v0  ;;  %2861 = vmatprep.subr.mxu1 %v2519_v17  ;;  %2791 = vmatpush2.msra.mxu0 %v2390_v3  ;;  %v3798_v20 = vadd.f32 %v1761_v1, %v1691_v62  ;;  %v2076_v58 = vld [vmem:[#allocation6 + $0x90] sm:$0xff]  ;;  %v2073_v1 = vld [vmem:[#allocation6 + $0x78] sm:$0xff] }
 0x248   :  { %2862 = vmatpush2.msra.mxu1 %v2518_v6  ;;  %2792 = vmatprep.subr.mxu0 %v2387_v9  ;;  %v2072_v59 = vld [vmem:[#allocation6 + $0x70] sm:$0xff]  ;;  %v2069_v61 = vld [vmem:[#allocation6 + $0x58] sm:$0xff] }
 0x249   :  { %v3800_v21 = vadd.f32 %v1763_v4, %v1693_v13  ;;  %2863 = vmatprep.subr.mxu1 %v2515_v11  ;;  %2793 = vmatpush2.msra.mxu0 %v2386_v14  ;;  %v2054_v10 = vmax.f32 %v3798_v20, 0.0  ;;  %v2068_v17 = vld [vmem:[#allocation6 + $0x50] sm:$0xff]  ;;  %v2065_v0 = vld [vmem:[#allocation6 + $0x38] sm:$0xff]  ;;  %v3193_v20 = vld [vmem:[%s4049_s5 + $0xe8] sm:$0xff] }
 0x24a   :  { %2864 = vmatpush2.msra.mxu1 %v2514_v16  ;;  %2794 = vmatprep.subr.mxu0 %v2383_v18  ;;  %v2064_v62 = vld [vmem:[#allocation6 + $0x30] sm:$0xff]  ;;  %v2061_v3 = vld [vmem:[#allocation6 + $0x18] sm:$0xff] }
 0x24b   :  { %v2055_v26 = vmax.f32 %v3800_v21, 0.0  ;;  %2865 = vmatprep.subr.mxu1 %v2511_v19  ;;  %2795 = vmatpush2.msra.mxu0 %v2382_v15  ;;  %v2060_v6 = vld [vmem:[#allocation6 + $0x10] sm:$0xff]  ;;  %v2185_v63 = vld [vmem:[#allocation6 + $0x3f8] sm:$0xff] }
 0x24c   :  { %2866 = vmatpush2.msra.mxu1 %v2510_v23  ;;  %2796 = vmatprep.subr.mxu0 %v2379_v24  ;;  %v2184_v9 = vld [vmem:[#allocation6 + $0x3f0] sm:$0xff]  ;;  %v2181_v11 = vld [vmem:[#allocation6 + $0x3d8] sm:$0xff] }
 0x24d   :  { %2798 = vmatprep.mubr.f32.mxu0 %v2055_v26  ;;  %2797 = vmatpush2.msra.mxu0 %v2378_v29  ;;  %v2180_v13 = vld [vmem:[#allocation6 + $0x3d0] sm:$0xff]  ;;  %v2177_v14 = vld [vmem:[#allocation6 + $0x3b8] sm:$0xff] }
 0x24e   :  { %2867 = vmatprep.subr.mxu1 %v2507_v49  ;;  %2876 = vmatprep.subr.mxu0 %v2121_v28  ;;  %v2176_v16 = vld [vmem:[#allocation6 + $0x3b0] sm:$0xff]  ;;  %v2173_v4 = vld [vmem:[#allocation6 + $0x398] sm:$0xff] }
 0x24f   :  { %2799 = vmatmul.mubr.f32.vlgmr.msra.gmra.mxu0 %v2054_v10  ;;  %2868 = vmatpush2.msra.mxu1 %v2506_v33  ;;  %v2172_v18 = vld [vmem:[#allocation6 + $0x390] sm:$0xff]  ;;  %v2169_v19 = vld [vmem:[#allocation6 + $0x378] sm:$0xff] }
 0x250   :  { %2877 = vmatpush1.msra.mxu0 %v2120_v30  ;;  %2940 = vmatprep.mubr.f32.mxu0 %v2051_v25  ;;  %v2096_v25 = vld [vmem:[#allocation6 + $0x130] sm:$0xff]  ;;  %v2165_v23 = vld [vmem:[#allocation6 + $0x358] sm:$0xff] }
 0x251   :  { %2878 = vmatprep.subr.mxu0 %v2117_v37  ;;  %2947 = vmatprep.subr.mxu1 %v2249_v2  ;;  %v2168_v15 = vld [vmem:[#allocation6 + $0x370] sm:$0xff]  ;;  %v2161_v29 = vld [vmem:[#allocation6 + $0x338] sm:$0xff] }
 0x252   :  { %2879 = vmatpush1.msra.mxu0 %v2116_v34  ;;  %v2164_v24 = vld [vmem:[#allocation6 + $0x350] sm:$0xff]  ;;  %v2157_v28 = vld [vmem:[#allocation6 + $0x318] sm:$0xff] }
 0x253   :  { %2880 = vmatprep.subr.mxu0 %v2113_v12  ;;  %v2160_v49 = vld [vmem:[#allocation6 + $0x330] sm:$0xff]  ;;  %v2153_v37 = vld [vmem:[#allocation6 + $0x2f8] sm:$0xff] }
 0x254   :  { %2881 = vmatpush1.msra.mxu0 %v2112_v38  ;;  %v2156_v30 = vld [vmem:[#allocation6 + $0x310] sm:$0xff]  ;;  %v2149_v34 = vld [vmem:[#allocation6 + $0x2d8] sm:$0xff]  ;;  %v896_v38 = vsub.s32 6, %v3685_v60 }
 0x255   :  { %2882 = vmatprep.subr.mxu0 %v2109_v39  ;;  %v2152_v33 = vld [vmem:[#allocation6 + $0x2f0] sm:$0xff]  ;;  %v2145_v12 = vld [vmem:[#allocation6 + $0x2b8] sm:$0xff] }
 0x256   :  { %2883 = vmatpush1.msra.mxu0 %v2108_v40  ;;  %v2148_v2 = vld [vmem:[#allocation6 + $0x2d0] sm:$0xff]  ;;  %v2141_v40 = vld [vmem:[#allocation6 + $0x298] sm:$0xff] }
 0x257   :  { %2884 = vmatprep.subr.mxu0 %v2105_v35  ;;  %v2144_v39 = vld [vmem:[#allocation6 + $0x2b0] sm:$0xff]  ;;  %v900_v35 = vsub.s32 7, %v3685_v60  ;;  %v2245_v21 = vld [vmem:[#allocation6 + $0x5d8] sm:$0xff] }
 0x258   :  { %2885 = vmatpush1.msra.mxu0 %v2104_v42  ;;  %v2140_v42 = vld [vmem:[#allocation6 + $0x290] sm:$0xff] }
 0x259   :  { %2886 = vmatprep.subr.mxu0 %v2101_v43  ;;  %v1832_v43 = vpop.f32.mrf.mxu1 }
 0x25a   :  { %2887 = vmatpush1.msra.mxu0 %v2100_v45  ;;  %v2137_v45 = vld [vmem:[#allocation6 + $0x278] sm:$0xff] }
 0x25b   :  { %2888 = vmatprep.subr.mxu0 %v2097_v50  ;;  %v897_v50 = vrot.slane %v3794_v27, %v896_v38  ;;  %v2352_v38 = vld [vmem:[#allocation6 + $0x930] sm:$0xff] }
 0x25c   :  { %2889 = vmatpush1.msra.mxu0 %v2096_v25  ;;  %v2136_v25 = vld [vmem:[#allocation6 + $0x270] sm:$0xff] }
 0x25d   :  { %2890 = vmatprep.subr.mxu0 %v2093_v46 }
 0x25e   :  { %2891 = vmatpush1.msra.mxu0 %v2092_v47  ;;  %v2133_v47 = vld [vmem:[#allocation6 + $0x258] sm:$0xff] }
 0x25f   :  { %2892 = vmatprep.subr.mxu0 %v2089_v48  ;;  %v901_v48 = vrot.slane %v3794_v27, %v900_v35  ;;  %v2229_v35 = vld [vmem:[#allocation6 + $0x558] sm:$0xff] }
 0x260   :  { %2893 = vmatpush1.msra.mxu0 %v2088_v51  ;;  %v2132_v51 = vld [vmem:[#allocation6 + $0x250] sm:$0xff] }
 0x261   :  { %2894 = vmatprep.subr.mxu0 %v2085_v52  ;;  %v1834_v52 = vpop.f32.mrf.mxu1 }
 0x262   :  { %2895 = vmatpush1.msra.mxu0 %v2084_v54 }
 0x263   :  { %2896 = vmatprep.subr.mxu0 %v2081_v55  ;;  %v2129_v55 = vld [vmem:[#allocation6 + $0x238] sm:$0xff] }
 0x264   :  { %2897 = vmatpush1.msra.mxu0 %v2080_v36  ;;  %v1833_v36 = vadd.f32 %v1832_v43, %v897_v50  ;;  %v2228_v43 = vld [vmem:[#allocation6 + $0x550] sm:$0xff]  ;;  %v2225_v50 = vld [vmem:[#allocation6 + $0x538] sm:$0xff] }
 0x265   :  { %2898 = vmatprep.subr.mxu0 %v2077_v57  ;;  %v2128_v57 = vld [vmem:[#allocation6 + $0x230] sm:$0xff] }
 0x266   :  { %2899 = vmatpush1.msra.mxu0 %v2076_v58  ;;  %v2125_v58 = vld [vmem:[#allocation6 + $0x218] sm:$0xff] }
 0x267   :  { %2900 = vmatprep.subr.mxu0 %v2073_v1  ;;  %v1835_v1 = vadd.f32 %v1834_v52, %v901_v48  ;;  %v2221_v48 = vld [vmem:[#allocation6 + $0x518] sm:$0xff]  ;;  %v2220_v52 = vld [vmem:[#allocation6 + $0x510] sm:$0xff] }
 0x268   :  { %2901 = vmatpush1.msra.mxu0 %v2072_v59 }
 0x269   :  { %2902 = vmatprep.subr.mxu0 %v2069_v61  ;;  %v2124_v61 = vld [vmem:[#allocation6 + $0x210] sm:$0xff] }
 0x26a   :  { %2903 = vmatpush1.msra.mxu0 %v2068_v17 }
 0x26b   :  { %2904 = vmatprep.subr.mxu0 %v2065_v0 }
 0x26c   :  { %2905 = vmatpush1.msra.mxu0 %v2064_v62  ;;  %v2377_v62 = vld [vmem:[#allocation6 + $0x9f8] sm:$0xff] }
 0x26d   :  { %2906 = vmatprep.subr.mxu0 %v2061_v3 }
 0x26e   :  { %2907 = vmatpush1.msra.mxu0 %v2060_v6  ;;  %v2376_v6 = vld [vmem:[#allocation6 + $0x9f0] sm:$0xff] }
 0x26f   :  { %2908 = vmatprep.subr.mxu0 %v2185_v63 }
 0x270   :  { %2909 = vmatpush2.msra.mxu0 %v2184_v9  ;;  %v2373_v9 = vld [vmem:[#allocation6 + $0x9d8] sm:$0xff] }
 0x271   :  { %2910 = vmatprep.subr.mxu0 %v2181_v11 }
 0x272   :  { %2911 = vmatpush2.msra.mxu0 %v2180_v13  ;;  %v2372_v13 = vld [vmem:[#allocation6 + $0x9d0] sm:$0xff] }
 0x273   :  { %2912 = vmatprep.subr.mxu0 %v2177_v14 }
 0x274   :  { %2913 = vmatpush2.msra.mxu0 %v2176_v16 }
 0x275   :  { %2914 = vmatprep.subr.mxu0 %v2173_v4  ;;  %v2369_v4 = vld [vmem:[#allocation6 + $0x9b8] sm:$0xff] }
 0x276   :  { %2915 = vmatpush2.msra.mxu0 %v2172_v18 }
 0x277   :  { %2916 = vmatprep.subr.mxu0 %v2169_v19  ;;  %v2368_v19 = vld [vmem:[#allocation6 + $0x9b0] sm:$0xff] }
 0x278   :  { %2917 = vmatpush2.msra.mxu0 %v2168_v15  ;;  %v2365_v15 = vld [vmem:[#allocation6 + $0x998] sm:$0xff] }
 0x279   :  { %2918 = vmatprep.subr.mxu0 %v2165_v23 }
 0x27a   :  { %2919 = vmatpush2.msra.mxu0 %v2164_v24  ;;  %v2248_v24 = vld [vmem:[#allocation6 + $0x5f0] sm:$0xff] }
 0x27b   :  { %2920 = vmatprep.subr.mxu0 %v2161_v29  ;;  %v2244_v29 = vld [vmem:[#allocation6 + $0x5d0] sm:$0xff] }
 0x27c   :  { %2921 = vmatpush2.msra.mxu0 %v2160_v49  ;;  %v2360_v49 = vld [vmem:[#allocation6 + $0x970] sm:$0xff] }
 0x27d   :  { %2922 = vmatprep.subr.mxu0 %v2157_v28  ;;  %v2241_v28 = vld [vmem:[#allocation6 + $0x5b8] sm:$0xff] }
 0x27e   :  { %2923 = vmatpush2.msra.mxu0 %v2156_v30  ;;  %v2357_v30 = vld [vmem:[#allocation6 + $0x958] sm:$0xff] }
 0x27f   :  { %2924 = vmatprep.subr.mxu0 %v2153_v37  ;;  %v2240_v37 = vld [vmem:[#allocation6 + $0x5b0] sm:$0xff] }
 0x280   :  { %2925 = vmatpush2.msra.mxu0 %v2152_v33  ;;  %v2356_v33 = vld [vmem:[#allocation6 + $0x950] sm:$0xff] }
 0x281   :  { %2926 = vmatprep.subr.mxu0 %v2149_v34  ;;  %v2237_v34 = vld [vmem:[#allocation6 + $0x598] sm:$0xff] }
 0x282   :  { %2927 = vmatpush2.msra.mxu0 %v2148_v2  ;;  %v2353_v2 = vld [vmem:[#allocation6 + $0x938] sm:$0xff] }
 0x283   :  { %2928 = vmatprep.subr.mxu0 %v2145_v12  ;;  %v2236_v12 = vld [vmem:[#allocation6 + $0x590] sm:$0xff] }
 0x284   :  { %2929 = vmatpush2.msra.mxu0 %v2144_v39  ;;  %v2233_v39 = vld [vmem:[#allocation6 + $0x578] sm:$0xff] }
 0x285   :  { %2930 = vmatprep.subr.mxu0 %v2141_v40  ;;  %v2349_v40 = vld [vmem:[#allocation6 + $0x918] sm:$0xff] }
 0x286   :  { %v1903_v46 = vpop.f32.mrf.mxu0  ;;  %2931 = vmatpush2.msra.mxu0 %v2140_v42  ;;  %v2345_v42 = vld [vmem:[#allocation6 + $0x8f8] sm:$0xff] }
 0x287   :  { %2932 = vmatprep.subr.mxu0 %v2137_v45  ;;  %v1904_v59 = vadd.f32 %v1903_v46, %v1833_v36  ;;  %v2344_v45 = vld [vmem:[#allocation6 + $0x8f0] sm:$0xff]  ;;  %v2333_v36 = vld [vmem:[#allocation6 + $0x898] sm:$0xff] }
 0x288   :  { %v1905_v54 = vpop.f32.mrf.mxu0  ;;  %2933 = vmatpush2.msra.mxu0 %v2136_v25  ;;  %v2341_v25 = vld [vmem:[#allocation6 + $0x8d8] sm:$0xff]  ;;  %v2224_v46 = vld [vmem:[#allocation6 + $0x530] sm:$0xff] }
 0x289   :  { %2934 = vmatprep.subr.mxu0 %v2133_v47  ;;  %v1906_v27 = vadd.f32 %v1905_v54, %v1835_v1  ;;  %v2340_v47 = vld [vmem:[#allocation6 + $0x8d0] sm:$0xff]  ;;  %v2213_v1 = vld [vmem:[#allocation6 + $0x4d8] sm:$0xff] }
 0x28a   :  { %2935 = vmatpush2.msra.mxu0 %v2132_v51  ;;  %v2337_v51 = vld [vmem:[#allocation6 + $0x8b8] sm:$0xff]  ;;  %v2336_v54 = vld [vmem:[#allocation6 + $0x8b0] sm:$0xff] }
 0x28b   :  { %2936 = vmatprep.subr.mxu0 %v2129_v55  ;;  %v1974_v17 = vpop.f32.mrf.mxu1  ;;  %v2217_v55 = vld [vmem:[#allocation6 + $0x4f8] sm:$0xff] }
 0x28c   :  { %v2045_v0 = vpop.f32.mrf.mxu0  ;;  %2937 = vmatpush2.msra.mxu0 %v2128_v57  ;;  %v1975_v3 = vadd.f32 %v1974_v17, %v1904_v59  ;;  %v2216_v57 = vld [vmem:[#allocation6 + $0x4f0] sm:$0xff]  ;;  %v2329_v59 = vld [vmem:[#allocation6 + $0x878] sm:$0xff] }
 0x28d   :  { %2938 = vmatprep.subr.mxu0 %v2125_v58  ;;  %v1976_v63 = vpop.f32.mrf.mxu1  ;;  %v2332_v58 = vld [vmem:[#allocation6 + $0x890] sm:$0xff] }
 0x28e   :  { %2939 = vmatpush2.msra.mxu0 %v2124_v61  ;;  %v1977_v11 = vadd.f32 %v1976_v63, %v1906_v27  ;;  %v3816_v14 = vadd.f32 %v2045_v0, %v1975_v3  ;;  %v2047_v16 = vpop.f32.mrf.mxu0  ;;  %v2212_v61 = vld [vmem:[#allocation6 + $0x4d0] sm:$0xff]  ;;  %v2209_v0 = vld [vmem:[#allocation6 + $0x4b8] sm:$0xff] }
 0x28f   :  { %2941 = vmatmul.mubr.f32.vlgmr.msra.gmra.mxu0 %v2050_v31  ;;  %3018 = vmatprep.subr.mxu0 %v2377_v62  ;;  %v2328_v17 = vld [vmem:[#allocation6 + $0x870] sm:$0xff]  ;;  %v2325_v62 = vld [vmem:[#allocation6 + $0x858] sm:$0xff] }
 0x290   :  { %3019 = vmatpush1.msra.mxu0 %v2376_v6  ;;  %3082 = vmatprep.mubr.f32.mxu0 %v2055_v26  ;;  %v3820_v18 = vadd.f32 %v2047_v16, %v1977_v11  ;;  %v2056_v31 = vmax.f32 %v3816_v14, 0.0  ;;  %v2361_v26 = vld [vmem:[#allocation6 + $0x978] sm:$0xff]  ;;  %v2208_v27 = vld [vmem:[#allocation6 + $0x4b0] sm:$0xff]  ;;  %v3225_v14 = vld [vmem:[%s4049_s5 + $0x1e8] sm:$0xff] }
 0x291   :  { %3020 = vmatprep.subr.mxu0 %v2373_v9  ;;  %v2324_v3 = vld [vmem:[#allocation6 + $0x850] sm:$0xff]  ;;  %v2205_v6 = vld [vmem:[#allocation6 + $0x498] sm:$0xff] }
 0x292   :  { %3021 = vmatpush1.msra.mxu0 %v2372_v13  ;;  %v2057_v23 = vmax.f32 %v3820_v18, 0.0  ;;  %v2321_v63 = vld [vmem:[#allocation6 + $0x838] sm:$0xff]  ;;  %v2204_v9 = vld [vmem:[#allocation6 + $0x490] sm:$0xff] }
 0x293   :  { %3022 = vmatprep.subr.mxu0 %v2369_v4  ;;  %v2320_v11 = vld [vmem:[#allocation6 + $0x830] sm:$0xff]  ;;  %v2201_v13 = vld [vmem:[#allocation6 + $0x478] sm:$0xff] }
 0x294   :  { %3023 = vmatpush1.msra.mxu0 %v2368_v19  ;;  %2869 = vmatprep.mubr.f32.mxu1 %v2057_v23  ;;  %v2317_v16 = vld [vmem:[#allocation6 + $0x818] sm:$0xff]  ;;  %v2200_v4 = vld [vmem:[#allocation6 + $0x470] sm:$0xff] }
 0x295   :  { %3024 = vmatprep.subr.mxu0 %v2365_v15  ;;  %2870 = vmatmul.mubr.f32.vlgmr.msra.gmra.mxu1 %v2056_v31  ;;  %v2316_v19 = vld [vmem:[#allocation6 + $0x810] sm:$0xff]  ;;  %v2197_v15 = vld [vmem:[#allocation6 + $0x458] sm:$0xff] }
 0x296   :  { %3025 = vmatpush1.msra.mxu0 %v2364_v53  ;;  %2948 = vmatpush1.msra.mxu1 %v2248_v24  ;;  %v2441_v53 = vld [vmem:[#allocation6 + $0xbf8] sm:$0xff]  ;;  %v2196_v24 = vld [vmem:[#allocation6 + $0x450] sm:$0xff] }
 0x297   :  { %3011 = vmatprep.mubr.f32.mxu1 %v2053_v5  ;;  %2949 = vmatprep.subr.mxu1 %v2245_v21  ;;  %v2348_v5 = vld [vmem:[#allocation6 + $0x910] sm:$0xff] }
 0x298   :  { %3026 = vmatprep.subr.mxu0 %v2361_v26  ;;  %2950 = vmatpush1.msra.mxu1 %v2244_v29  ;;  %v2440_v21 = vld [vmem:[#allocation6 + $0xbf0] sm:$0xff]  ;;  %v2193_v26 = vld [vmem:[#allocation6 + $0x438] sm:$0xff] }
 0x299   :  { %3027 = vmatpush1.msra.mxu0 %v2360_v49  ;;  %2951 = vmatprep.subr.mxu1 %v2241_v28  ;;  %v2437_v29 = vld [vmem:[#allocation6 + $0xbd8] sm:$0xff]  ;;  %v2192_v49 = vld [vmem:[#allocation6 + $0x430] sm:$0xff] }
 0x29a   :  { %3028 = vmatprep.subr.mxu0 %v2357_v30  ;;  %2952 = vmatpush1.msra.mxu1 %v2240_v37  ;;  %v2436_v28 = vld [vmem:[#allocation6 + $0xbd0] sm:$0xff]  ;;  %v2189_v30 = vld [vmem:[#allocation6 + $0x418] sm:$0xff] }
 0x29b   :  { %3029 = vmatpush1.msra.mxu0 %v2356_v33  ;;  %2953 = vmatprep.subr.mxu1 %v2237_v34  ;;  %v2433_v37 = vld [vmem:[#allocation6 + $0xbb8] sm:$0xff]  ;;  %v2188_v33 = vld [vmem:[#allocation6 + $0x410] sm:$0xff] }
 0x29c   :  { %3030 = vmatprep.subr.mxu0 %v2353_v2  ;;  %2954 = vmatpush1.msra.mxu1 %v2236_v12  ;;  %v2432_v34 = vld [vmem:[#allocation6 + $0xbb0] sm:$0xff]  ;;  %v2313_v2 = vld [vmem:[#allocation6 + $0x7f8] sm:$0xff] }
 0x29d   :  { %3031 = vmatpush1.msra.mxu0 %v2352_v38  ;;  %2955 = vmatprep.subr.mxu1 %v2233_v39  ;;  %v2429_v12 = vld [vmem:[#allocation6 + $0xb98] sm:$0xff]  ;;  %v2312_v38 = vld [vmem:[#allocation6 + $0x7f0] sm:$0xff] }
 0x29e   :  { %3032 = vmatprep.subr.mxu0 %v2349_v40  ;;  %2956 = vmatpush1.msra.mxu1 %v2232_v56  ;;  %v2428_v39 = vld [vmem:[#allocation6 + $0xb90] sm:$0xff]  ;;  %v2309_v40 = vld [vmem:[#allocation6 + $0x7d8] sm:$0xff] }
 0x29f   :  { %3033 = vmatpush1.msra.mxu0 %v2348_v5  ;;  %2957 = vmatprep.subr.mxu1 %v2229_v35  ;;  %v2425_v56 = vld [vmem:[#allocation6 + $0xb78] sm:$0xff]  ;;  %v2308_v5 = vld [vmem:[#allocation6 + $0x7d0] sm:$0xff] }
 0x2a0   :  { %3034 = vmatprep.subr.mxu0 %v2345_v42  ;;  %2958 = vmatpush1.msra.mxu1 %v2228_v43  ;;  %v2424_v35 = vld [vmem:[#allocation6 + $0xb70] sm:$0xff]  ;;  %v2305_v42 = vld [vmem:[#allocation6 + $0x7b8] sm:$0xff] }
 0x2a1   :  { %3035 = vmatpush1.msra.mxu0 %v2344_v45  ;;  %2959 = vmatprep.subr.mxu1 %v2225_v50  ;;  %v2421_v43 = vld [vmem:[#allocation6 + $0xb58] sm:$0xff]  ;;  %v2304_v45 = vld [vmem:[#allocation6 + $0x7b0] sm:$0xff] }
 0x2a2   :  { %3036 = vmatprep.subr.mxu0 %v2341_v25  ;;  %2960 = vmatpush1.msra.mxu1 %v2224_v46  ;;  %v2420_v50 = vld [vmem:[#allocation6 + $0xb50] sm:$0xff]  ;;  %v2301_v25 = vld [vmem:[#allocation6 + $0x798] sm:$0xff] }
 0x2a3   :  { %3037 = vmatpush1.msra.mxu0 %v2340_v47  ;;  %2961 = vmatprep.subr.mxu1 %v2221_v48  ;;  %v2417_v46 = vld [vmem:[#allocation6 + $0xb38] sm:$0xff]  ;;  %v2300_v47 = vld [vmem:[#allocation6 + $0x790] sm:$0xff] }
 0x2a4   :  { %3038 = vmatprep.subr.mxu0 %v2337_v51  ;;  %2962 = vmatpush1.msra.mxu1 %v2220_v52  ;;  %v2416_v48 = vld [vmem:[#allocation6 + $0xb30] sm:$0xff]  ;;  %v2297_v51 = vld [vmem:[#allocation6 + $0x778] sm:$0xff] }
 0x2a5   :  { %3039 = vmatpush1.msra.mxu0 %v2336_v54  ;;  %2963 = vmatprep.subr.mxu1 %v2217_v55  ;;  %v2413_v52 = vld [vmem:[#allocation6 + $0xb18] sm:$0xff]  ;;  %v2296_v54 = vld [vmem:[#allocation6 + $0x770] sm:$0xff] }
 0x2a6   :  { %3040 = vmatprep.subr.mxu0 %v2333_v36  ;;  %2964 = vmatpush1.msra.mxu1 %v2216_v57  ;;  %v2412_v55 = vld [vmem:[#allocation6 + $0xb10] sm:$0xff]  ;;  %v2293_v36 = vld [vmem:[#allocation6 + $0x758] sm:$0xff] }
 0x2a7   :  { %3041 = vmatpush1.msra.mxu0 %v2332_v58  ;;  %2965 = vmatprep.subr.mxu1 %v2213_v1  ;;  %v2409_v57 = vld [vmem:[#allocation6 + $0xaf8] sm:$0xff]  ;;  %v2292_v58 = vld [vmem:[#allocation6 + $0x750] sm:$0xff] }
 0x2a8   :  { %3042 = vmatprep.subr.mxu0 %v2329_v59  ;;  %2966 = vmatpush1.msra.mxu1 %v2212_v61  ;;  %v2408_v1 = vld [vmem:[#allocation6 + $0xaf0] sm:$0xff]  ;;  %v2289_v59 = vld [vmem:[#allocation6 + $0x738] sm:$0xff] }
 0x2a9   :  { %3043 = vmatpush1.msra.mxu0 %v2328_v17  ;;  %2967 = vmatprep.subr.mxu1 %v2209_v0  ;;  %v2405_v61 = vld [vmem:[#allocation6 + $0xad8] sm:$0xff]  ;;  %v2288_v17 = vld [vmem:[#allocation6 + $0x730] sm:$0xff] }
 0x2aa   :  { %3044 = vmatprep.subr.mxu0 %v2325_v62  ;;  %2968 = vmatpush1.msra.mxu1 %v2208_v27  ;;  %v2404_v0 = vld [vmem:[#allocation6 + $0xad0] sm:$0xff]  ;;  %v2285_v62 = vld [vmem:[#allocation6 + $0x718] sm:$0xff] }
 0x2ab   :  { %3045 = vmatpush1.msra.mxu0 %v2324_v3  ;;  %2969 = vmatprep.subr.mxu1 %v2205_v6  ;;  %v2401_v27 = vld [vmem:[#allocation6 + $0xab8] sm:$0xff]  ;;  %v2284_v3 = vld [vmem:[#allocation6 + $0x710] sm:$0xff] }
 0x2ac   :  { %3046 = vmatprep.subr.mxu0 %v2321_v63  ;;  %2970 = vmatpush1.msra.mxu1 %v2204_v9  ;;  %v2400_v6 = vld [vmem:[#allocation6 + $0xab0] sm:$0xff]  ;;  %v2281_v63 = vld [vmem:[#allocation6 + $0x6f8] sm:$0xff] }
 0x2ad   :  { %3047 = vmatpush1.msra.mxu0 %v2320_v11  ;;  %2971 = vmatprep.subr.mxu1 %v2201_v13  ;;  %v2397_v9 = vld [vmem:[#allocation6 + $0xa98] sm:$0xff]  ;;  %v2280_v11 = vld [vmem:[#allocation6 + $0x6f0] sm:$0xff] }
 0x2ae   :  { %3048 = vmatprep.subr.mxu0 %v2317_v16  ;;  %2972 = vmatpush1.msra.mxu1 %v2200_v4  ;;  %v2396_v13 = vld [vmem:[#allocation6 + $0xa90] sm:$0xff]  ;;  %v2277_v16 = vld [vmem:[#allocation6 + $0x6d8] sm:$0xff] }
 0x2af   :  { %3049 = vmatpush1.msra.mxu0 %v2316_v19  ;;  %2973 = vmatprep.subr.mxu1 %v2197_v15  ;;  %v2393_v4 = vld [vmem:[#allocation6 + $0xa78] sm:$0xff]  ;;  %v2276_v19 = vld [vmem:[#allocation6 + $0x6d0] sm:$0xff] }
 0x2b0   :  { %3050 = vmatprep.subr.mxu0 %v2441_v53  ;;  %2974 = vmatpush1.msra.mxu1 %v2196_v24  ;;  %v2392_v15 = vld [vmem:[#allocation6 + $0xa70] sm:$0xff]  ;;  %v2273_v53 = vld [vmem:[#allocation6 + $0x6b8] sm:$0xff] }
 0x2b1   :  { %3051 = vmatpush2.msra.mxu0 %v2440_v21  ;;  %2975 = vmatprep.subr.mxu1 %v2193_v26  ;;  %v2389_v24 = vld [vmem:[#allocation6 + $0xa58] sm:$0xff]  ;;  %v2272_v21 = vld [vmem:[#allocation6 + $0x6b0] sm:$0xff] }
 0x2b2   :  { %3052 = vmatprep.subr.mxu0 %v2437_v29  ;;  %2976 = vmatpush1.msra.mxu1 %v2192_v49  ;;  %v2388_v26 = vld [vmem:[#allocation6 + $0xa50] sm:$0xff]  ;;  %v2269_v29 = vld [vmem:[#allocation6 + $0x698] sm:$0xff] }
 0x2b3   :  { %3053 = vmatpush2.msra.mxu0 %v2436_v28  ;;  %2977 = vmatprep.subr.mxu1 %v2189_v30  ;;  %v2385_v49 = vld [vmem:[#allocation6 + $0xa38] sm:$0xff]  ;;  %v2268_v28 = vld [vmem:[#allocation6 + $0x690] sm:$0xff] }
 0x2b4   :  { %3054 = vmatprep.subr.mxu0 %v2433_v37  ;;  %2978 = vmatpush1.msra.mxu1 %v2188_v33  ;;  %v2384_v30 = vld [vmem:[#allocation6 + $0xa30] sm:$0xff]  ;;  %v2265_v37 = vld [vmem:[#allocation6 + $0x678] sm:$0xff] }
 0x2b5   :  { %3055 = vmatpush2.msra.mxu0 %v2432_v34  ;;  %2979 = vmatprep.subr.mxu1 %v2313_v2  ;;  %v2381_v33 = vld [vmem:[#allocation6 + $0xa18] sm:$0xff]  ;;  %v2264_v34 = vld [vmem:[#allocation6 + $0x670] sm:$0xff] }
 0x2b6   :  { %3056 = vmatprep.subr.mxu0 %v2429_v12  ;;  %2980 = vmatpush2.msra.mxu1 %v2312_v38  ;;  %v2380_v2 = vld [vmem:[#allocation6 + $0xa10] sm:$0xff]  ;;  %v2261_v12 = vld [vmem:[#allocation6 + $0x658] sm:$0xff] }
 0x2b7   :  { %3057 = vmatpush2.msra.mxu0 %v2428_v39  ;;  %2981 = vmatprep.subr.mxu1 %v2309_v40  ;;  %v2260_v38 = vld [vmem:[#allocation6 + $0x650] sm:$0xff]  ;;  %v2257_v40 = vld [vmem:[#allocation6 + $0x638] sm:$0xff] }
 0x2b8   :  { %3058 = vmatprep.subr.mxu0 %v2425_v56  ;;  %2982 = vmatpush2.msra.mxu1 %v2308_v5  ;;  %v3195_v39 = vld [vmem:[%s4049_s5 + $0xf8] sm:$0xff] }
 0x2b9   :  { %3059 = vmatpush2.msra.mxu0 %v2424_v35  ;;  %2983 = vmatprep.subr.mxu1 %v2305_v42  ;;  %v3179_v56 = vld [vmem:[%s4049_s5 + $0x78] sm:$0xff]  ;;  %v3194_v35 = vld [vmem:[%s4049_s5 + $0xf0] sm:$0xff]  ;;  %v2253_v42 = vld [vmem:[#allocation6 + $0x618] sm:$0xff] }
 0x2ba   :  { %3060 = vmatprep.subr.mxu0 %v2421_v43  ;;  %2984 = vmatpush2.msra.mxu1 %v2304_v45  ;;  %v2256_v5 = vld [vmem:[#allocation6 + $0x630] sm:$0xff]  ;;  %v3178_v43 = vld [vmem:[%s4049_s5 + $0x70] sm:$0xff] }
 0x2bb   :  { %3061 = vmatpush2.msra.mxu0 %v2420_v50  ;;  %2985 = vmatprep.subr.mxu1 %v2301_v25  ;;  %v2252_v45 = vld [vmem:[#allocation6 + $0x610] sm:$0xff]  ;;  %v2501_v25 = vld [vmem:[#allocation6 + $0xdd8] sm:$0xff] }
 0x2bc   :  { %3062 = vmatprep.subr.mxu0 %v2417_v46  ;;  %2986 = vmatpush2.msra.mxu1 %v2300_v47  ;;  %v2504_v50 = vld [vmem:[#allocation6 + $0xdf0] sm:$0xff]  ;;  %v3177_v46 = vld [vmem:[%s4049_s5 + $0x68] sm:$0xff] }
 0x2bd   :  { %3063 = vmatpush2.msra.mxu0 %v2416_v48  ;;  %2987 = vmatprep.subr.mxu1 %v2297_v51  ;;  %v2500_v47 = vld [vmem:[#allocation6 + $0xdd0] sm:$0xff]  ;;  %v3192_v48 = vld [vmem:[%s4049_s5 + $0xe0] sm:$0xff] }
 0x2be   :  { %3064 = vmatprep.subr.mxu0 %v2413_v52  ;;  %2988 = vmatpush2.msra.mxu1 %v2296_v54  ;;  %v2497_v51 = vld [vmem:[#allocation6 + $0xdb8] sm:$0xff]  ;;  %v2496_v54 = vld [vmem:[#allocation6 + $0xdb0] sm:$0xff] }
 0x2bf   :  { %3065 = vmatpush2.msra.mxu0 %v2412_v55  ;;  %2989 = vmatprep.subr.mxu1 %v2293_v36  ;;  %v3176_v52 = vld [vmem:[%s4049_s5 + $0x60] sm:$0xff]  ;;  %v3175_v18 = vld [vmem:[%s4049_s5 + $0x58] sm:$0xff]  ;;  %v3190_v55 = vld [vmem:[%s4049_s5 + $0xd0] sm:$0xff] }
 0x2c0   :  { %3066 = vmatprep.subr.mxu0 %v2409_v57  ;;  %2990 = vmatpush2.msra.mxu1 %v2292_v58  ;;  %v2489_v36 = vld [vmem:[#allocation6 + $0xd78] sm:$0xff]  ;;  %v3174_v57 = vld [vmem:[%s4049_s5 + $0x50] sm:$0xff]  ;;  %v2488_v58 = vld [vmem:[#allocation6 + $0xd70] sm:$0xff] }
 0x2c1   :  { %3067 = vmatpush2.msra.mxu0 %v2408_v1  ;;  %2991 = vmatprep.subr.mxu1 %v2289_v59  ;;  %v3189_v1 = vld [vmem:[%s4049_s5 + $0xc8] sm:$0xff]  ;;  %v2485_v59 = vld [vmem:[#allocation6 + $0xd58] sm:$0xff] }
 0x2c2   :  { %3068 = vmatprep.subr.mxu0 %v2405_v61  ;;  %2992 = vmatpush2.msra.mxu1 %v2288_v17  ;;  %v3173_v61 = vld [vmem:[%s4049_s5 + $0x48] sm:$0xff]  ;;  %v2484_v17 = vld [vmem:[#allocation6 + $0xd50] sm:$0xff] }
 0x2c3   :  { %3069 = vmatpush2.msra.mxu0 %v2404_v0  ;;  %2993 = vmatprep.subr.mxu1 %v2285_v62  ;;  %v3188_v0 = vld [vmem:[%s4049_s5 + $0xc0] sm:$0xff] }
 0x2c4   :  { %3070 = vmatprep.subr.mxu0 %v2401_v27  ;;  %2994 = vmatpush2.msra.mxu1 %v2284_v3  ;;  %v2481_v62 = vld [vmem:[#allocation6 + $0xd38] sm:$0xff]  ;;  %v2480_v3 = vld [vmem:[#allocation6 + $0xd30] sm:$0xff] }
 0x2c5   :  { %3071 = vmatpush2.msra.mxu0 %v2400_v6  ;;  %2995 = vmatprep.subr.mxu1 %v2281_v63  ;;  %v3172_v27 = vld [vmem:[%s4049_s5 + $0x40] sm:$0xff]  ;;  %v3187_v6 = vld [vmem:[%s4049_s5 + $0xb8] sm:$0xff] }
 0x2c6   :  { %3072 = vmatprep.subr.mxu0 %v2397_v9  ;;  %2996 = vmatpush2.msra.mxu1 %v2280_v11  ;;  %v2477_v63 = vld [vmem:[#allocation6 + $0xd18] sm:$0xff]  ;;  %v3171_v9 = vld [vmem:[%s4049_s5 + $0x38] sm:$0xff] }
 0x2c7   :  { %3073 = vmatpush2.msra.mxu0 %v2396_v13  ;;  %2997 = vmatprep.subr.mxu1 %v2277_v16  ;;  %v2476_v11 = vld [vmem:[#allocation6 + $0xd10] sm:$0xff]  ;;  %v3186_v13 = vld [vmem:[%s4049_s5 + $0xb0] sm:$0xff]  ;;  %v2473_v16 = vld [vmem:[#allocation6 + $0xcf8] sm:$0xff] }
 0x2c8   :  { %3074 = vmatprep.subr.mxu0 %v2393_v4  ;;  %2998 = vmatpush2.msra.mxu1 %v2276_v19  ;;  %v3170_v4 = vld [vmem:[%s4049_s5 + $0x30] sm:$0xff]  ;;  %v2472_v19 = vld [vmem:[#allocation6 + $0xcf0] sm:$0xff] }
 0x2c9   :  { %3075 = vmatpush2.msra.mxu0 %v2392_v15  ;;  %2999 = vmatprep.subr.mxu1 %v2273_v53  ;;  %v3185_v15 = vld [vmem:[%s4049_s5 + $0xa8] sm:$0xff]  ;;  %v2469_v53 = vld [vmem:[#allocation6 + $0xcd8] sm:$0xff] }
 0x2ca   :  { %3076 = vmatprep.subr.mxu0 %v2389_v24  ;;  %3000 = vmatpush2.msra.mxu1 %v2272_v21  ;;  %v3169_v24 = vld [vmem:[%s4049_s5 + $0x28] sm:$0xff]  ;;  %v2468_v21 = vld [vmem:[#allocation6 + $0xcd0] sm:$0xff] }
 0x2cb   :  { %3077 = vmatpush2.msra.mxu0 %v2388_v26  ;;  %3001 = vmatprep.subr.mxu1 %v2269_v29  ;;  %v3184_v26 = vld [vmem:[%s4049_s5 + $0xa0] sm:$0xff] }
 0x2cc   :  { %3078 = vmatprep.subr.mxu0 %v2385_v49  ;;  %3002 = vmatpush2.msra.mxu1 %v2268_v28  ;;  %v2465_v29 = vld [vmem:[#allocation6 + $0xcb8] sm:$0xff]  ;;  %v2464_v28 = vld [vmem:[#allocation6 + $0xcb0] sm:$0xff] }
 0x2cd   :  { %3079 = vmatpush2.msra.mxu0 %v2384_v30  ;;  %3003 = vmatprep.subr.mxu1 %v2265_v37  ;;  %v3168_v49 = vld [vmem:[%s4049_s5 + $0x20] sm:$0xff]  ;;  %v3183_v30 = vld [vmem:[%s4049_s5 + $0x98] sm:$0xff] }
 0x2ce   :  { %3080 = vmatprep.subr.mxu0 %v2381_v33  ;;  %3004 = vmatpush2.msra.mxu1 %v2264_v34  ;;  %v2461_v37 = vld [vmem:[#allocation6 + $0xc98] sm:$0xff]  ;;  %v3167_v33 = vld [vmem:[%s4049_s5 + $0x18] sm:$0xff] }
 0x2cf   :  { %3081 = vmatpush2.msra.mxu0 %v2380_v2  ;;  %3005 = vmatprep.subr.mxu1 %v2261_v12  ;;  %v2460_v34 = vld [vmem:[#allocation6 + $0xc90] sm:$0xff]  ;;  %v3182_v2 = vld [vmem:[%s4049_s5 + $0x90] sm:$0xff]  ;;  %v2457_v12 = vld [vmem:[#allocation6 + $0xc78] sm:$0xff] }
 0x2d0   :  { %3083 = vmatmul.mubr.f32.vlgmr.msra.gmra.mxu0 %v2054_v10  ;;  %3006 = vmatpush2.msra.mxu1 %v2260_v38  ;;  %v2505_v10 = vld [vmem:[#allocation6 + $0xdf8] sm:$0xff]  ;;  %v3166_v38 = vld [vmem:[%s4049_s5 + $0x10] sm:$0xff] }
 0x2d1   :  { %3388 = vmatprep.subr.mxu0 %v3195_v39  ;;  %3007 = vmatprep.subr.mxu1 %v2257_v40  ;;  %v2456_v39 = vld [vmem:[#allocation6 + $0xc70] sm:$0xff]  ;;  %v3181_v40 = vld [vmem:[%s4049_s5 + $0x88] sm:$0xff] }
 0x2d2   :  { %3389 = vmatpush3.msra.mxu0 %v3179_v56  ;;  %3008 = vmatpush2.msra.mxu1 %v2256_v5  ;;  %v2453_v56 = vld [vmem:[#allocation6 + $0xc58] sm:$0xff]  ;;  %v3165_v5 = vld [vmem:[%s4049_s5 + $0x8] sm:$0xff] }
 0x2d3   :  { %3390 = vmatprep.subr.mxu0 %v3194_v35  ;;  %3009 = vmatprep.subr.mxu1 %v2253_v42  ;;  %v2452_v35 = vld [vmem:[#allocation6 + $0xc50] sm:$0xff]  ;;  %v3180_v42 = vld [vmem:[%s4049_s5 + $0x80] sm:$0xff] }
 0x2d4   :  { %3391 = vmatpush3.msra.mxu0 %v3178_v43  ;;  %3010 = vmatpush2.msra.mxu1 %v2252_v45  ;;  %v2449_v43 = vld [vmem:[#allocation6 + $0xc38] sm:$0xff] }
 0x2d5   :  { %3392 = vmatprep.subr.mxu0 %v3193_v20  ;;  %3012 = vmatmul.mubr.f32.vlgmr.msra.gmra.mxu1 %v2052_v32  ;;  %v2493_v32 = vld [vmem:[#allocation6 + $0xd98] sm:$0xff]  ;;  %v2448_v20 = vld [vmem:[#allocation6 + $0xc30] sm:$0xff] }
 0x2d6   :  { %3089 = vmatprep.subr.mxu1 %v2505_v10  ;;  %3153 = vmatprep.mubr.f32.mxu1 %v2057_v23  ;;  %v2492_v23 = vld [vmem:[#allocation6 + $0xd90] sm:$0xff]  ;;  %v3164_v45 = vld [vmem:[%s4049_s5] sm:$0xff] }
 0x2d7   :  { %3090 = vmatpush1.msra.mxu1 %v2504_v50  ;;  %3393 = vmatpush3.msra.mxu0 %v3177_v46  ;;  %v2445_v10 = vld [vmem:[#allocation6 + $0xc18] sm:$0xff]  ;;  %v2444_v50 = vld [vmem:[#allocation6 + $0xc10] sm:$0xff] }
 0x2d8   :  { %3091 = vmatprep.subr.mxu1 %v2501_v25  ;;  %3394 = vmatprep.subr.mxu0 %v3192_v48  ;;  %v2569_v25 = vld [vmem:[#allocation6 + $0xff8] sm:$0xff]  ;;  %v2568_v46 = vld [vmem:[#allocation6 + $0xff0] sm:$0xff] }
 0x2d9   :  { %3092 = vmatpush1.msra.mxu1 %v2500_v47  ;;  %3395 = vmatpush3.msra.mxu0 %v3176_v52  ;;  %v2565_v47 = vld [vmem:[#allocation6 + $0xfd8] sm:$0xff]  ;;  %v2564_v48 = vld [vmem:[#allocation6 + $0xfd0] sm:$0xff] }
 0x2da   :  { %3093 = vmatprep.subr.mxu1 %v2497_v51  ;;  %3396 = vmatprep.subr.mxu0 %v3191_v44  ;;  %v2561_v51 = vld [vmem:[#allocation6 + $0xfb8] sm:$0xff]  ;;  %v2560_v52 = vld [vmem:[#allocation6 + $0xfb0] sm:$0xff] }
 0x2db   :  { %3094 = vmatpush1.msra.mxu1 %v2496_v54  ;;  %3397 = vmatpush3.msra.mxu0 %v3175_v18  ;;  %v2557_v54 = vld [vmem:[#allocation6 + $0xf98] sm:$0xff]  ;;  %v2556_v44 = vld [vmem:[#allocation6 + $0xf90] sm:$0xff] }
 0x2dc   :  { %3095 = vmatprep.subr.mxu1 %v2493_v32  ;;  %3398 = vmatprep.subr.mxu0 %v3190_v55  ;;  %v2553_v32 = vld [vmem:[#allocation6 + $0xf78] sm:$0xff]  ;;  %v2552_v18 = vld [vmem:[#allocation6 + $0xf70] sm:$0xff] }
 0x2dd   :  { %3096 = vmatpush1.msra.mxu1 %v2492_v23  ;;  %3399 = vmatpush3.msra.mxu0 %v3174_v57  ;;  %v2549_v23 = vld [vmem:[#allocation6 + $0xf58] sm:$0xff]  ;;  %v2548_v55 = vld [vmem:[#allocation6 + $0xf50] sm:$0xff] }
 0x2de   :  { %3097 = vmatprep.subr.mxu1 %v2489_v36  ;;  %3400 = vmatprep.subr.mxu0 %v3189_v1  ;;  %v2545_v36 = vld [vmem:[#allocation6 + $0xf38] sm:$0xff]  ;;  %v2544_v57 = vld [vmem:[#allocation6 + $0xf30] sm:$0xff] }
 0x2df   :  { %3098 = vmatpush1.msra.mxu1 %v2488_v58  ;;  %3401 = vmatpush3.msra.mxu0 %v3173_v61  ;;  %v2541_v58 = vld [vmem:[#allocation6 + $0xf18] sm:$0xff]  ;;  %v2540_v1 = vld [vmem:[#allocation6 + $0xf10] sm:$0xff] }
 0x2e0   :  { %3099 = vmatprep.subr.mxu1 %v2485_v59  ;;  %3402 = vmatprep.subr.mxu0 %v3188_v0  ;;  %v2537_v59 = vld [vmem:[#allocation6 + $0xef8] sm:$0xff]  ;;  %v2536_v61 = vld [vmem:[#allocation6 + $0xef0] sm:$0xff] }
 0x2e1   :  { %3100 = vmatpush1.msra.mxu1 %v2484_v17  ;;  %3403 = vmatpush3.msra.mxu0 %v3172_v27  ;;  %v2533_v17 = vld [vmem:[#allocation6 + $0xed8] sm:$0xff]  ;;  %v2532_v0 = vld [vmem:[#allocation6 + $0xed0] sm:$0xff] }
 0x2e2   :  { %3101 = vmatprep.subr.mxu1 %v2481_v62  ;;  %3404 = vmatprep.subr.mxu0 %v3187_v6  ;;  %v2529_v62 = vld [vmem:[#allocation6 + $0xeb8] sm:$0xff]  ;;  %v2528_v27 = vld [vmem:[#allocation6 + $0xeb0] sm:$0xff] }
 0x2e3   :  { %3102 = vmatpush1.msra.mxu1 %v2480_v3  ;;  %3405 = vmatpush3.msra.mxu0 %v3171_v9  ;;  %v2525_v3 = vld [vmem:[#allocation6 + $0xe98] sm:$0xff]  ;;  %v2524_v6 = vld [vmem:[#allocation6 + $0xe90] sm:$0xff] }
 0x2e4   :  { %3103 = vmatprep.subr.mxu1 %v2477_v63  ;;  %3406 = vmatprep.subr.mxu0 %v3186_v13  ;;  %v2521_v63 = vld [vmem:[#allocation6 + $0xe78] sm:$0xff]  ;;  %v2520_v9 = vld [vmem:[#allocation6 + $0xe70] sm:$0xff] }
 0x2e5   :  { %3104 = vmatpush1.msra.mxu1 %v2476_v11  ;;  %3407 = vmatpush3.msra.mxu0 %v3170_v4  ;;  %v2517_v11 = vld [vmem:[#allocation6 + $0xe58] sm:$0xff]  ;;  %v2516_v13 = vld [vmem:[#allocation6 + $0xe50] sm:$0xff] }
 0x2e6   :  { %3105 = vmatprep.subr.mxu1 %v2473_v16  ;;  %3408 = vmatprep.subr.mxu0 %v3185_v15  ;;  %v2513_v16 = vld [vmem:[#allocation6 + $0xe38] sm:$0xff]  ;;  %v2512_v4 = vld [vmem:[#allocation6 + $0xe30] sm:$0xff] }
 0x2e7   :  { %3106 = vmatpush1.msra.mxu1 %v2472_v19  ;;  %3409 = vmatpush3.msra.mxu0 %v3169_v24  ;;  %v2509_v19 = vld [vmem:[#allocation6 + $0xe18] sm:$0xff]  ;;  %v2508_v15 = vld [vmem:[#allocation6 + $0xe10] sm:$0xff] }
 0x2e8   :  { %3107 = vmatprep.subr.mxu1 %v2469_v53  ;;  %3410 = vmatprep.subr.mxu0 %v3184_v26  ;;  %v3227_v53 = vld [vmem:[%s4049_s5 + $0x1f8] sm:$0xff]  ;;  %v3210_v26 = vld [vmem:[%s4049_s5 + $0x170] sm:$0xff] }
 0x2e9   :  { %3108 = vmatpush1.msra.mxu1 %v2468_v21  ;;  %3411 = vmatpush3.msra.mxu0 %v3168_v49  ;;  %v3211_v24 = vld [vmem:[%s4049_s5 + $0x178] sm:$0xff]  ;;  %v3226_v21 = vld [vmem:[%s4049_s5 + $0x1f0] sm:$0xff]  ;;  %v3208_v49 = vld [vmem:[%s4049_s5 + $0x160] sm:$0xff] }
 0x2ea   :  { %3109 = vmatprep.subr.mxu1 %v2465_v29  ;;  %3412 = vmatprep.subr.mxu0 %v3183_v30  ;;  %v3224_v29 = vld [vmem:[%s4049_s5 + $0x1e0] sm:$0xff]  ;;  %v3207_v30 = vld [vmem:[%s4049_s5 + $0x158] sm:$0xff] }
 0x2eb   :  { %3110 = vmatpush1.msra.mxu1 %v2464_v28  ;;  %3413 = vmatpush3.msra.mxu0 %v3167_v33  ;;  %v3223_v28 = vld [vmem:[%s4049_s5 + $0x1d8] sm:$0xff]  ;;  %v3206_v33 = vld [vmem:[%s4049_s5 + $0x150] sm:$0xff] }
 0x2ec   :  { %3111 = vmatprep.subr.mxu1 %v2461_v37  ;;  %3414 = vmatprep.subr.mxu0 %v3182_v2  ;;  %v3222_v37 = vld [vmem:[%s4049_s5 + $0x1d0] sm:$0xff]  ;;  %v3205_v2 = vld [vmem:[%s4049_s5 + $0x148] sm:$0xff] }
 0x2ed   :  { %3112 = vmatpush1.msra.mxu1 %v2460_v34  ;;  %3415 = vmatpush3.msra.mxu0 %v3166_v38  ;;  %v3221_v34 = vld [vmem:[%s4049_s5 + $0x1c8] sm:$0xff]  ;;  %v3204_v38 = vld [vmem:[%s4049_s5 + $0x140] sm:$0xff] }
 0x2ee   :  { %3113 = vmatprep.subr.mxu1 %v2457_v12  ;;  %3416 = vmatprep.subr.mxu0 %v3181_v40  ;;  %v3220_v12 = vld [vmem:[%s4049_s5 + $0x1c0] sm:$0xff]  ;;  %v3203_v40 = vld [vmem:[%s4049_s5 + $0x138] sm:$0xff] }
 0x2ef   :  { %3114 = vmatpush1.msra.mxu1 %v2456_v39  ;;  %3417 = vmatpush3.msra.mxu0 %v3165_v5  ;;  %v3219_v39 = vld [vmem:[%s4049_s5 + $0x1b8] sm:$0xff]  ;;  %v3202_v5 = vld [vmem:[%s4049_s5 + $0x130] sm:$0xff] }
 0x2f0   :  { %3115 = vmatprep.subr.mxu1 %v2453_v56  ;;  %3418 = vmatprep.subr.mxu0 %v3180_v42  ;;  %v3218_v56 = vld [vmem:[%s4049_s5 + $0x1b0] sm:$0xff]  ;;  %v3201_v42 = vld [vmem:[%s4049_s5 + $0x128] sm:$0xff] }
 0x2f1   :  { %3116 = vmatpush1.msra.mxu1 %v2452_v35  ;;  %3419 = vmatpush3.msra.mxu0 %v3164_v45  ;;  %v3217_v35 = vld [vmem:[%s4049_s5 + $0x1a8] sm:$0xff]  ;;  %v3200_v45 = vld [vmem:[%s4049_s5 + $0x120] sm:$0xff] }
 0x2f2   :  { %3117 = vmatprep.subr.mxu1 %v2449_v43  ;;  %v3216_v43 = vld [vmem:[%s4049_s5 + $0x1a0] sm:$0xff] }
 0x2f3   :  { %3118 = vmatpush1.msra.mxu1 %v2448_v20  ;;  %v2570_v20 = vld [vmem:[#allocation7] sm:$0xf] }
 0x2f4   :  { %3119 = vmatprep.subr.mxu1 %v2445_v10  ;;  %v2658_v10 = vpop.f32.mrf.mxu0 }
 0x2f5   :  { %3120 = vmatpush1.msra.mxu1 %v2444_v50  ;;  %v2575_v50 = vrot.slane %v2570_v20, %v872_v7  ;;  %v3199_v7 = vld [vmem:[%s4049_s5 + $0x118] sm:$0xff] }
 0x2f6   :  { %3121 = vmatprep.subr.mxu1 %v2569_v25  ;;  %v2579_v25 = vrot.slane %v2570_v20, %v876_v22 }
 0x2f7   :  { %3122 = vmatpush2.msra.mxu1 %v2568_v46  ;;  %v2660_v46 = vpop.f32.mrf.mxu0 }
 0x2f8   :  { %3123 = vmatprep.subr.mxu1 %v2565_v47  ;;  %v2659_v47 = vadd.f32 %v2658_v10, %v2575_v50 }
 0x2f9   :  { %3124 = vmatpush2.msra.mxu1 %v2564_v48  ;;  %v2729_v48 = vpop.f32.mrf.mxu1 }
 0x2fa   :  { %3125 = vmatprep.subr.mxu1 %v2561_v51 }
 0x2fb   :  { %3126 = vmatpush2.msra.mxu1 %v2560_v52  ;;  %v2661_v52 = vadd.f32 %v2660_v46, %v2579_v25 }
 0x2fc   :  { %3127 = vmatprep.subr.mxu1 %v2557_v54  ;;  %v2730_v54 = vadd.f32 %v2729_v48, %v2659_v47 }
 0x2fd   :  { %3128 = vmatpush2.msra.mxu1 %v2556_v44  ;;  %v2731_v44 = vpop.f32.mrf.mxu1 }
 0x2fe   :  { %3129 = vmatprep.subr.mxu1 %v2553_v32 }
 0x2ff   :  { %3130 = vmatpush2.msra.mxu1 %v2552_v18  ;;  %v2732_v18 = vadd.f32 %v2731_v44, %v2661_v52 }
 0x300   :  { %3131 = vmatprep.subr.mxu1 %v2549_v23 }
 0x301   :  { %3132 = vmatpush2.msra.mxu1 %v2548_v55 }
 0x302   :  { %3133 = vmatprep.subr.mxu1 %v2545_v36  ;;  %v3215_v36 = vld [vmem:[%s4049_s5 + $0x198] sm:$0xff] }
 0x303   :  { %3134 = vmatpush2.msra.mxu1 %v2544_v57 }
 0x304   :  { %3135 = vmatprep.subr.mxu1 %v2541_v58 }
 0x305   :  { %3136 = vmatpush2.msra.mxu1 %v2540_v1  ;;  %v3214_v1 = vld [vmem:[%s4049_s5 + $0x190] sm:$0xff] }
 0x306   :  { %3137 = vmatprep.subr.mxu1 %v2537_v59 }
 0x307   :  { %3138 = vmatpush2.msra.mxu1 %v2536_v61  ;;  %v3198_v61 = vld [vmem:[%s4049_s5 + $0x110] sm:$0xff] }
 0x308   :  { %3139 = vmatprep.subr.mxu1 %v2533_v17  ;;  %v3213_v17 = vld [vmem:[%s4049_s5 + $0x188] sm:$0xff] }
 0x309   :  { %3140 = vmatpush2.msra.mxu1 %v2532_v0 }
 0x30a   :  { %3141 = vmatprep.subr.mxu1 %v2529_v62  ;;  %v3197_v62 = vld [vmem:[%s4049_s5 + $0x108] sm:$0xff] }
 0x30b   :  { %3142 = vmatpush2.msra.mxu1 %v2528_v27  ;;  %v3212_v27 = vld [vmem:[%s4049_s5 + $0x180] sm:$0xff] }
 0x30c   :  { %3143 = vmatprep.subr.mxu1 %v2525_v3  ;;  %v3196_v3 = vld [vmem:[%s4049_s5 + $0x100] sm:$0xff] }
 0x30d   :  { %3144 = vmatpush2.msra.mxu1 %v2524_v6 }
 0x30e   :  { %3145 = vmatprep.subr.mxu1 %v2521_v63 }
 0x30f   :  { %3146 = vmatpush2.msra.mxu1 %v2520_v9  ;;  %v2800_v51 = vpop.f32.mrf.mxu0  ;;  %v2583_v9 = vrot.slane %v2570_v20, %v880_v41 }
 0x310   :  { %3147 = vmatprep.subr.mxu1 %v2517_v11  ;;  %v2801_v23 = vadd.f32 %v2800_v51, %v2730_v54 }
 0x311   :  { %3148 = vmatpush2.msra.mxu1 %v2516_v13  ;;  %v2802_v32 = vpop.f32.mrf.mxu0  ;;  %v2587_v13 = vrot.slane %v2570_v20, %v884_v8 }
 0x312   :  { %3149 = vmatprep.subr.mxu1 %v2513_v16  ;;  %v2803_v57 = vadd.f32 %v2802_v32, %v2732_v18 }
 0x313   :  { %3150 = vmatpush2.msra.mxu1 %v2512_v4 }
 0x314   :  { %3151 = vmatprep.subr.mxu1 %v2509_v19 }
 0x315   :  { %3152 = vmatpush2.msra.mxu1 %v2508_v15 }
 0x316   :  { %3154 = vmatmul.mubr.f32.vlgmr.msra.gmra.mxu1 %v2056_v31  ;;  %3423 = vmatprep.subr.mxu1 %v3227_v53  ;;  %v3209_v31 = vld [vmem:[%s4049_s5 + $0x168] sm:$0xff] }
 0x317   :  { %3424 = vmatpush3.msra.mxu1 %v3211_v24 }
 0x318   :  { %3425 = vmatprep.subr.mxu1 %v3226_v21 }
 0x319   :  { %3426 = vmatpush3.msra.mxu1 %v3210_v26 }
 0x31a   :  { %3427 = vmatprep.subr.mxu1 %v3225_v14 }
 0x31b   :  { %3428 = vmatpush3.msra.mxu1 %v3209_v31 }
 0x31c   :  { %3429 = vmatprep.subr.mxu1 %v3224_v29 }
 0x31d   :  { %3430 = vmatpush3.msra.mxu1 %v3208_v49 }
 0x31e   :  { %3431 = vmatprep.subr.mxu1 %v3223_v28 }
 0x31f   :  { %3432 = vmatpush3.msra.mxu1 %v3207_v30 }
 0x320   :  { %3433 = vmatprep.subr.mxu1 %v3222_v37 }
 0x321   :  { %3434 = vmatpush3.msra.mxu1 %v3206_v33 }
 0x322   :  { %3435 = vmatprep.subr.mxu1 %v3221_v34  ;;  %v3387_v34 = vld [vmem:[%s4050_s6] ss:$0 sm:$0xff] }
 0x323   :  { %3436 = vmatpush3.msra.mxu1 %v3205_v2 }
 0x324   :  { %3437 = vmatprep.subr.mxu1 %v3220_v12 }
 0x325   :  { %3438 = vmatpush3.msra.mxu1 %v3204_v38 }
 0x326   :  { %3439 = vmatprep.subr.mxu1 %v3219_v39 }
 0x327   :  { %3440 = vmatpush3.msra.mxu1 %v3203_v40 }
 0x328   :  { %3441 = vmatprep.subr.mxu1 %v3218_v56 }
 0x329   :  { %3442 = vmatpush3.msra.mxu1 %v3202_v5 }
 0x32a   :  { %3443 = vmatprep.subr.mxu1 %v3217_v35 }
 0x32b   :  { %3444 = vmatpush3.msra.mxu1 %v3201_v42 }
 0x32c   :  { %3445 = vmatprep.subr.mxu1 %v3216_v43 }
 0x32d   :  { %3446 = vmatpush3.msra.mxu1 %v3200_v45 }
 0x32e   :  { %3447 = vmatprep.subr.mxu1 %v3215_v36 }
 0x32f   :  { %3448 = vmatpush3.msra.mxu1 %v3199_v7 }
 0x330   :  { %3449 = vmatprep.subr.mxu1 %v3214_v1 }
 0x331   :  { %3450 = vmatpush3.msra.mxu1 %v3198_v61 }
 0x332   :  { %3451 = vmatprep.subr.mxu1 %v3213_v17 }
 0x333   :  { %3452 = vmatpush3.msra.mxu1 %v3197_v62 }
 0x334   :  { %3453 = vmatprep.subr.mxu1 %v3212_v27 }
 0x335   :  { %3454 = vmatpush3.msra.mxu1 %v3196_v3 }
 0x34f   :  { %v2942_v63 = vpop.f32.mrf.mxu0 }
 0x350   :  { %v2943_v4 = vadd.f32 %v2942_v63, %v2583_v9 }
 0x351   :  { %v2944_v16 = vpop.f32.mrf.mxu0 }
 0x352   :  { %v2945_v15 = vadd.f32 %v2944_v16, %v2587_v13 }
 0x355   :  { %v2871_v55 = vpop.f32.mrf.mxu1 }
 0x356   :  { %v2872_v22 = vadd.f32 %v2871_v55, %v2801_v23 }
 0x357   :  { %v2873_v58 = vpop.f32.mrf.mxu1 }
 0x358   :  { %v2874_v59 = vadd.f32 %v2873_v58, %v2803_v57  ;;  %v3160_v6 = vmax.f32 %v2872_v22, 0.0 }
 0x35a   :  { %v3161_v0 = vmax.f32 %v2874_v59, 0.0 }
 0x35c   :  { %3299 = vmatprep.mubr.f32.mxu0 %v3161_v0 }
 0x35d   :  { %3300 = vmatmul.mubr.f32.vlgmr.msra.gmra.mxu0 %v3160_v6 }
 0x390   :  { %v3084_v53 = vpop.f32.mrf.mxu0 }
 0x392   :  { %v3086_v26 = vpop.f32.mrf.mxu0 }
 0x395   :  { %v3013_v11 = vpop.f32.mrf.mxu1 }
 0x396   :  { %v3014_v24 = vadd.f32 %v3013_v11, %v2943_v4 }
 0x397   :  { %v3015_v19 = vpop.f32.mrf.mxu1 }
 0x398   :  { %v3016_v21 = vadd.f32 %v3015_v19, %v2945_v15  ;;  %v3085_v14 = vadd.f32 %v3084_v53, %v3014_v24 }
 0x39a   :  { %v3087_v29 = vadd.f32 %v3086_v26, %v3016_v21 }
 0x3d6   :  { %v3155_v31 = vpop.f32.mrf.mxu1 }
 0x3d7   :  { %v3156_v49 = vadd.f32 %v3155_v31, %v3085_v14 }
 0x3d8   :  { %v3157_v28 = vpop.f32.mrf.mxu1 }
 0x3d9   :  { %v3158_v30 = vadd.f32 %v3157_v28, %v3087_v29  ;;  %v3162_v41 = vmax.f32 %v3156_v49, 0.0 }
 0x3db   :  { %v3163_v37 = vmax.f32 %v3158_v30, 0.0 }
 0x3dd   :  { %3369 = vmatprep.mubr.f32.mxu1 %v3163_v37 }
 0x3de   :  { %3370 = vmatmul.mubr.f32.vlgmr.msra.gmra.mxu1 %v3162_v41 }
 0x41d   :  { %v3420_v60 = vpop.f32.mrf.mxu0 }
 0x41f   :  { %v3421_v8 = vpop.f32.mrf.mxu0 }
 0x420   :  { %v3422_v33 = vadd.f32 %v3421_v8, %v3420_v60 }
 0x422   :  { %v3302_v38 = vadd.f32 %v3422_v33, %v3387_v34 }
 0x49e   :  { %v3455_v2 = vpop.f32.mrf.mxu1 }
 0x4a0   :  { %v3456_v12 = vpop.f32.mrf.mxu1 }
 0x4a1   :  { %v3457_v39 = vadd.f32 %v3456_v12, %v3455_v2 }
 0x4a3   :  { %v3372_v40 = vadd.f32 %v3457_v39, %v3302_v38 }
 0x4a5   :  { %3375 = vst [vmem:[%s4051_s7] sm:$0xff] %v3372_v40 }
 0x4a6   :  { %3380 = vsyncpa [#allocation3], 1 }
 0x4a7   :  { %3381 = vsyncpa [#allocation5], 1 }
 0x4a8   :  { %3382 = vsyncpa [#allocation8], 1 }

</bundles_post_ra>
